<compile_context>
chip_gen: v7x
topology: tpu7x:2x2x1
jax: 0.10.0
libtpu: 0.0.40
codegen_flags: <defaults>
</compile_context>

<pallas_src>
import functools

import jax
import jax.numpy as jnp
import numpy as np
from jax.experimental import pallas as pl
from jax.experimental.pallas import tpu as pltpu


def _round_up(x, m):
    return (x + m - 1) // m * m


def _vmem_capacity_bytes():
    """Per-TensorCore VMEM capacity; conservative fallback if the query fails."""
    try:
        info = pltpu.get_tpu_info()
        cap = int(getattr(info, "vmem_capacity_bytes", 0) or 0)
        if cap > 0:
            return cap
    except Exception:
        pass
    return 64 * 1024 * 1024  # v7x per-TC size; safe lower bound for v5e/v6e too


# ---------------------------------------------------------------------------
# Shared LSTM chunk recurrence.  Gate order matches PyTorch: i, f, g, o.
#   x_ref    : (tt, tb, Dp)   bf16 time-major activation chunk
#   wih_ref  : (Dp, 4*Hp)     bf16
#   whh_ref  : (Hp, 4*Hp)     bf16
#   b_ref    : (1, 4*Hp)      f32 (b_ih + b_hh folded)
#   h_scr/c_scr : (tb, Hp)    f32 recurrent state, persists across time chunks
#   g_scr    : (tt, tb, 4*Hp) f32 per-chunk gate pre-activations
#   emit(k, h_new)            per-step output callback (h_new is f32 (tb, Hp))
# ---------------------------------------------------------------------------
def _lstm_recurrence(x_ref, wih_ref, whh_ref, b_ref, h_scr, c_scr, g_scr,
                     *, unroll, emit):
    tt, tb, Dp = x_ref.shape
    Hp = whh_ref.shape[0]

    # Reset recurrent state at the first time chunk of each batch tile.
    @pl.when(pl.program_id(1) == 0)
    def _():
        h_scr[...] = jnp.zeros_like(h_scr)
        c_scr[...] = jnp.zeros_like(c_scr)

    # Time-parallel input projection for the whole chunk: one MXU matmul with
    # M = tt*tb rows; bias folded in here (hoisted off the serial path).
    xb = x_ref[...].astype(jnp.bfloat16).reshape(tt * tb, Dp)
    gx = jnp.dot(xb, wih_ref[...], preferred_element_type=jnp.float32) + b_ref[...]
    g_scr[...] = gx.reshape(tt, tb, 4 * Hp)

    def step(k, carry):
        # (h, c) live in vregs across the serial loop: no per-step VMEM round trip.
        h, c = carry
        gates = g_scr[k] + jnp.dot(h.astype(jnp.bfloat16), whh_ref[...],
                                   preferred_element_type=jnp.float32)
        i = jax.nn.sigmoid(gates[:, 0 * Hp:1 * Hp])
        f = jax.nn.sigmoid(gates[:, 1 * Hp:2 * Hp])
        g = jnp.tanh(gates[:, 2 * Hp:3 * Hp])
        o = jax.nn.sigmoid(gates[:, 3 * Hp:4 * Hp])
        c_new = f * c + i * g
        h_new = o * jnp.tanh(c_new)
        emit(k, h_new)
        return (h_new, c_new)

    h_fin, c_fin = jax.lax.fori_loop(0, tt, step, (h_scr[...], c_scr[...]),
                                     unroll=unroll)
    # Persist recurrent state across time chunks (written once per chunk).
    h_scr[...] = h_fin
    c_scr[...] = c_fin


def lstm_layer_kernel(x_ref, wih_ref, whh_ref, b_ref, hseq_ref,
                      h_scr, c_scr, g_scr, *, unroll):
    """Intermediate layer: emits the full bf16 hidden sequence chunk."""
    def emit(k, h_new):
        hseq_ref[k] = h_new.astype(hseq_ref.dtype)

    _lstm_recurrence(x_ref, wih_ref, whh_ref, b_ref, h_scr, c_scr, g_scr,
                     unroll=unroll, emit=emit)


def lstm_last_layer_kernel(x_ref, wih_ref, whh_ref, b_ref, hlast_ref,
                           h_scr, c_scr, g_scr, *, unroll, last_local):
    """Top layer: only h[T-1] is consumed downstream, so the whole hseq HBM
    writeback is skipped; a single (tb, Hp) block is written during the last
    time chunk (output block is resident across the time axis)."""
    is_last_chunk = pl.program_id(1) == pl.num_programs(1) - 1

    def emit(k, h_new):
        @pl.when(jnp.logical_and(is_last_chunk, k == last_local))
        def _():
            hlast_ref[...] = h_new.astype(hlast_ref.dtype)

    _lstm_recurrence(x_ref, wih_ref, whh_ref, b_ref, h_scr, c_scr, g_scr,
                     unroll=unroll, emit=emit)


# ---------------------------------------------------------------------------
# Tile / unroll selection heuristics (all static at trace time).
# ---------------------------------------------------------------------------
def _pick_unroll(tb):
    # Full unroll is best at small batch tiles; larger tiles would spill vregs
    # (gates is a (tb, 4*Hp) f32 tensor per in-flight step), so cap the factor.
    if tb <= 32:
        return True
    if tb <= 128:
        return 4
    return 2


def _pick_tb(Bp):
    """Batch tile: multiple of 16 (bf16 sublane packing), dividing Bp, as large as
    possible (up to 256 to fill the MXU M dim) while keeping >= 2 batch tiles for
    the v7x megacore once the batch is large enough for the split to be cheap."""
    cap = 256
    if Bp >= 64:
        cap = min(cap, Bp // 2)
    tb = min(cap, Bp)
    tb = max(16, (tb // 16) * 16)
    while tb > 16 and Bp % tb != 0:
        tb -= 16
    return tb


def _fits(tt, tb, Dmax, Hp, budget):
    weights = 2 * (Dmax + Hp) * 4 * Hp * 2            # bf16, counted double-buffered
    acts = 2 * tt * tb * Dmax * 2 + 2 * tt * tb * Hp * 2
    scratch = tt * tb * 4 * Hp * 4 + 2 * tb * Hp * 4
    return weights + acts + scratch <= budget


def _select_tiles(T, Bp, Dmax, Hp, budget):
    tb = _pick_tb(Bp)
    tt = min(32, T)                                   # amortize per-grid-step overhead
    while tt > 4 and not _fits(tt, tb, Dmax, Hp, budget):
        tt = max(4, tt // 2)
    while tb > 16 and not _fits(tt, tb, Dmax, Hp, budget):
        tb = max(16, (tb // 2 // 16) * 16)
        while tb > 16 and Bp % tb != 0:
            tb -= 16
    return min(tt, T), tb


# ---------------------------------------------------------------------------
# pallas_call wrappers.
# ---------------------------------------------------------------------------
def _layer_call(kernel, out_shape, out_spec, x_tbd, wih_t, whh_t, b_row,
                *, tt, tb, vmem_limit):
    Tp, Bp, Dp = x_tbd.shape
    Hp = whh_t.shape[0]
    grid = (Bp // tb, Tp // tt)
    return pl.pallas_call(
        kernel,
        out_shape=out_shape,
        grid=grid,
        in_specs=[
            pl.BlockSpec((tt, tb, Dp), lambda b, t: (t, b, 0)),
            pl.BlockSpec((Dp, 4 * Hp), lambda b, t: (0, 0)),   # resident weights
            pl.BlockSpec((Hp, 4 * Hp), lambda b, t: (0, 0)),
            pl.BlockSpec((1, 4 * Hp), lambda b, t: (0, 0)),
        ],
        out_specs=out_spec,
        scratch_shapes=[
            pltpu.VMEM((tb, Hp), jnp.float32),            # h state
            pltpu.VMEM((tb, Hp), jnp.float32),            # c state
            pltpu.VMEM((tt, tb, 4 * Hp), jnp.float32),    # chunk gate pre-activations
        ],
        compiler_params=pltpu.CompilerParams(
            dimension_semantics=("parallel", "arbitrary"),
            vmem_limit_bytes=vmem_limit,
        ),
    )(x_tbd, wih_t, whh_t, b_row)


def run_lstm_layer(x_tbd, wih_t, whh_t, b_row, *, tt, tb, vmem_limit):
    Tp, Bp, _ = x_tbd.shape
    Hp = whh_t.shape[0]
    kern = functools.partial(lstm_layer_kernel, unroll=_pick_unroll(tb))
    out_shape = jax.ShapeDtypeStruct((Tp, Bp, Hp), jnp.bfloat16)
    out_spec = pl.BlockSpec((tt, tb, Hp), lambda b, t: (t, b, 0))
    return _layer_call(kern, out_shape, out_spec, x_tbd, wih_t, whh_t, b_row,
                       tt=tt, tb=tb, vmem_limit=vmem_limit)


def run_lstm_last_layer(x_tbd, wih_t, whh_t, b_row, *, tt, tb, vmem_limit, t_last):
    Tp, Bp, _ = x_tbd.shape
    Hp = whh_t.shape[0]
    kern = functools.partial(lstm_last_layer_kernel, unroll=_pick_unroll(tb),
                             last_local=t_last % tt)
    out_shape = jax.ShapeDtypeStruct((Bp, Hp), jnp.bfloat16)
    out_spec = pl.BlockSpec((tb, Hp), lambda b, t: (b, 0))
    return _layer_call(kern, out_shape, out_spec, x_tbd, wih_t, whh_t, b_row,
                       tt=tt, tb=tb, vmem_limit=vmem_limit)


# ---------------------------------------------------------------------------
# Classifier: out = relu(h_last @ W^T + b)   (bf16 inputs, f32 accumulate/output)
# ---------------------------------------------------------------------------
def classifier_kernel(h_ref, w_ref, b_ref, o_ref):
    logits = (jnp.dot(h_ref[...], w_ref[...], preferred_element_type=jnp.float32)
              + b_ref[...])
    o_ref[...] = jnp.maximum(logits, 0.0)


def run_classifier(h_last, w_t, b_row):
    Bp, Hp = h_last.shape
    Cp = w_t.shape[1]
    return pl.pallas_call(
        classifier_kernel,
        out_shape=jax.ShapeDtypeStruct((Bp, Cp), jnp.float32),
        grid=(1,),
        in_specs=[
            pl.BlockSpec((Bp, Hp), lambda i: (0, 0)),
            pl.BlockSpec((Hp, Cp), lambda i: (0, 0)),
            pl.BlockSpec((1, Cp), lambda i: (0, 0)),
        ],
        out_specs=pl.BlockSpec((Bp, Cp), lambda i: (0, 0)),
        compiler_params=pltpu.CompilerParams(dimension_semantics=("arbitrary",)),
    )(h_last, w_t, b_row)


# ---------------------------------------------------------------------------
# Parameter init (PyTorch nn.LSTM / nn.Linear shapes) and padded/transposed prep.
# ---------------------------------------------------------------------------
def init_params(key, in_dim, hidden_dim, n_layer, n_class):
    lstm_params = []
    k = 1.0 / float(hidden_dim) ** 0.5
    for layer in range(n_layer):
        d = in_dim if layer == 0 else hidden_dim
        key, k1, k2, k3, k4 = jax.random.split(key, 5)
        w_ih = jax.random.uniform(k1, (4 * hidden_dim, d), jnp.float32, -k, k)
        w_hh = jax.random.uniform(k2, (4 * hidden_dim, hidden_dim), jnp.float32, -k, k)
        b_ih = jax.random.uniform(k3, (4 * hidden_dim,), jnp.float32, -k, k)
        b_hh = jax.random.uniform(k4, (4 * hidden_dim,), jnp.float32, -k, k)
        lstm_params.append((w_ih, w_hh, b_ih, b_hh))
    key, k5, k6 = jax.random.split(key, 3)
    w_cls = jax.random.uniform(k5, (n_class, hidden_dim), jnp.float32, -k, k)
    b_cls = jax.random.uniform(k6, (n_class,), jnp.float32, -k, k)
    return lstm_params, (w_cls, b_cls)


def prepare_params(lstm_params, cls_params, in_dim, hidden_dim, n_class):
    """Zero-pad to lane-aligned shapes (each of the 4 gates gets its own 128-aligned
    lane slot), pre-transpose for row-major MXU dots, cast weights to bf16, fold
    b_ih + b_hh.  Padded hidden units have zero weights/bias so they stay exactly 0
    through the recurrence; padded batch rows are garbage but are sliced off."""
    H = hidden_dim
    Hp = _round_up(H, 128)
    Cp = _round_up(n_class, 128)
    prepped = []
    for layer, (w_ih, w_hh, b_ih, b_hh) in enumerate(lstm_params):
        D = in_dim if layer == 0 else hidden_dim
        Dp = _round_up(D, 128)
        wih = jnp.zeros((4, Hp, Dp), jnp.float32).at[:, :H, :D].set(w_ih.reshape(4, H, D))
        wih_t = jnp.transpose(wih, (2, 0, 1)).reshape(Dp, 4 * Hp).astype(jnp.bfloat16)
        whh = jnp.zeros((4, Hp, Hp), jnp.float32).at[:, :H, :H].set(w_hh.reshape(4, H, H))
        whh_t = jnp.transpose(whh, (2, 0, 1)).reshape(Hp, 4 * Hp).astype(jnp.bfloat16)
        b = jnp.zeros((4, Hp), jnp.float32).at[:, :H].set((b_ih + b_hh).reshape(4, H))
        prepped.append((wih_t, whh_t, b.reshape(1, 4 * Hp)))
    w_cls, b_cls = cls_params
    wc = jnp.zeros((Cp, Hp), jnp.float32).at[:n_class, :H].set(w_cls)
    wc_t = wc.T.astype(jnp.bfloat16)
    bc = jnp.zeros((1, Cp), jnp.float32).at[0, :n_class].set(b_cls)
    return prepped, (wc_t, bc)


@functools.partial(jax.jit, static_argnames=("n_class",))
def lstm_module_forward(x_btd, lstm_params, cls_params, n_class):
    """Matches LSTM_module.forward: x (B, T, D) batch_first -> (B, n_class)."""
    B, T, D = x_btd.shape
    Dp0 = lstm_params[0][0].shape[0]
    Hp = lstm_params[0][1].shape[0]

    cap = _vmem_capacity_bytes()
    vmem_limit = int(0.85 * cap)
    budget = int(0.60 * cap)              # tile-selection budget (pipeline headroom)

    Bp = _round_up(B, 16)                 # bf16 sublane alignment for batch tiles
    tt, tb = _select_tiles(T, Bp, max(Dp0, Hp), Hp, budget)
    Tp = _round_up(T, tt)

    # Layer-0 input: one-time layout pass to time-major padded bf16 (Tp, Bp, Dp).
    # All inter-layer activations stay time-major bf16 (no further transposes and
    # half the HBM traffic of f32).
    x = jnp.transpose(x_btd, (1, 0, 2))
    x = jnp.pad(x, ((0, Tp - T), (0, Bp - B), (0, Dp0 - D))).astype(jnp.bfloat16)

    h = x
    for (wih_t, whh_t, b_row) in lstm_params[:-1]:
        h = run_lstm_layer(h, wih_t, whh_t, b_row, tt=tt, tb=tb,
                           vmem_limit=vmem_limit)
    wih_t, whh_t, b_row = lstm_params[-1]
    # Top layer emits only h[T-1]; its full hidden sequence never touches HBM.
    h_last = run_lstm_last_layer(h, wih_t, whh_t, b_row, tt=tt, tb=tb,
                                 vmem_limit=vmem_limit, t_last=T - 1)

    w_t, b_cls = cls_params
    out_p = run_classifier(h_last, w_t, b_cls)        # relu(linear(h_last)), (Bp, Cp)
    return out_p[:B, :n_class]


# ---------------------------------------------------------------------------
# Pure-JAX f32 reference for correctness checking (PyTorch gate order i,f,g,o).
# ---------------------------------------------------------------------------
def lstm_module_reference(x, raw_lstm, raw_cls):
    B, T, _ = x.shape
    h_seq = x
    for (w_ih, w_hh, b_ih, b_hh) in raw_lstm:
        H = w_hh.shape[1]
        h = jnp.zeros((B, H), jnp.float32)
        c = jnp.zeros((B, H), jnp.float32)
        outs = []
        for t in range(T):
            gates = h_seq[:, t, :] @ w_ih.T + b_ih + h @ w_hh.T + b_hh
            i, f, g, o = jnp.split(gates, 4, axis=-1)
            i = jax.nn.sigmoid(i)
            f = jax.nn.sigmoid(f)
            g = jnp.tanh(g)
            o = jax.nn.sigmoid(o)
            c = f * c + i * g
            h = o * jnp.tanh(c)
            outs.append(h)
        h_seq = jnp.stack(outs, axis=1)
    w_cls, b_cls = raw_cls
    return jax.nn.relu(h_seq[:, -1, :] @ w_cls.T + b_cls)


if __name__ == "__main__":
    B, T, D, H, L, C = 2, 8, 16, 32, 2, 8
    key = jax.random.PRNGKey(0)
    key, kx, kp = jax.random.split(key, 3)
    x = jax.random.normal(kx, (B, T, D), dtype=jnp.float32)
    raw_lstm, raw_cls = init_params(kp, D, H, L, C)
    lstm_params, cls_params = prepare_params(raw_lstm, raw_cls, D, H, C)

    out = lstm_module_forward(x, lstm_params, cls_params, n_class=C)
    out = jax.block_until_ready(out)
    assert out.shape == (B, C) and out.dtype == jnp.float32

    # bf16 MXU path vs f32 PyTorch-equivalent reference: loose tolerance.
    ref = jax.block_until_ready(lstm_module_reference(x, raw_lstm, raw_cls))
    np.testing.assert_allclose(np.asarray(out), np.asarray(ref), rtol=5e-2, atol=5e-2)

    print("KERNEL_OK")
</pallas_src>

<mosaic_0001>
module attributes {stable_mosaic.version = 11 : i64} {
  func.func @lstm_layer_kernel(%arg0: i32, %arg1: i32, %arg2: memref<8x16x128xbf16, #tpu.memory_space<vmem>>, %arg3: memref<128x512xbf16, #tpu.memory_space<vmem>>, %arg4: memref<128x512xbf16, #tpu.memory_space<vmem>>, %arg5: memref<1x512xf32, #tpu.memory_space<vmem>>, %arg6: memref<8x16x128xbf16, #tpu.memory_space<vmem>>, %arg7: memref<16x128xf32, #tpu.memory_space<vmem>>, %arg8: memref<16x128xf32, #tpu.memory_space<vmem>>, %arg9: memref<8x16x512xf32, #tpu.memory_space<vmem>>) attributes {dimension_semantics = [#tpu.dimension_semantics<parallel>, #tpu.dimension_semantics<arbitrary>], iteration_bounds = array<i64: 1, 1>, scalar_prefetch = 0 : i64, scratch_operands = 3 : i64, tpu.core_type = #tpu.core_type<tc>, window_params = [{transform_indices = @transform_0, window_bounds = array<i64: 8, 16, 128>}, {pipeline_mode = #tpu.pipeline_mode<synchronous>, transform_indices = @transform_1, window_bounds = array<i64: 128, 512>}, {pipeline_mode = #tpu.pipeline_mode<synchronous>, transform_indices = @transform_2, window_bounds = array<i64: 128, 512>}, {pipeline_mode = #tpu.pipeline_mode<synchronous>, transform_indices = @transform_3, window_bounds = array<i64: 1, 512>}, {transform_indices = @transform_4, window_bounds = array<i64: 8, 16, 128>}]} {
    %c0_i32 = arith.constant 0 : i32
    %0 = arith.cmpi eq, %arg1, %c0_i32 : i32
    %1 = arith.extui %0 : i1 to i32
    %c0_i32_0 = arith.constant 0 : i32
    %2 = arith.cmpi ne, %1, %c0_i32_0 : i32
    scf.if %2 {
      %cst_99 = arith.constant 0.000000e+00 : f32
      %312 = vector.broadcast %cst_99 : f32 to vector<16x128xf32>
      %c0_100 = arith.constant 0 : index
      %c0_101 = arith.constant 0 : index
      %313 = vector.load %arg7[%c0_100, %c0_101] : memref<16x128xf32, #tpu.memory_space<vmem>>, vector<16x128xf32>
      tpu.vector_store %arg7[%c0_100, %c0_101], %312 {strides = array<i32>} : memref<16x128xf32, #tpu.memory_space<vmem>>, vector<16x128xf32>,
      %cst_102 = arith.constant 0.000000e+00 : f32
      %314 = vector.broadcast %cst_102 : f32 to vector<16x128xf32>
      %c0_103 = arith.constant 0 : index
      %c0_104 = arith.constant 0 : index
      %315 = vector.load %arg8[%c0_103, %c0_104] : memref<16x128xf32, #tpu.memory_space<vmem>>, vector<16x128xf32>
      tpu.vector_store %arg8[%c0_103, %c0_104], %314 {strides = array<i32>} : memref<16x128xf32, #tpu.memory_space<vmem>>, vector<16x128xf32>,
    } else {
    }
    %c0 = arith.constant 0 : index
    %c0_1 = arith.constant 0 : index
    %c0_2 = arith.constant 0 : index
    %3 = vector.load %arg2[%c0, %c0_1, %c0_2] : memref<8x16x128xbf16, #tpu.memory_space<vmem>>, vector<8x16x128xbf16>
    %4 = vector.shape_cast %3 : vector<8x16x128xbf16> to vector<128x128xbf16>
    %c0_3 = arith.constant 0 : index
    %c0_4 = arith.constant 0 : index
    %5 = vector.load %arg3[%c0_3, %c0_4] : memref<128x512xbf16, #tpu.memory_space<vmem>>, vector<128x512xbf16>
    %cst = arith.constant dense<0.000000e+00> : vector<128x512xf32>
    %6 = tpu.matmul %4, %5, %cst {dimension_numbers = #tpu.dot_dimension_numbers<[1], [0], [0], [1], [0, 0, 1, 1], [], []>} : vector<128x128xbf16>, vector<128x512xbf16>, vector<128x512xf32> -> vector<128x512xf32>
    %c0_5 = arith.constant 0 : index
    %c0_6 = arith.constant 0 : index
    %7 = vector.load %arg5[%c0_5, %c0_6] : memref<1x512xf32, #tpu.memory_space<vmem>>, vector<1x512xf32>
    %8 = vector.broadcast %7 : vector<1x512xf32> to vector<128x512xf32>
    %9 = arith.addf %6, %8 : vector<128x512xf32>
    %10 = vector.shape_cast %9 : vector<128x512xf32> to vector<8x16x512xf32>
    %c0_7 = arith.constant 0 : index
    %c0_8 = arith.constant 0 : index
    %c0_9 = arith.constant 0 : index
    %11 = vector.load %arg9[%c0_7, %c0_8, %c0_9] : memref<8x16x512xf32, #tpu.memory_space<vmem>>, vector<8x16x512xf32>
    tpu.vector_store %arg9[%c0_7, %c0_8, %c0_9], %10 {strides = array<i32>} : memref<8x16x512xf32, #tpu.memory_space<vmem>>, vector<8x16x512xf32>,
    %c0_10 = arith.constant 0 : index
    %c0_11 = arith.constant 0 : index
    %12 = vector.load %arg7[%c0_10, %c0_11] : memref<16x128xf32, #tpu.memory_space<vmem>>, vector<16x128xf32>
    %c0_12 = arith.constant 0 : index
    %c0_13 = arith.constant 0 : index
    %13 = vector.load %arg8[%c0_12, %c0_13] : memref<16x128xf32, #tpu.memory_space<vmem>>, vector<16x128xf32>
    %c0_i32_14 = arith.constant 0 : i32
    %14 = arith.index_cast %c0_i32_14 : i32 to index
    %c0_15 = arith.constant 0 : index
    %c0_16 = arith.constant 0 : index
    %15 = vector.load %arg9[%14, %c0_15, %c0_16] : memref<8x16x512xf32, #tpu.memory_space<vmem>>, vector<1x16x512xf32>
    %16 = vector.shape_cast %15 : vector<1x16x512xf32> to vector<16x512xf32>
    %17 = arith.truncf %12 : vector<16x128xf32> to vector<16x128xbf16>
    %c0_17 = arith.constant 0 : index
    %c0_18 = arith.constant 0 : index
    %18 = vector.load %arg4[%c0_17, %c0_18] : memref<128x512xbf16, #tpu.memory_space<vmem>>, vector<128x512xbf16>
    %cst_19 = arith.constant dense<0.000000e+00> : vector<16x512xf32>
    %19 = tpu.matmul %17, %18, %cst_19 {dimension_numbers = #tpu.dot_dimension_numbers<[1], [0], [0], [1], [0, 0, 1, 1], [], []>} : vector<16x128xbf16>, vector<128x512xbf16>, vector<16x512xf32> -> vector<16x512xf32>
    %20 = arith.addf %16, %19 : vector<16x512xf32>
    %21 = vector.extract_strided_slice %20 {offsets = [0, 0], sizes = [16, 128], strides = [1, 1]} : vector<16x512xf32> to vector<16x128xf32>
    %22 = arith.negf %21 : vector<16x128xf32>
    %23 = math.exp %22 : vector<16x128xf32>
    %cst_20 = arith.constant 1.000000e+00 : f32
    %24 = vector.broadcast %cst_20 : f32 to vector<16x128xf32>
    %25 = arith.addf %24, %23 : vector<16x128xf32>
    %26 = arith.divf %24, %25 : vector<16x128xf32>
    %27 = vector.extract_strided_slice %20 {offsets = [0, 128], sizes = [16, 128], strides = [1, 1]} : vector<16x512xf32> to vector<16x128xf32>
    %28 = arith.negf %27 : vector<16x128xf32>
    %29 = math.exp %28 : vector<16x128xf32>
    %cst_21 = arith.constant 1.000000e+00 : f32
    %30 = vector.broadcast %cst_21 : f32 to vector<16x128xf32>
    %31 = arith.addf %30, %29 : vector<16x128xf32>
    %32 = arith.divf %30, %31 : vector<16x128xf32>
    %33 = vector.extract_strided_slice %20 {offsets = [0, 256], sizes = [16, 128], strides = [1, 1]} : vector<16x512xf32> to vector<16x128xf32>
    %34 = math.tanh %33 : vector<16x128xf32>
    %35 = vector.extract_strided_slice %20 {offsets = [0, 384], sizes = [16, 128], strides = [1, 1]} : vector<16x512xf32> to vector<16x128xf32>
    %36 = arith.negf %35 : vector<16x128xf32>
    %37 = math.exp %36 : vector<16x128xf32>
    %cst_22 = arith.constant 1.000000e+00 : f32
    %38 = vector.broadcast %cst_22 : f32 to vector<16x128xf32>
    %39 = arith.addf %38, %37 : vector<16x128xf32>
    %40 = arith.divf %38, %39 : vector<16x128xf32>
    %41 = arith.mulf %32, %13 : vector<16x128xf32>
    %42 = arith.mulf %26, %34 : vector<16x128xf32>
    %43 = arith.addf %41, %42 : vector<16x128xf32>
    %44 = math.tanh %43 : vector<16x128xf32>
    %45 = arith.mulf %40, %44 : vector<16x128xf32>
    %46 = arith.truncf %45 : vector<16x128xf32> to vector<16x128xbf16>
    %47 = arith.index_cast %c0_i32_14 : i32 to index
    %c0_23 = arith.constant 0 : index
    %c0_24 = arith.constant 0 : index
    %48 = vector.load %arg6[%47, %c0_23, %c0_24] : memref<8x16x128xbf16, #tpu.memory_space<vmem>>, vector<1x16x128xbf16>
    %49 = vector.shape_cast %48 : vector<1x16x128xbf16> to vector<16x128xbf16>
    %50 = vector.shape_cast %46 : vector<16x128xbf16> to vector<1x16x128xbf16>
    tpu.vector_store %arg6[%47, %c0_23, %c0_24], %50 {strides = array<i32>} : memref<8x16x128xbf16, #tpu.memory_space<vmem>>, vector<1x16x128xbf16>,
    %c1_i32 = arith.constant 1 : i32
    %51 = arith.index_cast %c1_i32 : i32 to index
    %c0_25 = arith.constant 0 : index
    %c0_26 = arith.constant 0 : index
    %52 = vector.load %arg9[%51, %c0_25, %c0_26] : memref<8x16x512xf32, #tpu.memory_space<vmem>>, vector<1x16x512xf32>
    %53 = vector.shape_cast %52 : vector<1x16x512xf32> to vector<16x512xf32>
    %54 = arith.truncf %45 : vector<16x128xf32> to vector<16x128xbf16>
    %c0_27 = arith.constant 0 : index
    %c0_28 = arith.constant 0 : index
    %55 = vector.load %arg4[%c0_27, %c0_28] : memref<128x512xbf16, #tpu.memory_space<vmem>>, vector<128x512xbf16>
    %cst_29 = arith.constant dense<0.000000e+00> : vector<16x512xf32>
    %56 = tpu.matmul %54, %55, %cst_29 {dimension_numbers = #tpu.dot_dimension_numbers<[1], [0], [0], [1], [0, 0, 1, 1], [], []>} : vector<16x128xbf16>, vector<128x512xbf16>, vector<16x512xf32> -> vector<16x512xf32>
    %57 = arith.addf %53, %56 : vector<16x512xf32>
    %58 = vector.extract_strided_slice %57 {offsets = [0, 0], sizes = [16, 128], strides = [1, 1]} : vector<16x512xf32> to vector<16x128xf32>
    %59 = arith.negf %58 : vector<16x128xf32>
    %60 = math.exp %59 : vector<16x128xf32>
    %cst_30 = arith.constant 1.000000e+00 : f32
    %61 = vector.broadcast %cst_30 : f32 to vector<16x128xf32>
    %62 = arith.addf %61, %60 : vector<16x128xf32>
    %63 = arith.divf %61, %62 : vector<16x128xf32>
    %64 = vector.extract_strided_slice %57 {offsets = [0, 128], sizes = [16, 128], strides = [1, 1]} : vector<16x512xf32> to vector<16x128xf32>
    %65 = arith.negf %64 : vector<16x128xf32>
    %66 = math.exp %65 : vector<16x128xf32>
    %cst_31 = arith.constant 1.000000e+00 : f32
    %67 = vector.broadcast %cst_31 : f32 to vector<16x128xf32>
    %68 = arith.addf %67, %66 : vector<16x128xf32>
    %69 = arith.divf %67, %68 : vector<16x128xf32>
    %70 = vector.extract_strided_slice %57 {offsets = [0, 256], sizes = [16, 128], strides = [1, 1]} : vector<16x512xf32> to vector<16x128xf32>
    %71 = math.tanh %70 : vector<16x128xf32>
    %72 = vector.extract_strided_slice %57 {offsets = [0, 384], sizes = [16, 128], strides = [1, 1]} : vector<16x512xf32> to vector<16x128xf32>
    %73 = arith.negf %72 : vector<16x128xf32>
    %74 = math.exp %73 : vector<16x128xf32>
    %cst_32 = arith.constant 1.000000e+00 : f32
    %75 = vector.broadcast %cst_32 : f32 to vector<16x128xf32>
    %76 = arith.addf %75, %74 : vector<16x128xf32>
    %77 = arith.divf %75, %76 : vector<16x128xf32>
    %78 = arith.mulf %69, %43 : vector<16x128xf32>
    %79 = arith.mulf %63, %71 : vector<16x128xf32>
    %80 = arith.addf %78, %79 : vector<16x128xf32>
    %81 = math.tanh %80 : vector<16x128xf32>
    %82 = arith.mulf %77, %81 : vector<16x128xf32>
    %83 = arith.truncf %82 : vector<16x128xf32> to vector<16x128xbf16>
    %84 = arith.index_cast %c1_i32 : i32 to index
    %c0_33 = arith.constant 0 : index
    %c0_34 = arith.constant 0 : index
    %85 = vector.load %arg6[%84, %c0_33, %c0_34] : memref<8x16x128xbf16, #tpu.memory_space<vmem>>, vector<1x16x128xbf16>
    %86 = vector.shape_cast %85 : vector<1x16x128xbf16> to vector<16x128xbf16>
    %87 = vector.shape_cast %83 : vector<16x128xbf16> to vector<1x16x128xbf16>
    tpu.vector_store %arg6[%84, %c0_33, %c0_34], %87 {strides = array<i32>} : memref<8x16x128xbf16, #tpu.memory_space<vmem>>, vector<1x16x128xbf16>,
    %c2_i32 = arith.constant 2 : i32
    %88 = arith.index_cast %c2_i32 : i32 to index
    %c0_35 = arith.constant 0 : index
    %c0_36 = arith.constant 0 : index
    %89 = vector.load %arg9[%88, %c0_35, %c0_36] : memref<8x16x512xf32, #tpu.memory_space<vmem>>, vector<1x16x512xf32>
    %90 = vector.shape_cast %89 : vector<1x16x512xf32> to vector<16x512xf32>
    %91 = arith.truncf %82 : vector<16x128xf32> to vector<16x128xbf16>
    %c0_37 = arith.constant 0 : index
    %c0_38 = arith.constant 0 : index
    %92 = vector.load %arg4[%c0_37, %c0_38] : memref<128x512xbf16, #tpu.memory_space<vmem>>, vector<128x512xbf16>
    %cst_39 = arith.constant dense<0.000000e+00> : vector<16x512xf32>
    %93 = tpu.matmul %91, %92, %cst_39 {dimension_numbers = #tpu.dot_dimension_numbers<[1], [0], [0], [1], [0, 0, 1, 1], [], []>} : vector<16x128xbf16>, vector<128x512xbf16>, vector<16x512xf32> -> vector<16x512xf32>
    %94 = arith.addf %90, %93 : vector<16x512xf32>
    %95 = vector.extract_strided_slice %94 {offsets = [0, 0], sizes = [16, 128], strides = [1, 1]} : vector<16x512xf32> to vector<16x128xf32>
    %96 = arith.negf %95 : vector<16x128xf32>
    %97 = math.exp %96 : vector<16x128xf32>
    %cst_40 = arith.constant 1.000000e+00 : f32
    %98 = vector.broadcast %cst_40 : f32 to vector<16x128xf32>
    %99 = arith.addf %98, %97 : vector<16x128xf32>
    %100 = arith.divf %98, %99 : vector<16x128xf32>
    %101 = vector.extract_strided_slice %94 {offsets = [0, 128], sizes = [16, 128], strides = [1, 1]} : vector<16x512xf32> to vector<16x128xf32>
    %102 = arith.negf %101 : vector<16x128xf32>
    %103 = math.exp %102 : vector<16x128xf32>
    %cst_41 = arith.constant 1.000000e+00 : f32
    %104 = vector.broadcast %cst_41 : f32 to vector<16x128xf32>
    %105 = arith.addf %104, %103 : vector<16x128xf32>
    %106 = arith.divf %104, %105 : vector<16x128xf32>
    %107 = vector.extract_strided_slice %94 {offsets = [0, 256], sizes = [16, 128], strides = [1, 1]} : vector<16x512xf32> to vector<16x128xf32>
    %108 = math.tanh %107 : vector<16x128xf32>
    %109 = vector.extract_strided_slice %94 {offsets = [0, 384], sizes = [16, 128], strides = [1, 1]} : vector<16x512xf32> to vector<16x128xf32>
    %110 = arith.negf %109 : vector<16x128xf32>
    %111 = math.exp %110 : vector<16x128xf32>
    %cst_42 = arith.constant 1.000000e+00 : f32
    %112 = vector.broadcast %cst_42 : f32 to vector<16x128xf32>
    %113 = arith.addf %112, %111 : vector<16x128xf32>
    %114 = arith.divf %112, %113 : vector<16x128xf32>
    %115 = arith.mulf %106, %80 : vector<16x128xf32>
    %116 = arith.mulf %100, %108 : vector<16x128xf32>
    %117 = arith.addf %115, %116 : vector<16x128xf32>
    %118 = math.tanh %117 : vector<16x128xf32>
    %119 = arith.mulf %114, %118 : vector<16x128xf32>
    %120 = arith.truncf %119 : vector<16x128xf32> to vector<16x128xbf16>
    %121 = arith.index_cast %c2_i32 : i32 to index
    %c0_43 = arith.constant 0 : index
    %c0_44 = arith.constant 0 : index
    %122 = vector.load %arg6[%121, %c0_43, %c0_44] : memref<8x16x128xbf16, #tpu.memory_space<vmem>>, vector<1x16x128xbf16>
    %123 = vector.shape_cast %122 : vector<1x16x128xbf16> to vector<16x128xbf16>
    %124 = vector.shape_cast %120 : vector<16x128xbf16> to vector<1x16x128xbf16>
    tpu.vector_store %arg6[%121, %c0_43, %c0_44], %124 {strides = array<i32>} : memref<8x16x128xbf16, #tpu.memory_space<vmem>>, vector<1x16x128xbf16>,
    %c3_i32 = arith.constant 3 : i32
    %125 = arith.index_cast %c3_i32 : i32 to index
    %c0_45 = arith.constant 0 : index
    %c0_46 = arith.constant 0 : index
    %126 = vector.load %arg9[%125, %c0_45, %c0_46] : memref<8x16x512xf32, #tpu.memory_space<vmem>>, vector<1x16x512xf32>
    %127 = vector.shape_cast %126 : vector<1x16x512xf32> to vector<16x512xf32>
    %128 = arith.truncf %119 : vector<16x128xf32> to vector<16x128xbf16>
    %c0_47 = arith.constant 0 : index
    %c0_48 = arith.constant 0 : index
    %129 = vector.load %arg4[%c0_47, %c0_48] : memref<128x512xbf16, #tpu.memory_space<vmem>>, vector<128x512xbf16>
    %cst_49 = arith.constant dense<0.000000e+00> : vector<16x512xf32>
    %130 = tpu.matmul %128, %129, %cst_49 {dimension_numbers = #tpu.dot_dimension_numbers<[1], [0], [0], [1], [0, 0, 1, 1], [], []>} : vector<16x128xbf16>, vector<128x512xbf16>, vector<16x512xf32> -> vector<16x512xf32>
    %131 = arith.addf %127, %130 : vector<16x512xf32>
    %132 = vector.extract_strided_slice %131 {offsets = [0, 0], sizes = [16, 128], strides = [1, 1]} : vector<16x512xf32> to vector<16x128xf32>
    %133 = arith.negf %132 : vector<16x128xf32>
    %134 = math.exp %133 : vector<16x128xf32>
    %cst_50 = arith.constant 1.000000e+00 : f32
    %135 = vector.broadcast %cst_50 : f32 to vector<16x128xf32>
    %136 = arith.addf %135, %134 : vector<16x128xf32>
    %137 = arith.divf %135, %136 : vector<16x128xf32>
    %138 = vector.extract_strided_slice %131 {offsets = [0, 128], sizes = [16, 128], strides = [1, 1]} : vector<16x512xf32> to vector<16x128xf32>
    %139 = arith.negf %138 : vector<16x128xf32>
    %140 = math.exp %139 : vector<16x128xf32>
    %cst_51 = arith.constant 1.000000e+00 : f32
    %141 = vector.broadcast %cst_51 : f32 to vector<16x128xf32>
    %142 = arith.addf %141, %140 : vector<16x128xf32>
    %143 = arith.divf %141, %142 : vector<16x128xf32>
    %144 = vector.extract_strided_slice %131 {offsets = [0, 256], sizes = [16, 128], strides = [1, 1]} : vector<16x512xf32> to vector<16x128xf32>
    %145 = math.tanh %144 : vector<16x128xf32>
    %146 = vector.extract_strided_slice %131 {offsets = [0, 384], sizes = [16, 128], strides = [1, 1]} : vector<16x512xf32> to vector<16x128xf32>
    %147 = arith.negf %146 : vector<16x128xf32>
    %148 = math.exp %147 : vector<16x128xf32>
    %cst_52 = arith.constant 1.000000e+00 : f32
    %149 = vector.broadcast %cst_52 : f32 to vector<16x128xf32>
    %150 = arith.addf %149, %148 : vector<16x128xf32>
    %151 = arith.divf %149, %150 : vector<16x128xf32>
    %152 = arith.mulf %143, %117 : vector<16x128xf32>
    %153 = arith.mulf %137, %145 : vector<16x128xf32>
    %154 = arith.addf %152, %153 : vector<16x128xf32>
    %155 = math.tanh %154 : vector<16x128xf32>
    %156 = arith.mulf %151, %155 : vector<16x128xf32>
    %157 = arith.truncf %156 : vector<16x128xf32> to vector<16x128xbf16>
    %158 = arith.index_cast %c3_i32 : i32 to index
    %c0_53 = arith.constant 0 : index
    %c0_54 = arith.constant 0 : index
    %159 = vector.load %arg6[%158, %c0_53, %c0_54] : memref<8x16x128xbf16, #tpu.memory_space<vmem>>, vector<1x16x128xbf16>
    %160 = vector.shape_cast %159 : vector<1x16x128xbf16> to vector<16x128xbf16>
    %161 = vector.shape_cast %157 : vector<16x128xbf16> to vector<1x16x128xbf16>
    tpu.vector_store %arg6[%158, %c0_53, %c0_54], %161 {strides = array<i32>} : memref<8x16x128xbf16, #tpu.memory_space<vmem>>, vector<1x16x128xbf16>,
    %c4_i32 = arith.constant 4 : i32
    %162 = arith.index_cast %c4_i32 : i32 to index
    %c0_55 = arith.constant 0 : index
    %c0_56 = arith.constant 0 : index
    %163 = vector.load %arg9[%162, %c0_55, %c0_56] : memref<8x16x512xf32, #tpu.memory_space<vmem>>, vector<1x16x512xf32>
    %164 = vector.shape_cast %163 : vector<1x16x512xf32> to vector<16x512xf32>
    %165 = arith.truncf %156 : vector<16x128xf32> to vector<16x128xbf16>
    %c0_57 = arith.constant 0 : index
    %c0_58 = arith.constant 0 : index
    %166 = vector.load %arg4[%c0_57, %c0_58] : memref<128x512xbf16, #tpu.memory_space<vmem>>, vector<128x512xbf16>
    %cst_59 = arith.constant dense<0.000000e+00> : vector<16x512xf32>
    %167 = tpu.matmul %165, %166, %cst_59 {dimension_numbers = #tpu.dot_dimension_numbers<[1], [0], [0], [1], [0, 0, 1, 1], [], []>} : vector<16x128xbf16>, vector<128x512xbf16>, vector<16x512xf32> -> vector<16x512xf32>
    %168 = arith.addf %164, %167 : vector<16x512xf32>
    %169 = vector.extract_strided_slice %168 {offsets = [0, 0], sizes = [16, 128], strides = [1, 1]} : vector<16x512xf32> to vector<16x128xf32>
    %170 = arith.negf %169 : vector<16x128xf32>
    %171 = math.exp %170 : vector<16x128xf32>
    %cst_60 = arith.constant 1.000000e+00 : f32
    %172 = vector.broadcast %cst_60 : f32 to vector<16x128xf32>
    %173 = arith.addf %172, %171 : vector<16x128xf32>
    %174 = arith.divf %172, %173 : vector<16x128xf32>
    %175 = vector.extract_strided_slice %168 {offsets = [0, 128], sizes = [16, 128], strides = [1, 1]} : vector<16x512xf32> to vector<16x128xf32>
    %176 = arith.negf %175 : vector<16x128xf32>
    %177 = math.exp %176 : vector<16x128xf32>
    %cst_61 = arith.constant 1.000000e+00 : f32
    %178 = vector.broadcast %cst_61 : f32 to vector<16x128xf32>
    %179 = arith.addf %178, %177 : vector<16x128xf32>
    %180 = arith.divf %178, %179 : vector<16x128xf32>
    %181 = vector.extract_strided_slice %168 {offsets = [0, 256], sizes = [16, 128], strides = [1, 1]} : vector<16x512xf32> to vector<16x128xf32>
    %182 = math.tanh %181 : vector<16x128xf32>
    %183 = vector.extract_strided_slice %168 {offsets = [0, 384], sizes = [16, 128], strides = [1, 1]} : vector<16x512xf32> to vector<16x128xf32>
    %184 = arith.negf %183 : vector<16x128xf32>
    %185 = math.exp %184 : vector<16x128xf32>
    %cst_62 = arith.constant 1.000000e+00 : f32
    %186 = vector.broadcast %cst_62 : f32 to vector<16x128xf32>
    %187 = arith.addf %186, %185 : vector<16x128xf32>
    %188 = arith.divf %186, %187 : vector<16x128xf32>
    %189 = arith.mulf %180, %154 : vector<16x128xf32>
    %190 = arith.mulf %174, %182 : vector<16x128xf32>
    %191 = arith.addf %189, %190 : vector<16x128xf32>
    %192 = math.tanh %191 : vector<16x128xf32>
    %193 = arith.mulf %188, %192 : vector<16x128xf32>
    %194 = arith.truncf %193 : vector<16x128xf32> to vector<16x128xbf16>
    %195 = arith.index_cast %c4_i32 : i32 to index
    %c0_63 = arith.constant 0 : index
    %c0_64 = arith.constant 0 : index
    %196 = vector.load %arg6[%195, %c0_63, %c0_64] : memref<8x16x128xbf16, #tpu.memory_space<vmem>>, vector<1x16x128xbf16>
    %197 = vector.shape_cast %196 : vector<1x16x128xbf16> to vector<16x128xbf16>
    %198 = vector.shape_cast %194 : vector<16x128xbf16> to vector<1x16x128xbf16>
    tpu.vector_store %arg6[%195, %c0_63, %c0_64], %198 {strides = array<i32>} : memref<8x16x128xbf16, #tpu.memory_space<vmem>>, vector<1x16x128xbf16>,
    %c5_i32 = arith.constant 5 : i32
    %199 = arith.index_cast %c5_i32 : i32 to index
    %c0_65 = arith.constant 0 : index
    %c0_66 = arith.constant 0 : index
    %200 = vector.load %arg9[%199, %c0_65, %c0_66] : memref<8x16x512xf32, #tpu.memory_space<vmem>>, vector<1x16x512xf32>
    %201 = vector.shape_cast %200 : vector<1x16x512xf32> to vector<16x512xf32>
    %202 = arith.truncf %193 : vector<16x128xf32> to vector<16x128xbf16>
    %c0_67 = arith.constant 0 : index
    %c0_68 = arith.constant 0 : index
    %203 = vector.load %arg4[%c0_67, %c0_68] : memref<128x512xbf16, #tpu.memory_space<vmem>>, vector<128x512xbf16>
    %cst_69 = arith.constant dense<0.000000e+00> : vector<16x512xf32>
    %204 = tpu.matmul %202, %203, %cst_69 {dimension_numbers = #tpu.dot_dimension_numbers<[1], [0], [0], [1], [0, 0, 1, 1], [], []>} : vector<16x128xbf16>, vector<128x512xbf16>, vector<16x512xf32> -> vector<16x512xf32>
    %205 = arith.addf %201, %204 : vector<16x512xf32>
    %206 = vector.extract_strided_slice %205 {offsets = [0, 0], sizes = [16, 128], strides = [1, 1]} : vector<16x512xf32> to vector<16x128xf32>
    %207 = arith.negf %206 : vector<16x128xf32>
    %208 = math.exp %207 : vector<16x128xf32>
    %cst_70 = arith.constant 1.000000e+00 : f32
    %209 = vector.broadcast %cst_70 : f32 to vector<16x128xf32>
    %210 = arith.addf %209, %208 : vector<16x128xf32>
    %211 = arith.divf %209, %210 : vector<16x128xf32>
    %212 = vector.extract_strided_slice %205 {offsets = [0, 128], sizes = [16, 128], strides = [1, 1]} : vector<16x512xf32> to vector<16x128xf32>
    %213 = arith.negf %212 : vector<16x128xf32>
    %214 = math.exp %213 : vector<16x128xf32>
    %cst_71 = arith.constant 1.000000e+00 : f32
    %215 = vector.broadcast %cst_71 : f32 to vector<16x128xf32>
    %216 = arith.addf %215, %214 : vector<16x128xf32>
    %217 = arith.divf %215, %216 : vector<16x128xf32>
    %218 = vector.extract_strided_slice %205 {offsets = [0, 256], sizes = [16, 128], strides = [1, 1]} : vector<16x512xf32> to vector<16x128xf32>
    %219 = math.tanh %218 : vector<16x128xf32>
    %220 = vector.extract_strided_slice %205 {offsets = [0, 384], sizes = [16, 128], strides = [1, 1]} : vector<16x512xf32> to vector<16x128xf32>
    %221 = arith.negf %220 : vector<16x128xf32>
    %222 = math.exp %221 : vector<16x128xf32>
    %cst_72 = arith.constant 1.000000e+00 : f32
    %223 = vector.broadcast %cst_72 : f32 to vector<16x128xf32>
    %224 = arith.addf %223, %222 : vector<16x128xf32>
    %225 = arith.divf %223, %224 : vector<16x128xf32>
    %226 = arith.mulf %217, %191 : vector<16x128xf32>
    %227 = arith.mulf %211, %219 : vector<16x128xf32>
    %228 = arith.addf %226, %227 : vector<16x128xf32>
    %229 = math.tanh %228 : vector<16x128xf32>
    %230 = arith.mulf %225, %229 : vector<16x128xf32>
    %231 = arith.truncf %230 : vector<16x128xf32> to vector<16x128xbf16>
    %232 = arith.index_cast %c5_i32 : i32 to index
    %c0_73 = arith.constant 0 : index
    %c0_74 = arith.constant 0 : index
    %233 = vector.load %arg6[%232, %c0_73, %c0_74] : memref<8x16x128xbf16, #tpu.memory_space<vmem>>, vector<1x16x128xbf16>
    %234 = vector.shape_cast %233 : vector<1x16x128xbf16> to vector<16x128xbf16>
    %235 = vector.shape_cast %231 : vector<16x128xbf16> to vector<1x16x128xbf16>
    tpu.vector_store %arg6[%232, %c0_73, %c0_74], %235 {strides = array<i32>} : memref<8x16x128xbf16, #tpu.memory_space<vmem>>, vector<1x16x128xbf16>,
    %c6_i32 = arith.constant 6 : i32
    %236 = arith.index_cast %c6_i32 : i32 to index
    %c0_75 = arith.constant 0 : index
    %c0_76 = arith.constant 0 : index
    %237 = vector.load %arg9[%236, %c0_75, %c0_76] : memref<8x16x512xf32, #tpu.memory_space<vmem>>, vector<1x16x512xf32>
    %238 = vector.shape_cast %237 : vector<1x16x512xf32> to vector<16x512xf32>
    %239 = arith.truncf %230 : vector<16x128xf32> to vector<16x128xbf16>
    %c0_77 = arith.constant 0 : index
    %c0_78 = arith.constant 0 : index
    %240 = vector.load %arg4[%c0_77, %c0_78] : memref<128x512xbf16, #tpu.memory_space<vmem>>, vector<128x512xbf16>
    %cst_79 = arith.constant dense<0.000000e+00> : vector<16x512xf32>
    %241 = tpu.matmul %239, %240, %cst_79 {dimension_numbers = #tpu.dot_dimension_numbers<[1], [0], [0], [1], [0, 0, 1, 1], [], []>} : vector<16x128xbf16>, vector<128x512xbf16>, vector<16x512xf32> -> vector<16x512xf32>
    %242 = arith.addf %238, %241 : vector<16x512xf32>
    %243 = vector.extract_strided_slice %242 {offsets = [0, 0], sizes = [16, 128], strides = [1, 1]} : vector<16x512xf32> to vector<16x128xf32>
    %244 = arith.negf %243 : vector<16x128xf32>
    %245 = math.exp %244 : vector<16x128xf32>
    %cst_80 = arith.constant 1.000000e+00 : f32
    %246 = vector.broadcast %cst_80 : f32 to vector<16x128xf32>
    %247 = arith.addf %246, %245 : vector<16x128xf32>
    %248 = arith.divf %246, %247 : vector<16x128xf32>
    %249 = vector.extract_strided_slice %242 {offsets = [0, 128], sizes = [16, 128], strides = [1, 1]} : vector<16x512xf32> to vector<16x128xf32>
    %250 = arith.negf %249 : vector<16x128xf32>
    %251 = math.exp %250 : vector<16x128xf32>
    %cst_81 = arith.constant 1.000000e+00 : f32
    %252 = vector.broadcast %cst_81 : f32 to vector<16x128xf32>
    %253 = arith.addf %252, %251 : vector<16x128xf32>
    %254 = arith.divf %252, %253 : vector<16x128xf32>
    %255 = vector.extract_strided_slice %242 {offsets = [0, 256], sizes = [16, 128], strides = [1, 1]} : vector<16x512xf32> to vector<16x128xf32>
    %256 = math.tanh %255 : vector<16x128xf32>
    %257 = vector.extract_strided_slice %242 {offsets = [0, 384], sizes = [16, 128], strides = [1, 1]} : vector<16x512xf32> to vector<16x128xf32>
    %258 = arith.negf %257 : vector<16x128xf32>
    %259 = math.exp %258 : vector<16x128xf32>
    %cst_82 = arith.constant 1.000000e+00 : f32
    %260 = vector.broadcast %cst_82 : f32 to vector<16x128xf32>
    %261 = arith.addf %260, %259 : vector<16x128xf32>
    %262 = arith.divf %260, %261 : vector<16x128xf32>
    %263 = arith.mulf %254, %228 : vector<16x128xf32>
    %264 = arith.mulf %248, %256 : vector<16x128xf32>
    %265 = arith.addf %263, %264 : vector<16x128xf32>
    %266 = math.tanh %265 : vector<16x128xf32>
    %267 = arith.mulf %262, %266 : vector<16x128xf32>
    %268 = arith.truncf %267 : vector<16x128xf32> to vector<16x128xbf16>
    %269 = arith.index_cast %c6_i32 : i32 to index
    %c0_83 = arith.constant 0 : index
    %c0_84 = arith.constant 0 : index
    %270 = vector.load %arg6[%269, %c0_83, %c0_84] : memref<8x16x128xbf16, #tpu.memory_space<vmem>>, vector<1x16x128xbf16>
    %271 = vector.shape_cast %270 : vector<1x16x128xbf16> to vector<16x128xbf16>
    %272 = vector.shape_cast %268 : vector<16x128xbf16> to vector<1x16x128xbf16>
    tpu.vector_store %arg6[%269, %c0_83, %c0_84], %272 {strides = array<i32>} : memref<8x16x128xbf16, #tpu.memory_space<vmem>>, vector<1x16x128xbf16>,
    %c7_i32 = arith.constant 7 : i32
    %273 = arith.index_cast %c7_i32 : i32 to index
    %c0_85 = arith.constant 0 : index
    %c0_86 = arith.constant 0 : index
    %274 = vector.load %arg9[%273, %c0_85, %c0_86] : memref<8x16x512xf32, #tpu.memory_space<vmem>>, vector<1x16x512xf32>
    %275 = vector.shape_cast %274 : vector<1x16x512xf32> to vector<16x512xf32>
    %276 = arith.truncf %267 : vector<16x128xf32> to vector<16x128xbf16>
    %c0_87 = arith.constant 0 : index
    %c0_88 = arith.constant 0 : index
    %277 = vector.load %arg4[%c0_87, %c0_88] : memref<128x512xbf16, #tpu.memory_space<vmem>>, vector<128x512xbf16>
    %cst_89 = arith.constant dense<0.000000e+00> : vector<16x512xf32>
    %278 = tpu.matmul %276, %277, %cst_89 {dimension_numbers = #tpu.dot_dimension_numbers<[1], [0], [0], [1], [0, 0, 1, 1], [], []>} : vector<16x128xbf16>, vector<128x512xbf16>, vector<16x512xf32> -> vector<16x512xf32>
    %279 = arith.addf %275, %278 : vector<16x512xf32>
    %280 = vector.extract_strided_slice %279 {offsets = [0, 0], sizes = [16, 128], strides = [1, 1]} : vector<16x512xf32> to vector<16x128xf32>
    %281 = arith.negf %280 : vector<16x128xf32>
    %282 = math.exp %281 : vector<16x128xf32>
    %cst_90 = arith.constant 1.000000e+00 : f32
    %283 = vector.broadcast %cst_90 : f32 to vector<16x128xf32>
    %284 = arith.addf %283, %282 : vector<16x128xf32>
    %285 = arith.divf %283, %284 : vector<16x128xf32>
    %286 = vector.extract_strided_slice %279 {offsets = [0, 128], sizes = [16, 128], strides = [1, 1]} : vector<16x512xf32> to vector<16x128xf32>
    %287 = arith.negf %286 : vector<16x128xf32>
    %288 = math.exp %287 : vector<16x128xf32>
    %cst_91 = arith.constant 1.000000e+00 : f32
    %289 = vector.broadcast %cst_91 : f32 to vector<16x128xf32>
    %290 = arith.addf %289, %288 : vector<16x128xf32>
    %291 = arith.divf %289, %290 : vector<16x128xf32>
    %292 = vector.extract_strided_slice %279 {offsets = [0, 256], sizes = [16, 128], strides = [1, 1]} : vector<16x512xf32> to vector<16x128xf32>
    %293 = math.tanh %292 : vector<16x128xf32>
    %294 = vector.extract_strided_slice %279 {offsets = [0, 384], sizes = [16, 128], strides = [1, 1]} : vector<16x512xf32> to vector<16x128xf32>
    %295 = arith.negf %294 : vector<16x128xf32>
    %296 = math.exp %295 : vector<16x128xf32>
    %cst_92 = arith.constant 1.000000e+00 : f32
    %297 = vector.broadcast %cst_92 : f32 to vector<16x128xf32>
    %298 = arith.addf %297, %296 : vector<16x128xf32>
    %299 = arith.divf %297, %298 : vector<16x128xf32>
    %300 = arith.mulf %291, %265 : vector<16x128xf32>
    %301 = arith.mulf %285, %293 : vector<16x128xf32>
    %302 = arith.addf %300, %301 : vector<16x128xf32>
    %303 = math.tanh %302 : vector<16x128xf32>
    %304 = arith.mulf %299, %303 : vector<16x128xf32>
    %305 = arith.truncf %304 : vector<16x128xf32> to vector<16x128xbf16>
    %306 = arith.index_cast %c7_i32 : i32 to index
    %c0_93 = arith.constant 0 : index
    %c0_94 = arith.constant 0 : index
    %307 = vector.load %arg6[%306, %c0_93, %c0_94] : memref<8x16x128xbf16, #tpu.memory_space<vmem>>, vector<1x16x128xbf16>
    %308 = vector.shape_cast %307 : vector<1x16x128xbf16> to vector<16x128xbf16>
    %309 = vector.shape_cast %305 : vector<16x128xbf16> to vector<1x16x128xbf16>
    tpu.vector_store %arg6[%306, %c0_93, %c0_94], %309 {strides = array<i32>} : memref<8x16x128xbf16, #tpu.memory_space<vmem>>, vector<1x16x128xbf16>,
    %c8_i32 = arith.constant 8 : i32
    %c0_95 = arith.constant 0 : index
    %c0_96 = arith.constant 0 : index
    %310 = vector.load %arg7[%c0_95, %c0_96] : memref<16x128xf32, #tpu.memory_space<vmem>>, vector<16x128xf32>
    tpu.vector_store %arg7[%c0_95, %c0_96], %304 {strides = array<i32>} : memref<16x128xf32, #tpu.memory_space<vmem>>, vector<16x128xf32>,
    %c0_97 = arith.constant 0 : index
    %c0_98 = arith.constant 0 : index
    %311 = vector.load %arg8[%c0_97, %c0_98] : memref<16x128xf32, #tpu.memory_space<vmem>>, vector<16x128xf32>
    tpu.vector_store %arg8[%c0_97, %c0_98], %302 {strides = array<i32>} : memref<16x128xf32, #tpu.memory_space<vmem>>, vector<16x128xf32>,
    return
  }
  func.func @transform_0(%arg0: i32, %arg1: i32) -> (i32, i32, i32) {
    %c0_i32 = arith.constant 0 : i32
    %c0_i32_0 = arith.constant 0 : i32
    return %arg1, %arg0, %c0_i32 : i32, i32, i32
  }
  func.func @transform_1(%arg0: i32, %arg1: i32) -> (i32, i32) {
    %c0_i32 = arith.constant 0 : i32
    %c0_i32_0 = arith.constant 0 : i32
    %c0_i32_1 = arith.constant 0 : i32
    return %c0_i32, %c0_i32_0 : i32, i32
  }
  func.func @transform_2(%arg0: i32, %arg1: i32) -> (i32, i32) {
    %c0_i32 = arith.constant 0 : i32
    %c0_i32_0 = arith.constant 0 : i32
    %c0_i32_1 = arith.constant 0 : i32
    return %c0_i32, %c0_i32_0 : i32, i32
  }
  func.func @transform_3(%arg0: i32, %arg1: i32) -> (i32, i32) {
    %c0_i32 = arith.constant 0 : i32
    %c0_i32_0 = arith.constant 0 : i32
    %c0_i32_1 = arith.constant 0 : i32
    return %c0_i32, %c0_i32_0 : i32, i32
  }
  func.func @transform_4(%arg0: i32, %arg1: i32) -> (i32, i32, i32) {
    %c0_i32 = arith.constant 0 : i32
    %c0_i32_0 = arith.constant 0 : i32
    return %arg1, %arg0, %c0_i32 : i32, i32, i32
  }
}

module attributes {stable_mosaic.version = 11 : i64} {
  func.func @lstm_last_layer_kernel(%arg0: i32, %arg1: i32, %arg2: memref<8x16x128xbf16, #tpu.memory_space<vmem>>, %arg3: memref<128x512xbf16, #tpu.memory_space<vmem>>, %arg4: memref<128x512xbf16, #tpu.memory_space<vmem>>, %arg5: memref<1x512xf32, #tpu.memory_space<vmem>>, %arg6: memref<16x128xbf16, #tpu.memory_space<vmem>>, %arg7: memref<16x128xf32, #tpu.memory_space<vmem>>, %arg8: memref<16x128xf32, #tpu.memory_space<vmem>>, %arg9: memref<8x16x512xf32, #tpu.memory_space<vmem>>) attributes {dimension_semantics = [#tpu.dimension_semantics<parallel>, #tpu.dimension_semantics<arbitrary>], iteration_bounds = array<i64: 1, 1>, scalar_prefetch = 0 : i64, scratch_operands = 3 : i64, tpu.core_type = #tpu.core_type<tc>, window_params = [{transform_indices = @transform_0, window_bounds = array<i64: 8, 16, 128>}, {pipeline_mode = #tpu.pipeline_mode<synchronous>, transform_indices = @transform_1, window_bounds = array<i64: 128, 512>}, {pipeline_mode = #tpu.pipeline_mode<synchronous>, transform_indices = @transform_2, window_bounds = array<i64: 128, 512>}, {pipeline_mode = #tpu.pipeline_mode<synchronous>, transform_indices = @transform_3, window_bounds = array<i64: 1, 512>}, {transform_indices = @transform_4, window_bounds = array<i64: 16, 128>}]} {
    %c0_i32 = arith.constant 0 : i32
    %0 = arith.cmpi eq, %arg1, %c0_i32 : i32
    %c0_i32_0 = arith.constant 0 : i32
    %1 = arith.cmpi eq, %arg1, %c0_i32_0 : i32
    %2 = arith.extui %1 : i1 to i32
    %c0_i32_1 = arith.constant 0 : i32
    %3 = arith.cmpi ne, %2, %c0_i32_1 : i32
    scf.if %3 {
      %cst_100 = arith.constant 0.000000e+00 : f32
      %305 = vector.broadcast %cst_100 : f32 to vector<16x128xf32>
      %c0_101 = arith.constant 0 : index
      %c0_102 = arith.constant 0 : index
      %306 = vector.load %arg7[%c0_101, %c0_102] : memref<16x128xf32, #tpu.memory_space<vmem>>, vector<16x128xf32>
      tpu.vector_store %arg7[%c0_101, %c0_102], %305 {strides = array<i32>} : memref<16x128xf32, #tpu.memory_space<vmem>>, vector<16x128xf32>,
      %cst_103 = arith.constant 0.000000e+00 : f32
      %307 = vector.broadcast %cst_103 : f32 to vector<16x128xf32>
      %c0_104 = arith.constant 0 : index
      %c0_105 = arith.constant 0 : index
      %308 = vector.load %arg8[%c0_104, %c0_105] : memref<16x128xf32, #tpu.memory_space<vmem>>, vector<16x128xf32>
      tpu.vector_store %arg8[%c0_104, %c0_105], %307 {strides = array<i32>} : memref<16x128xf32, #tpu.memory_space<vmem>>, vector<16x128xf32>,
    } else {
    }
    %c0 = arith.constant 0 : index
    %c0_2 = arith.constant 0 : index
    %c0_3 = arith.constant 0 : index
    %4 = vector.load %arg2[%c0, %c0_2, %c0_3] : memref<8x16x128xbf16, #tpu.memory_space<vmem>>, vector<8x16x128xbf16>
    %5 = vector.shape_cast %4 : vector<8x16x128xbf16> to vector<128x128xbf16>
    %c0_4 = arith.constant 0 : index
    %c0_5 = arith.constant 0 : index
    %6 = vector.load %arg3[%c0_4, %c0_5] : memref<128x512xbf16, #tpu.memory_space<vmem>>, vector<128x512xbf16>
    %cst = arith.constant dense<0.000000e+00> : vector<128x512xf32>
    %7 = tpu.matmul %5, %6, %cst {dimension_numbers = #tpu.dot_dimension_numbers<[1], [0], [0], [1], [0, 0, 1, 1], [], []>} : vector<128x128xbf16>, vector<128x512xbf16>, vector<128x512xf32> -> vector<128x512xf32>
    %c0_6 = arith.constant 0 : index
    %c0_7 = arith.constant 0 : index
    %8 = vector.load %arg5[%c0_6, %c0_7] : memref<1x512xf32, #tpu.memory_space<vmem>>, vector<1x512xf32>
    %9 = vector.broadcast %8 : vector<1x512xf32> to vector<128x512xf32>
    %10 = arith.addf %7, %9 : vector<128x512xf32>
    %11 = vector.shape_cast %10 : vector<128x512xf32> to vector<8x16x512xf32>
    %c0_8 = arith.constant 0 : index
    %c0_9 = arith.constant 0 : index
    %c0_10 = arith.constant 0 : index
    %12 = vector.load %arg9[%c0_8, %c0_9, %c0_10] : memref<8x16x512xf32, #tpu.memory_space<vmem>>, vector<8x16x512xf32>
    tpu.vector_store %arg9[%c0_8, %c0_9, %c0_10], %11 {strides = array<i32>} : memref<8x16x512xf32, #tpu.memory_space<vmem>>, vector<8x16x512xf32>,
    %c0_11 = arith.constant 0 : index
    %c0_12 = arith.constant 0 : index
    %13 = vector.load %arg7[%c0_11, %c0_12] : memref<16x128xf32, #tpu.memory_space<vmem>>, vector<16x128xf32>
    %c0_13 = arith.constant 0 : index
    %c0_14 = arith.constant 0 : index
    %14 = vector.load %arg8[%c0_13, %c0_14] : memref<16x128xf32, #tpu.memory_space<vmem>>, vector<16x128xf32>
    %c0_i32_15 = arith.constant 0 : i32
    %15 = arith.index_cast %c0_i32_15 : i32 to index
    %c0_16 = arith.constant 0 : index
    %c0_17 = arith.constant 0 : index
    %16 = vector.load %arg9[%15, %c0_16, %c0_17] : memref<8x16x512xf32, #tpu.memory_space<vmem>>, vector<1x16x512xf32>
    %17 = vector.shape_cast %16 : vector<1x16x512xf32> to vector<16x512xf32>
    %18 = arith.truncf %13 : vector<16x128xf32> to vector<16x128xbf16>
    %c0_18 = arith.constant 0 : index
    %c0_19 = arith.constant 0 : index
    %19 = vector.load %arg4[%c0_18, %c0_19] : memref<128x512xbf16, #tpu.memory_space<vmem>>, vector<128x512xbf16>
    %cst_20 = arith.constant dense<0.000000e+00> : vector<16x512xf32>
    %20 = tpu.matmul %18, %19, %cst_20 {dimension_numbers = #tpu.dot_dimension_numbers<[1], [0], [0], [1], [0, 0, 1, 1], [], []>} : vector<16x128xbf16>, vector<128x512xbf16>, vector<16x512xf32> -> vector<16x512xf32>
    %21 = arith.addf %17, %20 : vector<16x512xf32>
    %22 = vector.extract_strided_slice %21 {offsets = [0, 0], sizes = [16, 128], strides = [1, 1]} : vector<16x512xf32> to vector<16x128xf32>
    %23 = arith.negf %22 : vector<16x128xf32>
    %24 = math.exp %23 : vector<16x128xf32>
    %cst_21 = arith.constant 1.000000e+00 : f32
    %25 = vector.broadcast %cst_21 : f32 to vector<16x128xf32>
    %26 = arith.addf %25, %24 : vector<16x128xf32>
    %27 = arith.divf %25, %26 : vector<16x128xf32>
    %28 = vector.extract_strided_slice %21 {offsets = [0, 128], sizes = [16, 128], strides = [1, 1]} : vector<16x512xf32> to vector<16x128xf32>
    %29 = arith.negf %28 : vector<16x128xf32>
    %30 = math.exp %29 : vector<16x128xf32>
    %cst_22 = arith.constant 1.000000e+00 : f32
    %31 = vector.broadcast %cst_22 : f32 to vector<16x128xf32>
    %32 = arith.addf %31, %30 : vector<16x128xf32>
    %33 = arith.divf %31, %32 : vector<16x128xf32>
    %34 = vector.extract_strided_slice %21 {offsets = [0, 256], sizes = [16, 128], strides = [1, 1]} : vector<16x512xf32> to vector<16x128xf32>
    %35 = math.tanh %34 : vector<16x128xf32>
    %36 = vector.extract_strided_slice %21 {offsets = [0, 384], sizes = [16, 128], strides = [1, 1]} : vector<16x512xf32> to vector<16x128xf32>
    %37 = arith.negf %36 : vector<16x128xf32>
    %38 = math.exp %37 : vector<16x128xf32>
    %cst_23 = arith.constant 1.000000e+00 : f32
    %39 = vector.broadcast %cst_23 : f32 to vector<16x128xf32>
    %40 = arith.addf %39, %38 : vector<16x128xf32>
    %41 = arith.divf %39, %40 : vector<16x128xf32>
    %42 = arith.mulf %33, %14 : vector<16x128xf32>
    %43 = arith.mulf %27, %35 : vector<16x128xf32>
    %44 = arith.addf %42, %43 : vector<16x128xf32>
    %45 = math.tanh %44 : vector<16x128xf32>
    %46 = arith.mulf %41, %45 : vector<16x128xf32>
    %c7_i32 = arith.constant 7 : i32
    %47 = arith.cmpi eq, %c0_i32_15, %c7_i32 : i32
    %48 = arith.andi %0, %47 : i1
    %49 = arith.extui %48 : i1 to i32
    %c0_i32_24 = arith.constant 0 : i32
    %50 = arith.cmpi ne, %49, %c0_i32_24 : i32
    scf.if %50 {
      %305 = arith.truncf %46 : vector<16x128xf32> to vector<16x128xbf16>
      %c0_100 = arith.constant 0 : index
      %c0_101 = arith.constant 0 : index
      %306 = vector.load %arg6[%c0_100, %c0_101] : memref<16x128xbf16, #tpu.memory_space<vmem>>, vector<16x128xbf16>
      tpu.vector_store %arg6[%c0_100, %c0_101], %305 {strides = array<i32>} : memref<16x128xbf16, #tpu.memory_space<vmem>>, vector<16x128xbf16>,
    } else {
    }
    %c1_i32 = arith.constant 1 : i32
    %51 = arith.index_cast %c1_i32 : i32 to index
    %c0_25 = arith.constant 0 : index
    %c0_26 = arith.constant 0 : index
    %52 = vector.load %arg9[%51, %c0_25, %c0_26] : memref<8x16x512xf32, #tpu.memory_space<vmem>>, vector<1x16x512xf32>
    %53 = vector.shape_cast %52 : vector<1x16x512xf32> to vector<16x512xf32>
    %54 = arith.truncf %46 : vector<16x128xf32> to vector<16x128xbf16>
    %c0_27 = arith.constant 0 : index
    %c0_28 = arith.constant 0 : index
    %55 = vector.load %arg4[%c0_27, %c0_28] : memref<128x512xbf16, #tpu.memory_space<vmem>>, vector<128x512xbf16>
    %cst_29 = arith.constant dense<0.000000e+00> : vector<16x512xf32>
    %56 = tpu.matmul %54, %55, %cst_29 {dimension_numbers = #tpu.dot_dimension_numbers<[1], [0], [0], [1], [0, 0, 1, 1], [], []>} : vector<16x128xbf16>, vector<128x512xbf16>, vector<16x512xf32> -> vector<16x512xf32>
    %57 = arith.addf %53, %56 : vector<16x512xf32>
    %58 = vector.extract_strided_slice %57 {offsets = [0, 0], sizes = [16, 128], strides = [1, 1]} : vector<16x512xf32> to vector<16x128xf32>
    %59 = arith.negf %58 : vector<16x128xf32>
    %60 = math.exp %59 : vector<16x128xf32>
    %cst_30 = arith.constant 1.000000e+00 : f32
    %61 = vector.broadcast %cst_30 : f32 to vector<16x128xf32>
    %62 = arith.addf %61, %60 : vector<16x128xf32>
    %63 = arith.divf %61, %62 : vector<16x128xf32>
    %64 = vector.extract_strided_slice %57 {offsets = [0, 128], sizes = [16, 128], strides = [1, 1]} : vector<16x512xf32> to vector<16x128xf32>
    %65 = arith.negf %64 : vector<16x128xf32>
    %66 = math.exp %65 : vector<16x128xf32>
    %cst_31 = arith.constant 1.000000e+00 : f32
    %67 = vector.broadcast %cst_31 : f32 to vector<16x128xf32>
    %68 = arith.addf %67, %66 : vector<16x128xf32>
    %69 = arith.divf %67, %68 : vector<16x128xf32>
    %70 = vector.extract_strided_slice %57 {offsets = [0, 256], sizes = [16, 128], strides = [1, 1]} : vector<16x512xf32> to vector<16x128xf32>
    %71 = math.tanh %70 : vector<16x128xf32>
    %72 = vector.extract_strided_slice %57 {offsets = [0, 384], sizes = [16, 128], strides = [1, 1]} : vector<16x512xf32> to vector<16x128xf32>
    %73 = arith.negf %72 : vector<16x128xf32>
    %74 = math.exp %73 : vector<16x128xf32>
    %cst_32 = arith.constant 1.000000e+00 : f32
    %75 = vector.broadcast %cst_32 : f32 to vector<16x128xf32>
    %76 = arith.addf %75, %74 : vector<16x128xf32>
    %77 = arith.divf %75, %76 : vector<16x128xf32>
    %78 = arith.mulf %69, %44 : vector<16x128xf32>
    %79 = arith.mulf %63, %71 : vector<16x128xf32>
    %80 = arith.addf %78, %79 : vector<16x128xf32>
    %81 = math.tanh %80 : vector<16x128xf32>
    %82 = arith.mulf %77, %81 : vector<16x128xf32>
    %c7_i32_33 = arith.constant 7 : i32
    %83 = arith.cmpi eq, %c1_i32, %c7_i32_33 : i32
    %84 = arith.andi %0, %83 : i1
    %85 = arith.extui %84 : i1 to i32
    %c0_i32_34 = arith.constant 0 : i32
    %86 = arith.cmpi ne, %85, %c0_i32_34 : i32
    scf.if %86 {
      %305 = arith.truncf %82 : vector<16x128xf32> to vector<16x128xbf16>
      %c0_100 = arith.constant 0 : index
      %c0_101 = arith.constant 0 : index
      %306 = vector.load %arg6[%c0_100, %c0_101] : memref<16x128xbf16, #tpu.memory_space<vmem>>, vector<16x128xbf16>
      tpu.vector_store %arg6[%c0_100, %c0_101], %305 {strides = array<i32>} : memref<16x128xbf16, #tpu.memory_space<vmem>>, vector<16x128xbf16>,
    } else {
    }
    %c2_i32 = arith.constant 2 : i32
    %87 = arith.index_cast %c2_i32 : i32 to index
    %c0_35 = arith.constant 0 : index
    %c0_36 = arith.constant 0 : index
    %88 = vector.load %arg9[%87, %c0_35, %c0_36] : memref<8x16x512xf32, #tpu.memory_space<vmem>>, vector<1x16x512xf32>
    %89 = vector.shape_cast %88 : vector<1x16x512xf32> to vector<16x512xf32>
    %90 = arith.truncf %82 : vector<16x128xf32> to vector<16x128xbf16>
    %c0_37 = arith.constant 0 : index
    %c0_38 = arith.constant 0 : index
    %91 = vector.load %arg4[%c0_37, %c0_38] : memref<128x512xbf16, #tpu.memory_space<vmem>>, vector<128x512xbf16>
    %cst_39 = arith.constant dense<0.000000e+00> : vector<16x512xf32>
    %92 = tpu.matmul %90, %91, %cst_39 {dimension_numbers = #tpu.dot_dimension_numbers<[1], [0], [0], [1], [0, 0, 1, 1], [], []>} : vector<16x128xbf16>, vector<128x512xbf16>, vector<16x512xf32> -> vector<16x512xf32>
    %93 = arith.addf %89, %92 : vector<16x512xf32>
    %94 = vector.extract_strided_slice %93 {offsets = [0, 0], sizes = [16, 128], strides = [1, 1]} : vector<16x512xf32> to vector<16x128xf32>
    %95 = arith.negf %94 : vector<16x128xf32>
    %96 = math.exp %95 : vector<16x128xf32>
    %cst_40 = arith.constant 1.000000e+00 : f32
    %97 = vector.broadcast %cst_40 : f32 to vector<16x128xf32>
    %98 = arith.addf %97, %96 : vector<16x128xf32>
    %99 = arith.divf %97, %98 : vector<16x128xf32>
    %100 = vector.extract_strided_slice %93 {offsets = [0, 128], sizes = [16, 128], strides = [1, 1]} : vector<16x512xf32> to vector<16x128xf32>
    %101 = arith.negf %100 : vector<16x128xf32>
    %102 = math.exp %101 : vector<16x128xf32>
    %cst_41 = arith.constant 1.000000e+00 : f32
    %103 = vector.broadcast %cst_41 : f32 to vector<16x128xf32>
    %104 = arith.addf %103, %102 : vector<16x128xf32>
    %105 = arith.divf %103, %104 : vector<16x128xf32>
    %106 = vector.extract_strided_slice %93 {offsets = [0, 256], sizes = [16, 128], strides = [1, 1]} : vector<16x512xf32> to vector<16x128xf32>
    %107 = math.tanh %106 : vector<16x128xf32>
    %108 = vector.extract_strided_slice %93 {offsets = [0, 384], sizes = [16, 128], strides = [1, 1]} : vector<16x512xf32> to vector<16x128xf32>
    %109 = arith.negf %108 : vector<16x128xf32>
    %110 = math.exp %109 : vector<16x128xf32>
    %cst_42 = arith.constant 1.000000e+00 : f32
    %111 = vector.broadcast %cst_42 : f32 to vector<16x128xf32>
    %112 = arith.addf %111, %110 : vector<16x128xf32>
    %113 = arith.divf %111, %112 : vector<16x128xf32>
    %114 = arith.mulf %105, %80 : vector<16x128xf32>
    %115 = arith.mulf %99, %107 : vector<16x128xf32>
    %116 = arith.addf %114, %115 : vector<16x128xf32>
    %117 = math.tanh %116 : vector<16x128xf32>
    %118 = arith.mulf %113, %117 : vector<16x128xf32>
    %c7_i32_43 = arith.constant 7 : i32
    %119 = arith.cmpi eq, %c2_i32, %c7_i32_43 : i32
    %120 = arith.andi %0, %119 : i1
    %121 = arith.extui %120 : i1 to i32
    %c0_i32_44 = arith.constant 0 : i32
    %122 = arith.cmpi ne, %121, %c0_i32_44 : i32
    scf.if %122 {
      %305 = arith.truncf %118 : vector<16x128xf32> to vector<16x128xbf16>
      %c0_100 = arith.constant 0 : index
      %c0_101 = arith.constant 0 : index
      %306 = vector.load %arg6[%c0_100, %c0_101] : memref<16x128xbf16, #tpu.memory_space<vmem>>, vector<16x128xbf16>
      tpu.vector_store %arg6[%c0_100, %c0_101], %305 {strides = array<i32>} : memref<16x128xbf16, #tpu.memory_space<vmem>>, vector<16x128xbf16>,
    } else {
    }
    %c3_i32 = arith.constant 3 : i32
    %123 = arith.index_cast %c3_i32 : i32 to index
    %c0_45 = arith.constant 0 : index
    %c0_46 = arith.constant 0 : index
    %124 = vector.load %arg9[%123, %c0_45, %c0_46] : memref<8x16x512xf32, #tpu.memory_space<vmem>>, vector<1x16x512xf32>
    %125 = vector.shape_cast %124 : vector<1x16x512xf32> to vector<16x512xf32>
    %126 = arith.truncf %118 : vector<16x128xf32> to vector<16x128xbf16>
    %c0_47 = arith.constant 0 : index
    %c0_48 = arith.constant 0 : index
    %127 = vector.load %arg4[%c0_47, %c0_48] : memref<128x512xbf16, #tpu.memory_space<vmem>>, vector<128x512xbf16>
    %cst_49 = arith.constant dense<0.000000e+00> : vector<16x512xf32>
    %128 = tpu.matmul %126, %127, %cst_49 {dimension_numbers = #tpu.dot_dimension_numbers<[1], [0], [0], [1], [0, 0, 1, 1], [], []>} : vector<16x128xbf16>, vector<128x512xbf16>, vector<16x512xf32> -> vector<16x512xf32>
    %129 = arith.addf %125, %128 : vector<16x512xf32>
    %130 = vector.extract_strided_slice %129 {offsets = [0, 0], sizes = [16, 128], strides = [1, 1]} : vector<16x512xf32> to vector<16x128xf32>
    %131 = arith.negf %130 : vector<16x128xf32>
    %132 = math.exp %131 : vector<16x128xf32>
    %cst_50 = arith.constant 1.000000e+00 : f32
    %133 = vector.broadcast %cst_50 : f32 to vector<16x128xf32>
    %134 = arith.addf %133, %132 : vector<16x128xf32>
    %135 = arith.divf %133, %134 : vector<16x128xf32>
    %136 = vector.extract_strided_slice %129 {offsets = [0, 128], sizes = [16, 128], strides = [1, 1]} : vector<16x512xf32> to vector<16x128xf32>
    %137 = arith.negf %136 : vector<16x128xf32>
    %138 = math.exp %137 : vector<16x128xf32>
    %cst_51 = arith.constant 1.000000e+00 : f32
    %139 = vector.broadcast %cst_51 : f32 to vector<16x128xf32>
    %140 = arith.addf %139, %138 : vector<16x128xf32>
    %141 = arith.divf %139, %140 : vector<16x128xf32>
    %142 = vector.extract_strided_slice %129 {offsets = [0, 256], sizes = [16, 128], strides = [1, 1]} : vector<16x512xf32> to vector<16x128xf32>
    %143 = math.tanh %142 : vector<16x128xf32>
    %144 = vector.extract_strided_slice %129 {offsets = [0, 384], sizes = [16, 128], strides = [1, 1]} : vector<16x512xf32> to vector<16x128xf32>
    %145 = arith.negf %144 : vector<16x128xf32>
    %146 = math.exp %145 : vector<16x128xf32>
    %cst_52 = arith.constant 1.000000e+00 : f32
    %147 = vector.broadcast %cst_52 : f32 to vector<16x128xf32>
    %148 = arith.addf %147, %146 : vector<16x128xf32>
    %149 = arith.divf %147, %148 : vector<16x128xf32>
    %150 = arith.mulf %141, %116 : vector<16x128xf32>
    %151 = arith.mulf %135, %143 : vector<16x128xf32>
    %152 = arith.addf %150, %151 : vector<16x128xf32>
    %153 = math.tanh %152 : vector<16x128xf32>
    %154 = arith.mulf %149, %153 : vector<16x128xf32>
    %c7_i32_53 = arith.constant 7 : i32
    %155 = arith.cmpi eq, %c3_i32, %c7_i32_53 : i32
    %156 = arith.andi %0, %155 : i1
    %157 = arith.extui %156 : i1 to i32
    %c0_i32_54 = arith.constant 0 : i32
    %158 = arith.cmpi ne, %157, %c0_i32_54 : i32
    scf.if %158 {
      %305 = arith.truncf %154 : vector<16x128xf32> to vector<16x128xbf16>
      %c0_100 = arith.constant 0 : index
      %c0_101 = arith.constant 0 : index
      %306 = vector.load %arg6[%c0_100, %c0_101] : memref<16x128xbf16, #tpu.memory_space<vmem>>, vector<16x128xbf16>
      tpu.vector_store %arg6[%c0_100, %c0_101], %305 {strides = array<i32>} : memref<16x128xbf16, #tpu.memory_space<vmem>>, vector<16x128xbf16>,
    } else {
    }
    %c4_i32 = arith.constant 4 : i32
    %159 = arith.index_cast %c4_i32 : i32 to index
    %c0_55 = arith.constant 0 : index
    %c0_56 = arith.constant 0 : index
    %160 = vector.load %arg9[%159, %c0_55, %c0_56] : memref<8x16x512xf32, #tpu.memory_space<vmem>>, vector<1x16x512xf32>
    %161 = vector.shape_cast %160 : vector<1x16x512xf32> to vector<16x512xf32>
    %162 = arith.truncf %154 : vector<16x128xf32> to vector<16x128xbf16>
    %c0_57 = arith.constant 0 : index
    %c0_58 = arith.constant 0 : index
    %163 = vector.load %arg4[%c0_57, %c0_58] : memref<128x512xbf16, #tpu.memory_space<vmem>>, vector<128x512xbf16>
    %cst_59 = arith.constant dense<0.000000e+00> : vector<16x512xf32>
    %164 = tpu.matmul %162, %163, %cst_59 {dimension_numbers = #tpu.dot_dimension_numbers<[1], [0], [0], [1], [0, 0, 1, 1], [], []>} : vector<16x128xbf16>, vector<128x512xbf16>, vector<16x512xf32> -> vector<16x512xf32>
    %165 = arith.addf %161, %164 : vector<16x512xf32>
    %166 = vector.extract_strided_slice %165 {offsets = [0, 0], sizes = [16, 128], strides = [1, 1]} : vector<16x512xf32> to vector<16x128xf32>
    %167 = arith.negf %166 : vector<16x128xf32>
    %168 = math.exp %167 : vector<16x128xf32>
    %cst_60 = arith.constant 1.000000e+00 : f32
    %169 = vector.broadcast %cst_60 : f32 to vector<16x128xf32>
    %170 = arith.addf %169, %168 : vector<16x128xf32>
    %171 = arith.divf %169, %170 : vector<16x128xf32>
    %172 = vector.extract_strided_slice %165 {offsets = [0, 128], sizes = [16, 128], strides = [1, 1]} : vector<16x512xf32> to vector<16x128xf32>
    %173 = arith.negf %172 : vector<16x128xf32>
    %174 = math.exp %173 : vector<16x128xf32>
    %cst_61 = arith.constant 1.000000e+00 : f32
    %175 = vector.broadcast %cst_61 : f32 to vector<16x128xf32>
    %176 = arith.addf %175, %174 : vector<16x128xf32>
    %177 = arith.divf %175, %176 : vector<16x128xf32>
    %178 = vector.extract_strided_slice %165 {offsets = [0, 256], sizes = [16, 128], strides = [1, 1]} : vector<16x512xf32> to vector<16x128xf32>
    %179 = math.tanh %178 : vector<16x128xf32>
    %180 = vector.extract_strided_slice %165 {offsets = [0, 384], sizes = [16, 128], strides = [1, 1]} : vector<16x512xf32> to vector<16x128xf32>
    %181 = arith.negf %180 : vector<16x128xf32>
    %182 = math.exp %181 : vector<16x128xf32>
    %cst_62 = arith.constant 1.000000e+00 : f32
    %183 = vector.broadcast %cst_62 : f32 to vector<16x128xf32>
    %184 = arith.addf %183, %182 : vector<16x128xf32>
    %185 = arith.divf %183, %184 : vector<16x128xf32>
    %186 = arith.mulf %177, %152 : vector<16x128xf32>
    %187 = arith.mulf %171, %179 : vector<16x128xf32>
    %188 = arith.addf %186, %187 : vector<16x128xf32>
    %189 = math.tanh %188 : vector<16x128xf32>
    %190 = arith.mulf %185, %189 : vector<16x128xf32>
    %c7_i32_63 = arith.constant 7 : i32
    %191 = arith.cmpi eq, %c4_i32, %c7_i32_63 : i32
    %192 = arith.andi %0, %191 : i1
    %193 = arith.extui %192 : i1 to i32
    %c0_i32_64 = arith.constant 0 : i32
    %194 = arith.cmpi ne, %193, %c0_i32_64 : i32
    scf.if %194 {
      %305 = arith.truncf %190 : vector<16x128xf32> to vector<16x128xbf16>
      %c0_100 = arith.constant 0 : index
      %c0_101 = arith.constant 0 : index
      %306 = vector.load %arg6[%c0_100, %c0_101] : memref<16x128xbf16, #tpu.memory_space<vmem>>, vector<16x128xbf16>
      tpu.vector_store %arg6[%c0_100, %c0_101], %305 {strides = array<i32>} : memref<16x128xbf16, #tpu.memory_space<vmem>>, vector<16x128xbf16>,
    } else {
    }
    %c5_i32 = arith.constant 5 : i32
    %195 = arith.index_cast %c5_i32 : i32 to index
    %c0_65 = arith.constant 0 : index
    %c0_66 = arith.constant 0 : index
    %196 = vector.load %arg9[%195, %c0_65, %c0_66] : memref<8x16x512xf32, #tpu.memory_space<vmem>>, vector<1x16x512xf32>
    %197 = vector.shape_cast %196 : vector<1x16x512xf32> to vector<16x512xf32>
    %198 = arith.truncf %190 : vector<16x128xf32> to vector<16x128xbf16>
    %c0_67 = arith.constant 0 : index
    %c0_68 = arith.constant 0 : index
    %199 = vector.load %arg4[%c0_67, %c0_68] : memref<128x512xbf16, #tpu.memory_space<vmem>>, vector<128x512xbf16>
    %cst_69 = arith.constant dense<0.000000e+00> : vector<16x512xf32>
    %200 = tpu.matmul %198, %199, %cst_69 {dimension_numbers = #tpu.dot_dimension_numbers<[1], [0], [0], [1], [0, 0, 1, 1], [], []>} : vector<16x128xbf16>, vector<128x512xbf16>, vector<16x512xf32> -> vector<16x512xf32>
    %201 = arith.addf %197, %200 : vector<16x512xf32>
    %202 = vector.extract_strided_slice %201 {offsets = [0, 0], sizes = [16, 128], strides = [1, 1]} : vector<16x512xf32> to vector<16x128xf32>
    %203 = arith.negf %202 : vector<16x128xf32>
    %204 = math.exp %203 : vector<16x128xf32>
    %cst_70 = arith.constant 1.000000e+00 : f32
    %205 = vector.broadcast %cst_70 : f32 to vector<16x128xf32>
    %206 = arith.addf %205, %204 : vector<16x128xf32>
    %207 = arith.divf %205, %206 : vector<16x128xf32>
    %208 = vector.extract_strided_slice %201 {offsets = [0, 128], sizes = [16, 128], strides = [1, 1]} : vector<16x512xf32> to vector<16x128xf32>
    %209 = arith.negf %208 : vector<16x128xf32>
    %210 = math.exp %209 : vector<16x128xf32>
    %cst_71 = arith.constant 1.000000e+00 : f32
    %211 = vector.broadcast %cst_71 : f32 to vector<16x128xf32>
    %212 = arith.addf %211, %210 : vector<16x128xf32>
    %213 = arith.divf %211, %212 : vector<16x128xf32>
    %214 = vector.extract_strided_slice %201 {offsets = [0, 256], sizes = [16, 128], strides = [1, 1]} : vector<16x512xf32> to vector<16x128xf32>
    %215 = math.tanh %214 : vector<16x128xf32>
    %216 = vector.extract_strided_slice %201 {offsets = [0, 384], sizes = [16, 128], strides = [1, 1]} : vector<16x512xf32> to vector<16x128xf32>
    %217 = arith.negf %216 : vector<16x128xf32>
    %218 = math.exp %217 : vector<16x128xf32>
    %cst_72 = arith.constant 1.000000e+00 : f32
    %219 = vector.broadcast %cst_72 : f32 to vector<16x128xf32>
    %220 = arith.addf %219, %218 : vector<16x128xf32>
    %221 = arith.divf %219, %220 : vector<16x128xf32>
    %222 = arith.mulf %213, %188 : vector<16x128xf32>
    %223 = arith.mulf %207, %215 : vector<16x128xf32>
    %224 = arith.addf %222, %223 : vector<16x128xf32>
    %225 = math.tanh %224 : vector<16x128xf32>
    %226 = arith.mulf %221, %225 : vector<16x128xf32>
    %c7_i32_73 = arith.constant 7 : i32
    %227 = arith.cmpi eq, %c5_i32, %c7_i32_73 : i32
    %228 = arith.andi %0, %227 : i1
    %229 = arith.extui %228 : i1 to i32
    %c0_i32_74 = arith.constant 0 : i32
    %230 = arith.cmpi ne, %229, %c0_i32_74 : i32
    scf.if %230 {
      %305 = arith.truncf %226 : vector<16x128xf32> to vector<16x128xbf16>
      %c0_100 = arith.constant 0 : index
      %c0_101 = arith.constant 0 : index
      %306 = vector.load %arg6[%c0_100, %c0_101] : memref<16x128xbf16, #tpu.memory_space<vmem>>, vector<16x128xbf16>
      tpu.vector_store %arg6[%c0_100, %c0_101], %305 {strides = array<i32>} : memref<16x128xbf16, #tpu.memory_space<vmem>>, vector<16x128xbf16>,
    } else {
    }
    %c6_i32 = arith.constant 6 : i32
    %231 = arith.index_cast %c6_i32 : i32 to index
    %c0_75 = arith.constant 0 : index
    %c0_76 = arith.constant 0 : index
    %232 = vector.load %arg9[%231, %c0_75, %c0_76] : memref<8x16x512xf32, #tpu.memory_space<vmem>>, vector<1x16x512xf32>
    %233 = vector.shape_cast %232 : vector<1x16x512xf32> to vector<16x512xf32>
    %234 = arith.truncf %226 : vector<16x128xf32> to vector<16x128xbf16>
    %c0_77 = arith.constant 0 : index
    %c0_78 = arith.constant 0 : index
    %235 = vector.load %arg4[%c0_77, %c0_78] : memref<128x512xbf16, #tpu.memory_space<vmem>>, vector<128x512xbf16>
    %cst_79 = arith.constant dense<0.000000e+00> : vector<16x512xf32>
    %236 = tpu.matmul %234, %235, %cst_79 {dimension_numbers = #tpu.dot_dimension_numbers<[1], [0], [0], [1], [0, 0, 1, 1], [], []>} : vector<16x128xbf16>, vector<128x512xbf16>, vector<16x512xf32> -> vector<16x512xf32>
    %237 = arith.addf %233, %236 : vector<16x512xf32>
    %238 = vector.extract_strided_slice %237 {offsets = [0, 0], sizes = [16, 128], strides = [1, 1]} : vector<16x512xf32> to vector<16x128xf32>
    %239 = arith.negf %238 : vector<16x128xf32>
    %240 = math.exp %239 : vector<16x128xf32>
    %cst_80 = arith.constant 1.000000e+00 : f32
    %241 = vector.broadcast %cst_80 : f32 to vector<16x128xf32>
    %242 = arith.addf %241, %240 : vector<16x128xf32>
    %243 = arith.divf %241, %242 : vector<16x128xf32>
    %244 = vector.extract_strided_slice %237 {offsets = [0, 128], sizes = [16, 128], strides = [1, 1]} : vector<16x512xf32> to vector<16x128xf32>
    %245 = arith.negf %244 : vector<16x128xf32>
    %246 = math.exp %245 : vector<16x128xf32>
    %cst_81 = arith.constant 1.000000e+00 : f32
    %247 = vector.broadcast %cst_81 : f32 to vector<16x128xf32>
    %248 = arith.addf %247, %246 : vector<16x128xf32>
    %249 = arith.divf %247, %248 : vector<16x128xf32>
    %250 = vector.extract_strided_slice %237 {offsets = [0, 256], sizes = [16, 128], strides = [1, 1]} : vector<16x512xf32> to vector<16x128xf32>
    %251 = math.tanh %250 : vector<16x128xf32>
    %252 = vector.extract_strided_slice %237 {offsets = [0, 384], sizes = [16, 128], strides = [1, 1]} : vector<16x512xf32> to vector<16x128xf32>
    %253 = arith.negf %252 : vector<16x128xf32>
    %254 = math.exp %253 : vector<16x128xf32>
    %cst_82 = arith.constant 1.000000e+00 : f32
    %255 = vector.broadcast %cst_82 : f32 to vector<16x128xf32>
    %256 = arith.addf %255, %254 : vector<16x128xf32>
    %257 = arith.divf %255, %256 : vector<16x128xf32>
    %258 = arith.mulf %249, %224 : vector<16x128xf32>
    %259 = arith.mulf %243, %251 : vector<16x128xf32>
    %260 = arith.addf %258, %259 : vector<16x128xf32>
    %261 = math.tanh %260 : vector<16x128xf32>
    %262 = arith.mulf %257, %261 : vector<16x128xf32>
    %c7_i32_83 = arith.constant 7 : i32
    %263 = arith.cmpi eq, %c6_i32, %c7_i32_83 : i32
    %264 = arith.andi %0, %263 : i1
    %265 = arith.extui %264 : i1 to i32
    %c0_i32_84 = arith.constant 0 : i32
    %266 = arith.cmpi ne, %265, %c0_i32_84 : i32
    scf.if %266 {
      %305 = arith.truncf %262 : vector<16x128xf32> to vector<16x128xbf16>
      %c0_100 = arith.constant 0 : index
      %c0_101 = arith.constant 0 : index
      %306 = vector.load %arg6[%c0_100, %c0_101] : memref<16x128xbf16, #tpu.memory_space<vmem>>, vector<16x128xbf16>
      tpu.vector_store %arg6[%c0_100, %c0_101], %305 {strides = array<i32>} : memref<16x128xbf16, #tpu.memory_space<vmem>>, vector<16x128xbf16>,
    } else {
    }
    %c7_i32_85 = arith.constant 7 : i32
    %267 = arith.index_cast %c7_i32_85 : i32 to index
    %c0_86 = arith.constant 0 : index
    %c0_87 = arith.constant 0 : index
    %268 = vector.load %arg9[%267, %c0_86, %c0_87] : memref<8x16x512xf32, #tpu.memory_space<vmem>>, vector<1x16x512xf32>
    %269 = vector.shape_cast %268 : vector<1x16x512xf32> to vector<16x512xf32>
    %270 = arith.truncf %262 : vector<16x128xf32> to vector<16x128xbf16>
    %c0_88 = arith.constant 0 : index
    %c0_89 = arith.constant 0 : index
    %271 = vector.load %arg4[%c0_88, %c0_89] : memref<128x512xbf16, #tpu.memory_space<vmem>>, vector<128x512xbf16>
    %cst_90 = arith.constant dense<0.000000e+00> : vector<16x512xf32>
    %272 = tpu.matmul %270, %271, %cst_90 {dimension_numbers = #tpu.dot_dimension_numbers<[1], [0], [0], [1], [0, 0, 1, 1], [], []>} : vector<16x128xbf16>, vector<128x512xbf16>, vector<16x512xf32> -> vector<16x512xf32>
    %273 = arith.addf %269, %272 : vector<16x512xf32>
    %274 = vector.extract_strided_slice %273 {offsets = [0, 0], sizes = [16, 128], strides = [1, 1]} : vector<16x512xf32> to vector<16x128xf32>
    %275 = arith.negf %274 : vector<16x128xf32>
    %276 = math.exp %275 : vector<16x128xf32>
    %cst_91 = arith.constant 1.000000e+00 : f32
    %277 = vector.broadcast %cst_91 : f32 to vector<16x128xf32>
    %278 = arith.addf %277, %276 : vector<16x128xf32>
    %279 = arith.divf %277, %278 : vector<16x128xf32>
    %280 = vector.extract_strided_slice %273 {offsets = [0, 128], sizes = [16, 128], strides = [1, 1]} : vector<16x512xf32> to vector<16x128xf32>
    %281 = arith.negf %280 : vector<16x128xf32>
    %282 = math.exp %281 : vector<16x128xf32>
    %cst_92 = arith.constant 1.000000e+00 : f32
    %283 = vector.broadcast %cst_92 : f32 to vector<16x128xf32>
    %284 = arith.addf %283, %282 : vector<16x128xf32>
    %285 = arith.divf %283, %284 : vector<16x128xf32>
    %286 = vector.extract_strided_slice %273 {offsets = [0, 256], sizes = [16, 128], strides = [1, 1]} : vector<16x512xf32> to vector<16x128xf32>
    %287 = math.tanh %286 : vector<16x128xf32>
    %288 = vector.extract_strided_slice %273 {offsets = [0, 384], sizes = [16, 128], strides = [1, 1]} : vector<16x512xf32> to vector<16x128xf32>
    %289 = arith.negf %288 : vector<16x128xf32>
    %290 = math.exp %289 : vector<16x128xf32>
    %cst_93 = arith.constant 1.000000e+00 : f32
    %291 = vector.broadcast %cst_93 : f32 to vector<16x128xf32>
    %292 = arith.addf %291, %290 : vector<16x128xf32>
    %293 = arith.divf %291, %292 : vector<16x128xf32>
    %294 = arith.mulf %285, %260 : vector<16x128xf32>
    %295 = arith.mulf %279, %287 : vector<16x128xf32>
    %296 = arith.addf %294, %295 : vector<16x128xf32>
    %297 = math.tanh %296 : vector<16x128xf32>
    %298 = arith.mulf %293, %297 : vector<16x128xf32>
    %c7_i32_94 = arith.constant 7 : i32
    %299 = arith.cmpi eq, %c7_i32_85, %c7_i32_94 : i32
    %300 = arith.andi %0, %299 : i1
    %301 = arith.extui %300 : i1 to i32
    %c0_i32_95 = arith.constant 0 : i32
    %302 = arith.cmpi ne, %301, %c0_i32_95 : i32
    scf.if %302 {
      %305 = arith.truncf %298 : vector<16x128xf32> to vector<16x128xbf16>
      %c0_100 = arith.constant 0 : index
      %c0_101 = arith.constant 0 : index
      %306 = vector.load %arg6[%c0_100, %c0_101] : memref<16x128xbf16, #tpu.memory_space<vmem>>, vector<16x128xbf16>
      tpu.vector_store %arg6[%c0_100, %c0_101], %305 {strides = array<i32>} : memref<16x128xbf16, #tpu.memory_space<vmem>>, vector<16x128xbf16>,
    } else {
    }
    %c8_i32 = arith.constant 8 : i32
    %c0_96 = arith.constant 0 : index
    %c0_97 = arith.constant 0 : index
    %303 = vector.load %arg7[%c0_96, %c0_97] : memref<16x128xf32, #tpu.memory_space<vmem>>, vector<16x128xf32>
    tpu.vector_store %arg7[%c0_96, %c0_97], %298 {strides = array<i32>} : memref<16x128xf32, #tpu.memory_space<vmem>>, vector<16x128xf32>,
    %c0_98 = arith.constant 0 : index
    %c0_99 = arith.constant 0 : index
    %304 = vector.load %arg8[%c0_98, %c0_99] : memref<16x128xf32, #tpu.memory_space<vmem>>, vector<16x128xf32>
    tpu.vector_store %arg8[%c0_98, %c0_99], %296 {strides = array<i32>} : memref<16x128xf32, #tpu.memory_space<vmem>>, vector<16x128xf32>,
    return
  }
  func.func @transform_0(%arg0: i32, %arg1: i32) -> (i32, i32, i32) {
    %c0_i32 = arith.constant 0 : i32
    %c0_i32_0 = arith.constant 0 : i32
    return %arg1, %arg0, %c0_i32 : i32, i32, i32
  }
  func.func @transform_1(%arg0: i32, %arg1: i32) -> (i32, i32) {
    %c0_i32 = arith.constant 0 : i32
    %c0_i32_0 = arith.constant 0 : i32
    %c0_i32_1 = arith.constant 0 : i32
    return %c0_i32, %c0_i32_0 : i32, i32
  }
  func.func @transform_2(%arg0: i32, %arg1: i32) -> (i32, i32) {
    %c0_i32 = arith.constant 0 : i32
    %c0_i32_0 = arith.constant 0 : i32
    %c0_i32_1 = arith.constant 0 : i32
    return %c0_i32, %c0_i32_0 : i32, i32
  }
  func.func @transform_3(%arg0: i32, %arg1: i32) -> (i32, i32) {
    %c0_i32 = arith.constant 0 : i32
    %c0_i32_0 = arith.constant 0 : i32
    %c0_i32_1 = arith.constant 0 : i32
    return %c0_i32, %c0_i32_0 : i32, i32
  }
  func.func @transform_4(%arg0: i32, %arg1: i32) -> (i32, i32) {
    %c0_i32 = arith.constant 0 : i32
    %c0_i32_0 = arith.constant 0 : i32
    return %arg0, %c0_i32 : i32, i32
  }
}

module attributes {stable_mosaic.version = 11 : i64} {
  func.func @classifier_kernel(%arg0: i32, %arg1: memref<16x128xbf16, #tpu.memory_space<vmem>>, %arg2: memref<128x128xbf16, #tpu.memory_space<vmem>>, %arg3: memref<1x128xf32, #tpu.memory_space<vmem>>, %arg4: memref<16x128xf32, #tpu.memory_space<vmem>>) attributes {dimension_semantics = [#tpu.dimension_semantics<arbitrary>], iteration_bounds = array<i64: 1>, scalar_prefetch = 0 : i64, scratch_operands = 0 : i64, tpu.core_type = #tpu.core_type<tc>, window_params = [{pipeline_mode = #tpu.pipeline_mode<synchronous>, transform_indices = @transform_0, window_bounds = array<i64: 16, 128>}, {pipeline_mode = #tpu.pipeline_mode<synchronous>, transform_indices = @transform_1, window_bounds = array<i64: 128, 128>}, {pipeline_mode = #tpu.pipeline_mode<synchronous>, transform_indices = @transform_2, window_bounds = array<i64: 1, 128>}, {pipeline_mode = #tpu.pipeline_mode<synchronous>, transform_indices = @transform_3, window_bounds = array<i64: 16, 128>}]} {
    %c0 = arith.constant 0 : index
    %c0_0 = arith.constant 0 : index
    %0 = vector.load %arg1[%c0, %c0_0] : memref<16x128xbf16, #tpu.memory_space<vmem>>, vector<16x128xbf16>
    %c0_1 = arith.constant 0 : index
    %c0_2 = arith.constant 0 : index
    %1 = vector.load %arg2[%c0_1, %c0_2] : memref<128x128xbf16, #tpu.memory_space<vmem>>, vector<128x128xbf16>
    %cst = arith.constant dense<0.000000e+00> : vector<16x128xf32>
    %2 = tpu.matmul %0, %1, %cst {dimension_numbers = #tpu.dot_dimension_numbers<[1], [0], [0], [1], [0, 0, 1, 1], [], []>} : vector<16x128xbf16>, vector<128x128xbf16>, vector<16x128xf32> -> vector<16x128xf32>
    %c0_3 = arith.constant 0 : index
    %c0_4 = arith.constant 0 : index
    %3 = vector.load %arg3[%c0_3, %c0_4] : memref<1x128xf32, #tpu.memory_space<vmem>>, vector<1x128xf32>
    %4 = vector.broadcast %3 : vector<1x128xf32> to vector<16x128xf32>
    %5 = arith.addf %2, %4 : vector<16x128xf32>
    %cst_5 = arith.constant 0.000000e+00 : f32
    %6 = vector.broadcast %cst_5 : f32 to vector<16x128xf32>
    %7 = arith.maximumf %5, %6 : vector<16x128xf32>
    %c0_6 = arith.constant 0 : index
    %c0_7 = arith.constant 0 : index
    %8 = vector.load %arg4[%c0_6, %c0_7] : memref<16x128xf32, #tpu.memory_space<vmem>>, vector<16x128xf32>
    tpu.vector_store %arg4[%c0_6, %c0_7], %7 {strides = array<i32>} : memref<16x128xf32, #tpu.memory_space<vmem>>, vector<16x128xf32>,
    return
  }
  func.func @transform_0(%arg0: i32) -> (i32, i32) {
    %c0_i32 = arith.constant 0 : i32
    %c0_i32_0 = arith.constant 0 : i32
    %c0_i32_1 = arith.constant 0 : i32
    return %c0_i32, %c0_i32_0 : i32, i32
  }
  func.func @transform_1(%arg0: i32) -> (i32, i32) {
    %c0_i32 = arith.constant 0 : i32
    %c0_i32_0 = arith.constant 0 : i32
    %c0_i32_1 = arith.constant 0 : i32
    return %c0_i32, %c0_i32_0 : i32, i32
  }
  func.func @transform_2(%arg0: i32) -> (i32, i32) {
    %c0_i32 = arith.constant 0 : i32
    %c0_i32_0 = arith.constant 0 : i32
    %c0_i32_1 = arith.constant 0 : i32
    return %c0_i32, %c0_i32_0 : i32, i32
  }
  func.func @transform_3(%arg0: i32) -> (i32, i32) {
    %c0_i32 = arith.constant 0 : i32
    %c0_i32_0 = arith.constant 0 : i32
    %c0_i32_1 = arith.constant 0 : i32
    return %c0_i32, %c0_i32_0 : i32, i32
  }
}

</mosaic_0001>

<bundles_post_ra>
// kernel: lstm_module_forward.5
= control target key start
LH: loop header
LB: loop body
LE: loop exit
PB: predicated region body
PF: predicated region fallthrough
CT: control target
= control target key end

     0   :  { %v193_v0 = vmov 0.0   ;;  %vm194_vm0 = vmmov 0   ;;  %s251_s1 = inlined_call_operand.vmem [shape: bf16[128,128], index: 1, kind: input, shape index: {}]   ;;  %s252_s0 = inlined_call_operand.vmem [shape: bf16[16,128], index: 0, kind: input, shape index: {}]   ;;  %s253_s2 = inlined_call_operand.vmem [shape: f32[1,128], index: 2, kind: input, shape index: {}]   ;;  %s254_s3 = inlined_call_operand.vmem [shape: f32[16,128], index: 3, kind: output, shape index: {}]  }
   0x1   :  { %162 = vmatprep.subr.bf16.mxu0 %v193_v0  ;;  %v184_v1 = vld [vmem:[%s251_s1] sm:$0xff]   ;;  %178 = vmatprep.mubr.msk.bf16.mxu0 %vm194_vm0, %v193_v0  ;;  %v185_v2 = vld [vmem:[%s251_s1 + $0x8] sm:$0xff]   ;;  %v186_v3 = vld [vmem:[%s251_s1 + $0x10] sm:$0xff]  }
   0x2   :  { %163 = vmatpush3.bf16.msra.mxu0 %v184_v1  ;;  %v187_v4 = vld [vmem:[%s251_s1 + $0x18] sm:$0xff]   ;;  %v188_v5 = vld [vmem:[%s251_s1 + $0x20] sm:$0xff]   ;;  %v189_v6 = vld [vmem:[%s251_s1 + $0x28] sm:$0xff]  }
   0x3   :  { %164 = vmatprep.subr.bf16.mxu0 %v193_v0  ;;  %v190_v7 = vld [vmem:[%s251_s1 + $0x30] sm:$0xff]   ;;  %v191_v8 = vld [vmem:[%s251_s1 + $0x38] sm:$0xff]   ;;  %v192_v9 = vld [vmem:[%s252_s0] sm:$0xff]  }
   0x4   :  { %v143_v10 = vld [vmem:[%s253_s2] ss:$0 sm:$0xff] }
   0x6   :  { %165 = vmatpush3.bf16.msra.mxu0 %v185_v2 }
   0x7   :  { %166 = vmatprep.subr.bf16.mxu0 %v193_v0 }
   0xa   :  { %167 = vmatpush3.bf16.msra.mxu0 %v186_v3 }
   0xb   :  { %168 = vmatprep.subr.bf16.mxu0 %v193_v0 }
   0xe   :  { %169 = vmatpush3.bf16.msra.mxu0 %v187_v4 }
   0xf   :  { %170 = vmatprep.subr.bf16.mxu0 %v193_v0 }
  0x12   :  { %171 = vmatpush3.bf16.msra.mxu0 %v188_v5 }
  0x13   :  { %172 = vmatprep.subr.bf16.mxu0 %v193_v0 }
  0x16   :  { %173 = vmatpush3.bf16.msra.mxu0 %v189_v6 }
  0x17   :  { %174 = vmatprep.subr.bf16.mxu0 %v193_v0 }
  0x1a   :  { %175 = vmatpush3.bf16.msra.mxu0 %v190_v7 }
  0x1b   :  { %176 = vmatprep.subr.bf16.mxu0 %v193_v0 }
  0x1e   :  { %177 = vmatpush3.bf16.msra.mxu0 %v191_v8 }
  0x21   :  { %179 = vmatmul.mubr.bf16.vlgmr.msra.gmra.mrb[0].mxu0 %v192_v9 }
  0xf4   :  { %v128_v11 = vpop.f32.mrb[0].mxu0 }
  0xf5   :  { %v129_v12 = vadd.f32 %v143_v10, %v128_v11  ;;  %v180_v13 = vpop.f32.mrb[1].mxu0 }
  0xf6   :  { %v131_v14 = vpop.f32.mrb[2].mxu0 }
  0xf7   :  { %v135_v15 = vmax.f32 %v129_v12, 0.0  ;;  %v132_v16 = vadd.f32 %v143_v10, %v131_v14  ;;  %v181_v17 = vpop.f32.mrb[3].mxu0 }
  0xf9   :  { %137 = vst [vmem:[%s254_s3] sm:$0xff] %v135_v15  ;;  %v136_v18 = vmax.f32 %v132_v16, 0.0 }
  0xfb   :  { %138 = vst [vmem:[%s254_s3 + $0x8] sm:$0xff] %v136_v18 }

// kernel: lstm_module_forward.4
= control target key start
LH: loop header
LB: loop body
LE: loop exit
PB: predicated region body
PF: predicated region fallthrough
CT: control target
= control target key end

     0   :  { %v2677_v1 = vmov 0   ;;  %s3566_s1 = inlined_call_operand.vmem [shape: bf16[128,512], index: 1, kind: input, shape index: {}]   ;;  %s3567_s0 = inlined_call_operand.vmem [shape: bf16[8,16,128], index: 0, kind: input, shape index: {}]   ;;  %s3568_s2 = inlined_call_operand.vmem [shape: bf16[128,512], index: 2, kind: input, shape index: {}]   ;;  %s3569_s3 = inlined_call_operand.vmem [shape: f32[1,512], index: 3, kind: input, shape index: {}]   ;;  %s3570_s4 = inlined_call_operand.vmem [shape: bf16[16,128], index: 4, kind: output, shape index: {}]  }
   0x1   :  { %v2285_v0 = vld [vmem:[%s3566_s1 + $0x4] ss:$16 sps:$4 sm:$0xff]   ;;  %336 = vmatprep.mubr.bf16.mxu0 %v2677_v1  ;;  %449 = vmatprep.mubr.bf16.mxu1 %v2677_v1  ;;  %v2287_v2 = vld [vmem:[%s3566_s1 + $0xc] ss:$16 sps:$4 sm:$0xff]   ;;  %v2289_v3 = vld [vmem:[%s3566_s1] ss:$16 sps:$4 sm:$0xff]  }
   0x2   :  { %304 = vmatprep.subr.bf16.mxu0 %v2285_v0  ;;  %v2290_v4 = vld [vmem:[%s3566_s1 + $0x8] ss:$16 sps:$4 sm:$0xff]   ;;  %417 = vmatprep.subr.bf16.mxu1 %v2287_v2  ;;  %v2291_v5 = vld [vmem:[%s3566_s1 + $0x24] ss:$16 sps:$4 sm:$0xff]   ;;  %v2293_v6 = vld [vmem:[%s3566_s1 + $0x2c] ss:$16 sps:$4 sm:$0xff]  }
   0x3   :  { %305 = vmatpush1.bf16.msra.mxu0 %v2289_v3  ;;  %418 = vmatpush1.bf16.msra.mxu1 %v2290_v4  ;;  %v2295_v7 = vld [vmem:[%s3566_s1 + $0x20] ss:$16 sps:$4 sm:$0xff]   ;;  %v2296_v8 = vld [vmem:[%s3566_s1 + $0x28] ss:$16 sps:$4 sm:$0xff]   ;;  %v2297_v9 = vld [vmem:[%s3566_s1 + $0x44] ss:$16 sps:$4 sm:$0xff]  }
   0x4   :  { %306 = vmatprep.subr.bf16.mxu0 %v2291_v5  ;;  %419 = vmatprep.subr.bf16.mxu1 %v2293_v6  ;;  %v2299_v10 = vld [vmem:[%s3566_s1 + $0x4c] ss:$16 sps:$4 sm:$0xff]   ;;  %v2301_v11 = vld [vmem:[%s3566_s1 + $0x40] ss:$16 sps:$4 sm:$0xff]   ;;  %v2302_v12 = vld [vmem:[%s3566_s1 + $0x48] ss:$16 sps:$4 sm:$0xff]  }
   0x5   :  { %v2303_v13 = vld [vmem:[%s3566_s1 + $0x64] ss:$16 sps:$4 sm:$0xff]   ;;  %v2305_v14 = vld [vmem:[%s3566_s1 + $0x6c] ss:$16 sps:$4 sm:$0xff]   ;;  %v2307_v15 = vld [vmem:[%s3566_s1 + $0x60] ss:$16 sps:$4 sm:$0xff]  }
   0x6   :  { %v2308_v16 = vld [vmem:[%s3566_s1 + $0x68] ss:$16 sps:$4 sm:$0xff]   ;;  %v2309_v17 = vld [vmem:[%s3566_s1 + $0x84] ss:$16 sps:$4 sm:$0xff]   ;;  %v2311_v18 = vld [vmem:[%s3566_s1 + $0x8c] ss:$16 sps:$4 sm:$0xff]  }
   0x7   :  { %307 = vmatpush1.bf16.msra.mxu0 %v2295_v7  ;;  %420 = vmatpush1.bf16.msra.mxu1 %v2296_v8  ;;  %v2313_v19 = vld [vmem:[%s3566_s1 + $0x80] ss:$16 sps:$4 sm:$0xff]   ;;  %v2314_v20 = vld [vmem:[%s3566_s1 + $0x88] ss:$16 sps:$4 sm:$0xff]   ;;  %v2315_v21 = vld [vmem:[%s3566_s1 + $0xa4] ss:$16 sps:$4 sm:$0xff]  }
   0x8   :  { %308 = vmatprep.subr.bf16.mxu0 %v2297_v9  ;;  %421 = vmatprep.subr.bf16.mxu1 %v2299_v10  ;;  %v2317_v22 = vld [vmem:[%s3566_s1 + $0xac] ss:$16 sps:$4 sm:$0xff]   ;;  %v2319_v23 = vld [vmem:[%s3566_s1 + $0xa0] ss:$16 sps:$4 sm:$0xff]   ;;  %v2320_v24 = vld [vmem:[%s3566_s1 + $0xa8] ss:$16 sps:$4 sm:$0xff]  }
   0x9   :  { %v2321_v25 = vld [vmem:[%s3566_s1 + $0xc4] ss:$16 sps:$4 sm:$0xff]   ;;  %v2323_v26 = vld [vmem:[%s3566_s1 + $0xcc] ss:$16 sps:$4 sm:$0xff]   ;;  %v2325_v27 = vld [vmem:[%s3566_s1 + $0xc0] ss:$16 sps:$4 sm:$0xff]  }
   0xa   :  { %v2326_v28 = vld [vmem:[%s3566_s1 + $0xc8] ss:$16 sps:$4 sm:$0xff]   ;;  %v2327_v29 = vld [vmem:[%s3566_s1 + $0xe4] ss:$16 sps:$4 sm:$0xff]   ;;  %v2329_v30 = vld [vmem:[%s3566_s1 + $0xec] ss:$16 sps:$4 sm:$0xff]  }
   0xb   :  { %309 = vmatpush1.bf16.msra.mxu0 %v2301_v11  ;;  %422 = vmatpush1.bf16.msra.mxu1 %v2302_v12  ;;  %v2331_v31 = vld [vmem:[%s3566_s1 + $0xe0] ss:$16 sps:$4 sm:$0xff]   ;;  %v2332_v32 = vld [vmem:[%s3566_s1 + $0xe8] ss:$16 sps:$4 sm:$0xff]   ;;  %v2805_v33 = vld [vmem:[%s3568_s2 + $0x4] ss:$16 sps:$4 sm:$0xff]   ;;  %v76_v11 = vlaneseq }
   0xc   :  { %310 = vmatprep.subr.bf16.mxu0 %v2303_v13  ;;  %423 = vmatprep.subr.bf16.mxu1 %v2305_v14  ;;  %v2810_v34 = vld [vmem:[%s3568_s2 + $0xc] ss:$16 sps:$4 sm:$0xff]   ;;  %v2333_v35 = vld [vmem:[%s3567_s0] sm:$0xff]   ;;  %v2830_v38 = vld [vmem:[%s3568_s2 + $0x8] ss:$16 sps:$4 sm:$0xff]   ;;  %v2678_v10 = vmov 0.0|0.0  }
   0xd   :  { %v2818_v36 = vld [vmem:[%s3568_s2] ss:$16 sps:$4 sm:$0xff]   ;;  %v2824_v37 = vld [vmem:[%s3568_s2 + $0x24] ss:$16 sps:$4 sm:$0xff]   ;;  %v2835_v39 = vld [vmem:[%s3568_s2 + $0x2c] ss:$16 sps:$4 sm:$0xff]  }
   0xe   :  { %v2842_v40 = vld [vmem:[%s3568_s2 + $0x20] ss:$16 sps:$4 sm:$0xff]   ;;  %v2849_v41 = vld [vmem:[%s3568_s2 + $0x44] ss:$16 sps:$4 sm:$0xff]   ;;  %v2855_v42 = vld [vmem:[%s3568_s2 + $0x28] ss:$16 sps:$4 sm:$0xff]  }
   0xf   :  { %311 = vmatpush1.bf16.msra.mxu0 %v2307_v15  ;;  %424 = vmatpush1.bf16.msra.mxu1 %v2308_v16  ;;  %v2337_v43 = vld [vmem:[%s3567_s0 + $0x8] sm:$0xff]   ;;  %v2865_v44 = vld [vmem:[%s3568_s2 + $0x40] ss:$16 sps:$4 sm:$0xff]   ;;  %v2870_v45 = vld [vmem:[%s3568_s2 + $0x64] ss:$16 sps:$4 sm:$0xff]   ;;  %v77_v12 = vshrl.u32 %v76_v11, 7 }
  0x10   :  { %312 = vmatprep.subr.bf16.mxu0 %v2309_v17  ;;  %425 = vmatprep.subr.bf16.mxu1 %v2311_v18  ;;  %v2876_v46 = vld [vmem:[%s3568_s2 + $0x4c] ss:$16 sps:$4 sm:$0xff]   ;;  %v2882_v47 = vld [vmem:[%s3568_s2 + $0x48] ss:$16 sps:$4 sm:$0xff]   ;;  %v2895_v49 = vld [vmem:[%s3568_s2 + $0x60] ss:$16 sps:$4 sm:$0xff]  }
  0x11   :  { %v2887_v48 = vld [vmem:[%s3568_s2 + $0x6c] ss:$16 sps:$4 sm:$0xff]   ;;  %v2901_v50 = vld [vmem:[%s3568_s2 + $0x84] ss:$16 sps:$4 sm:$0xff]   ;;  %v2908_v51 = vld [vmem:[%s3568_s2 + $0x68] ss:$16 sps:$4 sm:$0xff]  }
  0x12   :  { %v2343_v52 = vld [vmem:[%s3567_s0 + $0x10] sm:$0xff]   ;;  %v2923_v54 = vld [vmem:[%s3568_s2 + $0x8c] ss:$16 sps:$4 sm:$0xff]   ;;  %v2935_v56 = vld [vmem:[%s3568_s2 + $0x88] ss:$16 sps:$4 sm:$0xff]   ;;  %v78_v13 = vsub.s32 0, %v77_v12 }
  0x13   :  { %313 = vmatpush1.bf16.msra.mxu0 %v2313_v19  ;;  %426 = vmatpush1.bf16.msra.mxu1 %v2314_v20  ;;  %v2917_v53 = vld [vmem:[%s3568_s2 + $0x80] ss:$16 sps:$4 sm:$0xff]   ;;  %v2929_v55 = vld [vmem:[%s3568_s2 + $0xa4] ss:$16 sps:$4 sm:$0xff]   ;;  %v2940_v57 = vld [vmem:[%s3568_s2 + $0xac] ss:$16 sps:$4 sm:$0xff]  }
  0x14   :  { %314 = vmatprep.subr.bf16.mxu0 %v2315_v21  ;;  %427 = vmatprep.subr.bf16.mxu1 %v2317_v22  ;;  %v2948_v58 = vld [vmem:[%s3568_s2 + $0xa0] ss:$16 sps:$4 sm:$0xff]   ;;  %v2955_v59 = vld [vmem:[%s3568_s2 + $0xc4] ss:$16 sps:$4 sm:$0xff]   ;;  %v2961_v60 = vld [vmem:[%s3568_s2 + $0xa8] ss:$16 sps:$4 sm:$0xff]  }
  0x15   :  { %v2350_v61 = vld [vmem:[%s3567_s0 + $0x18] sm:$0xff]   ;;  %v2971_v62 = vld [vmem:[%s3568_s2 + $0xc0] ss:$16 sps:$4 sm:$0xff]   ;;  %v2983_v0 = vld [vmem:[%s3568_s2 + $0xe4] ss:$16 sps:$4 sm:$0xff]   ;;  %v82_v15 = vsub.s32 1, %v77_v12 }
  0x16   :  { %v2976_v63 = vld [vmem:[%s3568_s2 + $0xcc] ss:$16 sps:$4 sm:$0xff]   ;;  %v2988_v2 = vld [vmem:[%s3568_s2 + $0xc8] ss:$16 sps:$4 sm:$0xff]   ;;  %v3002_v4 = vld [vmem:[%s3568_s2 + $0xe0] ss:$16 sps:$4 sm:$0xff]  }
  0x17   :  { %315 = vmatpush1.bf16.msra.mxu0 %v2319_v23  ;;  %428 = vmatpush1.bf16.msra.mxu1 %v2320_v24  ;;  %v2993_v3 = vld [vmem:[%s3568_s2 + $0xec] ss:$16 sps:$4 sm:$0xff]   ;;  %v3009_v5 = vld [vmem:[%s3568_s2 + $0xe8] ss:$16 sps:$4 sm:$0xff]   ;;  %v2357_v6 = vld [vmem:[%s3567_s0 + $0x20] sm:$0xff]   ;;  %v90_v20 = vsub.s32 3, %v77_v12 }
  0x18   :  { %316 = vmatprep.subr.bf16.mxu0 %v2321_v25  ;;  %429 = vmatprep.subr.bf16.mxu1 %v2323_v26  ;;  %v2364_v7 = vld [vmem:[%s3567_s0 + $0x28] sm:$0xff]   ;;  %v2371_v8 = vld [vmem:[%s3567_s0 + $0x30] sm:$0xff]   ;;  %v2379_v9 = vld [vmem:[%s3567_s0 + $0x38] sm:$0xff]  }
  0x19   :  { %v74_v14 = vld [vmem:[%s3569_s3] sm:$0xf] }
  0x1a   :  { %v3073_v16 = vrot.slane %v74_v14, %v78_v13  ;;  %v3075_v17 = vrot.slane %v74_v14, %v82_v15 }
  0x1b   :  { %317 = vmatpush1.bf16.msra.mxu0 %v2325_v27  ;;  %430 = vmatpush1.bf16.msra.mxu1 %v2326_v28  ;;  %v86_v28 = vsub.s32 2, %v77_v12 }
  0x1c   :  { %318 = vmatprep.subr.bf16.mxu0 %v2327_v29  ;;  %431 = vmatprep.subr.bf16.mxu1 %v2329_v30 }
  0x1f   :  { %319 = vmatpush1.bf16.msra.mxu0 %v2331_v31  ;;  %432 = vmatpush1.bf16.msra.mxu1 %v2332_v32 }
  0x20   :  { %799 = vmatprep.subr.bf16.mxu0 %v2805_v33  ;;  %842 = vmatprep.subr.bf16.mxu1 %v2810_v34 }
  0x22   :  { %337 = vmatmul.mubr.bf16.vlgmr.msra.gmra.mrb[0].mxu0 %v2333_v35  ;;  %450 = vmatmul.mubr.bf16.vlgmr.msra.gmra.mrb[0].mxu1 %v2333_v35  ;;  %v3080_v35 = vrot.slane %v74_v14, %v90_v20 }
  0x23   :  { %800 = vmatpush1.bf16.msra.mxu0 %v2818_v36  ;;  %346 = vmatprep.mubr.bf16.mxu0 %v2677_v1 }
  0x24   :  { %459 = vmatprep.mubr.bf16.mxu1 %v2677_v1  ;;  %801 = vmatprep.subr.bf16.mxu0 %v2824_v37 }
  0x25   :  { %843 = vmatpush1.bf16.msra.mxu1 %v2830_v38 }
  0x26   :  { %844 = vmatprep.subr.bf16.mxu1 %v2835_v39 }
  0x27   :  { %802 = vmatpush1.bf16.msra.mxu0 %v2842_v40 }
  0x28   :  { %803 = vmatprep.subr.bf16.mxu0 %v2849_v41 }
  0x29   :  { %845 = vmatpush1.bf16.msra.mxu1 %v2855_v42 }
  0x2a   :  { %347 = vmatmul.mubr.bf16.gmra.mrb[4].mxu0 %v2337_v43  ;;  %460 = vmatmul.mubr.bf16.gmra.mrb[4].mxu1 %v2337_v43 }
  0x2b   :  { %356 = vmatprep.mubr.bf16.mxu0 %v2677_v1  ;;  %469 = vmatprep.mubr.bf16.mxu1 %v2677_v1 }
  0x2c   :  { %804 = vmatpush1.bf16.msra.mxu0 %v2865_v44  ;;  %846 = vmatprep.subr.bf16.mxu1 %v2876_v46 }
  0x2d   :  { %805 = vmatprep.subr.bf16.mxu0 %v2870_v45  ;;  %847 = vmatpush1.bf16.msra.mxu1 %v2882_v47 }
  0x2e   :  { %848 = vmatprep.subr.bf16.mxu1 %v2887_v48 }
  0x30   :  { %806 = vmatpush1.bf16.msra.mxu0 %v2895_v49 }
  0x31   :  { %807 = vmatprep.subr.bf16.mxu0 %v2901_v50  ;;  %849 = vmatpush1.bf16.msra.mxu1 %v2908_v51 }
  0x32   :  { %357 = vmatmul.mubr.bf16.gmra.mrb[8].mxu0 %v2343_v52  ;;  %470 = vmatmul.mubr.bf16.gmra.mrb[8].mxu1 %v2343_v52 }
  0x33   :  { %366 = vmatprep.mubr.bf16.mxu0 %v2677_v1  ;;  %479 = vmatprep.mubr.bf16.mxu1 %v2677_v1 }
  0x34   :  { %808 = vmatpush1.bf16.msra.mxu0 %v2917_v53  ;;  %850 = vmatprep.subr.bf16.mxu1 %v2923_v54 }
  0x35   :  { %809 = vmatprep.subr.bf16.mxu0 %v2929_v55  ;;  %851 = vmatpush1.bf16.msra.mxu1 %v2935_v56 }
  0x36   :  { %852 = vmatprep.subr.bf16.mxu1 %v2940_v57 }
  0x38   :  { %810 = vmatpush1.bf16.msra.mxu0 %v2948_v58 }
  0x39   :  { %811 = vmatprep.subr.bf16.mxu0 %v2955_v59  ;;  %853 = vmatpush1.bf16.msra.mxu1 %v2961_v60 }
  0x3a   :  { %367 = vmatmul.mubr.bf16.gmra.mrb[12].mxu0 %v2350_v61  ;;  %480 = vmatmul.mubr.bf16.gmra.mrb[12].mxu1 %v2350_v61 }
  0x3b   :  { %376 = vmatprep.mubr.bf16.mxu0 %v2677_v1  ;;  %489 = vmatprep.mubr.bf16.mxu1 %v2677_v1 }
  0x3c   :  { %812 = vmatpush1.bf16.msra.mxu0 %v2971_v62  ;;  %854 = vmatprep.subr.bf16.mxu1 %v2976_v63 }
  0x3d   :  { %813 = vmatprep.subr.bf16.mxu0 %v2983_v0  ;;  %855 = vmatpush1.bf16.msra.mxu1 %v2988_v2 }
  0x3e   :  { %856 = vmatprep.subr.bf16.mxu1 %v2993_v3 }
  0x40   :  { %814 = vmatpush1.bf16.msra.mxu0 %v3002_v4 }
  0x41   :  { %857 = vmatpush1.bf16.msra.mxu1 %v3009_v5  ;;  %951 = vmatprep.subr.bf16.mxu0 %v2805_v33 }
  0x42   :  { %377 = vmatmul.mubr.bf16.gmra.mrb[16].mxu0 %v2357_v6  ;;  %490 = vmatmul.mubr.bf16.gmra.mrb[16].mxu1 %v2357_v6  ;;  %v3083_v6 = vrot.slane %v74_v14, %v86_v28 }
  0x43   :  { %386 = vmatprep.mubr.bf16.mxu0 %v2677_v1  ;;  %499 = vmatprep.mubr.bf16.mxu1 %v2677_v1 }
  0x44   :  { %994 = vmatprep.subr.bf16.mxu1 %v2810_v34 }
  0x4a   :  { %387 = vmatmul.mubr.bf16.gmra.mrb[20].mxu0 %v2364_v7  ;;  %500 = vmatmul.mubr.bf16.gmra.mrb[20].mxu1 %v2364_v7 }
  0x4b   :  { %396 = vmatprep.mubr.bf16.mxu0 %v2677_v1  ;;  %509 = vmatprep.mubr.bf16.mxu1 %v2677_v1 }
  0x52   :  { %397 = vmatmul.mubr.bf16.gmra.mrb[24].mxu0 %v2371_v8  ;;  %510 = vmatmul.mubr.bf16.gmra.mrb[24].mxu1 %v2371_v8 }
  0x53   :  { %406 = vmatprep.mubr.bf16.mxu0 %v2677_v1  ;;  %519 = vmatprep.mubr.bf16.mxu1 %v2677_v1 }
  0x5a   :  { %407 = vmatmul.mubr.bf16.gmra.mrb[28].mxu0 %v2379_v9  ;;  %520 = vmatmul.mubr.bf16.gmra.mrb[28].mxu1 %v2379_v9 }
  0x5b   :  { %831 = vmatprep.mubr.bf16.mxu0 %v2677_v1  ;;  %874 = vmatprep.mubr.bf16.mxu1 %v2677_v1 }
  0x62   :  { %832 = vmatmul.mubr.bf16.vlgmr.msra.gmra.mrb[0].mxu0 %v2678_v10  ;;  %875 = vmatmul.mubr.bf16.vlgmr.msra.gmra.mrb[0].mxu1 %v2678_v10 }
  0x63   :  { %952 = vmatpush1.bf16.msra.mxu0 %v2818_v36  ;;  %995 = vmatpush1.bf16.msra.mxu1 %v2830_v38 }
  0x64   :  { %953 = vmatprep.subr.bf16.mxu0 %v2824_v37  ;;  %996 = vmatprep.subr.bf16.mxu1 %v2835_v39 }
  0x65   :  { %983 = vmatprep.mubr.bf16.mxu0 %v2677_v1  ;;  %1026 = vmatprep.mubr.bf16.mxu1 %v2677_v1 }
  0x67   :  { %954 = vmatpush1.bf16.msra.mxu0 %v2842_v40  ;;  %997 = vmatpush1.bf16.msra.mxu1 %v2855_v42 }
  0x68   :  { %955 = vmatprep.subr.bf16.mxu0 %v2849_v41  ;;  %998 = vmatprep.subr.bf16.mxu1 %v2876_v46 }
  0x6b   :  { %956 = vmatpush1.bf16.msra.mxu0 %v2865_v44  ;;  %999 = vmatpush1.bf16.msra.mxu1 %v2882_v47 }
  0x6c   :  { %957 = vmatprep.subr.bf16.mxu0 %v2870_v45  ;;  %1000 = vmatprep.subr.bf16.mxu1 %v2887_v48 }
  0x6f   :  { %958 = vmatpush1.bf16.msra.mxu0 %v2895_v49  ;;  %1001 = vmatpush1.bf16.msra.mxu1 %v2908_v51 }
  0x70   :  { %959 = vmatprep.subr.bf16.mxu0 %v2901_v50  ;;  %1002 = vmatprep.subr.bf16.mxu1 %v2923_v54 }
  0x73   :  { %960 = vmatpush1.bf16.msra.mxu0 %v2917_v53  ;;  %1003 = vmatpush1.bf16.msra.mxu1 %v2935_v56 }
  0x74   :  { %961 = vmatprep.subr.bf16.mxu0 %v2929_v55  ;;  %1004 = vmatprep.subr.bf16.mxu1 %v2940_v57 }
  0x77   :  { %962 = vmatpush1.bf16.msra.mxu0 %v2948_v58  ;;  %1005 = vmatpush1.bf16.msra.mxu1 %v2961_v60 }
  0x78   :  { %963 = vmatprep.subr.bf16.mxu0 %v2955_v59  ;;  %1006 = vmatprep.subr.bf16.mxu1 %v2976_v63 }
  0x7b   :  { %964 = vmatpush1.bf16.msra.mxu0 %v2971_v62  ;;  %1007 = vmatpush1.bf16.msra.mxu1 %v2988_v2 }
  0x7c   :  { %965 = vmatprep.subr.bf16.mxu0 %v2983_v0  ;;  %1008 = vmatprep.subr.bf16.mxu1 %v2993_v3 }
  0x7f   :  { %966 = vmatpush1.bf16.msra.mxu0 %v3002_v4  ;;  %1009 = vmatpush1.bf16.msra.mxu1 %v3009_v5 }
  0x80   :  { %1103 = vmatprep.subr.bf16.mxu0 %v2805_v33  ;;  %1146 = vmatprep.subr.bf16.mxu1 %v2810_v34 }
 0x135   :  { %v833_v18 = vpop.f32.mrb[0].mxu0  ;;  %v876_v19 = vpop.f32.mrb[0].mxu1 }
 0x136   :  { %v2155_v21 = vadd.f32 %v833_v18, %v3073_v16  ;;  %v835_v22 = vpop.f32.mrb[1].mxu0  ;;  %v878_v23 = vpop.f32.mrb[1].mxu1  ;;  %v2187_v8 = vadd.f32 %v876_v19, %v3083_v6 }
 0x137   :  { %v2156_v24 = vadd.f32 %v835_v22, %v3075_v17  ;;  %v837_v25 = vpop.f32.mrb[2].mxu0  ;;  %v880_v26 = vpop.f32.mrb[2].mxu1  ;;  %v2188_v7 = vadd.f32 %v878_v23, %v3080_v35 }
 0x138   :  { %v2098_v27 = vmul.f32 -1.442695, %v2155_v21  ;;  %v2157_v29 = vadd.f32 %v837_v25, %v3073_v16  ;;  %v839_v30 = vpop.f32.mrb[3].mxu0  ;;  %v882_v31 = vpop.f32.mrb[3].mxu1  ;;  %v2189_v11 = vadd.f32 %v880_v26, %v3083_v6 }
 0x139   :  { %v2100_v32 = vmul.f32 -1.442695, %v2156_v24  ;;  %v2158_v43 = vadd.f32 %v839_v30, %v3075_v17  ;;  %v2102_v9 = vmul.f32 -1.442695, %v2188_v7  ;;  %v2190_v10 = vadd.f32 %v882_v31, %v3080_v35 }
 0x13a   :  { %2389 = vpow2.f32 %v2098_v27  ;;  %v2099_v52 = vmul.f32 -1.442695, %v2157_v29 }
 0x13b   :  { %2391 = vpow2.f32 %v2100_v32  ;;  %v2101_v61 = vmul.f32 -1.442695, %v2158_v43  ;;  %v2103_v18 = vmul.f32 -1.442695, %v2190_v10 }
 0x13c   :  { %2393 = vpow2.f32 %v2099_v52 }
 0x13d   :  { %2395 = vpow2.f32 %v2101_v61 }
 0x13e   :  { %2397 = vtanh.f32 %v2187_v8 }
 0x13f   :  { %2399 = vpow2.f32 %v2102_v9 }
 0x140   :  { %2401 = vtanh.f32 %v2189_v11 }
 0x144   :  { %v2390_v12 = vpop.eup %2389 }
 0x145   :  { %v2392_v13 = vpop.eup %2391  ;;  %v899_v15 = vadd.f32 1.0, %v2390_v12 }
 0x146   :  { %v911_v20 = vadd.f32 1.0, %v2392_v13  ;;  %v2394_v14 = vpop.eup %2393 }
 0x147   :  { %2403 = vrcp.f32 %v899_v15  ;;  %v900_v21 = vadd.f32 1.0, %v2394_v14  ;;  %v2396_v22 = vpop.eup %2395 }
 0x148   :  { %2405 = vrcp.f32 %v911_v20  ;;  %v912_v19 = vadd.f32 1.0, %v2396_v22  ;;  %v2398_v23 = vpop.eup %2397 }
 0x149   :  { %2407 = vpow2.f32 %v2103_v18  ;;  %v2400_v24 = vpop.eup %2399 }
 0x14a   :  { %2409 = vrcp.f32 %v900_v21  ;;  %v2402_v25 = vpop.eup %2401  ;;  %v925_v32 = vadd.f32 1.0, %v2400_v24 }
 0x14b   :  { %2411 = vrcp.f32 %v912_v19 }
 0x14c   :  { %2413 = vrcp.f32 %v925_v32 }
 0x151   :  { %v2404_v26 = vpop.eup %2403 }
 0x152   :  { %v2406_v27 = vpop.eup %2405  ;;  %v933_v28 = vmul.f32 %v2404_v26, %v2398_v23 }
 0x153   :  { %v2408_v29 = vpop.eup %2407  ;;  %v931_v30 = vmul.f32 0.0, %v2406_v27 }
 0x154   :  { %v2410_v31 = vpop.eup %2409  ;;  %v926_v7 = vadd.f32 1.0, %v2408_v29 }
 0x155   :  { %v3089_v43 = vadd.f32 %v933_v28, %v931_v30  ;;  %v934_v52 = vmul.f32 %v2410_v31, %v2402_v25  ;;  %v2412_v61 = vpop.eup %2411 }
 0x156   :  { %v932_v8 = vmul.f32 0.0, %v2412_v61  ;;  %v2414_v10 = vpop.eup %2413 }
 0x157   :  { %2415 = vtanh.f32 %v3089_v43 }
 0x158   :  { %v3092_v9 = vadd.f32 %v934_v52, %v932_v8  ;;  %2417 = vrcp.f32 %v926_v7 }
 0x15a   :  { %2419 = vtanh.f32 %v3092_v9 }
 0x161   :  { %v2416_v11 = vpop.eup %2415 }
 0x162   :  { %v2418_v12 = vpop.eup %2417  ;;  %v939_v15 = vmul.f32 %v2416_v11, %v2414_v10 }
 0x164   :  { %v2420_v13 = vpop.eup %2419 }
 0x165   :  { %v940_v18 = vmul.f32 %v2420_v13, %v2418_v12 }
 0x167   :  { %v950_v20 = vpack.c.bf16 %v940_v18, %v939_v15 }
 0x169   :  { %984 = vmatmul.mubr.bf16.vlgmr.msra.gmra.mrb[4].mxu0 %v950_v20  ;;  %1027 = vmatmul.mubr.bf16.vlgmr.msra.gmra.mrb[4].mxu1 %v950_v20 }
 0x16a   :  { %1104 = vmatpush1.bf16.msra.mxu0 %v2818_v36  ;;  %1147 = vmatpush1.bf16.msra.mxu1 %v2830_v38 }
 0x16b   :  { %1105 = vmatprep.subr.bf16.mxu0 %v2824_v37  ;;  %1148 = vmatprep.subr.bf16.mxu1 %v2835_v39 }
 0x16c   :  { %1135 = vmatprep.mubr.bf16.mxu0 %v2677_v1  ;;  %1178 = vmatprep.mubr.bf16.mxu1 %v2677_v1 }
 0x16e   :  { %1106 = vmatpush1.bf16.msra.mxu0 %v2842_v40  ;;  %1149 = vmatpush1.bf16.msra.mxu1 %v2855_v42 }
 0x16f   :  { %1107 = vmatprep.subr.bf16.mxu0 %v2849_v41  ;;  %1150 = vmatprep.subr.bf16.mxu1 %v2876_v46 }
 0x172   :  { %1108 = vmatpush1.bf16.msra.mxu0 %v2865_v44  ;;  %1151 = vmatpush1.bf16.msra.mxu1 %v2882_v47 }
 0x173   :  { %1109 = vmatprep.subr.bf16.mxu0 %v2870_v45  ;;  %1152 = vmatprep.subr.bf16.mxu1 %v2887_v48 }
 0x176   :  { %1110 = vmatpush1.bf16.msra.mxu0 %v2895_v49  ;;  %1153 = vmatpush1.bf16.msra.mxu1 %v2908_v51 }
 0x177   :  { %1111 = vmatprep.subr.bf16.mxu0 %v2901_v50  ;;  %1154 = vmatprep.subr.bf16.mxu1 %v2923_v54 }
 0x17a   :  { %1112 = vmatpush1.bf16.msra.mxu0 %v2917_v53  ;;  %1155 = vmatpush1.bf16.msra.mxu1 %v2935_v56 }
 0x17b   :  { %1113 = vmatprep.subr.bf16.mxu0 %v2929_v55  ;;  %1156 = vmatprep.subr.bf16.mxu1 %v2940_v57 }
 0x17e   :  { %1114 = vmatpush1.bf16.msra.mxu0 %v2948_v58  ;;  %1157 = vmatpush1.bf16.msra.mxu1 %v2961_v60 }
 0x17f   :  { %1115 = vmatprep.subr.bf16.mxu0 %v2955_v59  ;;  %1158 = vmatprep.subr.bf16.mxu1 %v2976_v63 }
 0x182   :  { %1116 = vmatpush1.bf16.msra.mxu0 %v2971_v62  ;;  %1159 = vmatpush1.bf16.msra.mxu1 %v2988_v2 }
 0x183   :  { %1117 = vmatprep.subr.bf16.mxu0 %v2983_v0  ;;  %1160 = vmatprep.subr.bf16.mxu1 %v2993_v3 }
 0x186   :  { %1118 = vmatpush1.bf16.msra.mxu0 %v3002_v4  ;;  %1161 = vmatpush1.bf16.msra.mxu1 %v3009_v5 }
 0x187   :  { %1255 = vmatprep.subr.bf16.mxu0 %v2805_v33  ;;  %1298 = vmatprep.subr.bf16.mxu1 %v2810_v34 }
 0x23c   :  { %v985_v14 = vpop.f32.mrb[4].mxu0  ;;  %v1028_v21 = vpop.f32.mrb[4].mxu1 }
 0x23d   :  { %v2159_v22 = vadd.f32 %v985_v14, %v3073_v16  ;;  %v987_v19 = vpop.f32.mrb[5].mxu0  ;;  %v1030_v23 = vpop.f32.mrb[5].mxu1  ;;  %v2191_v8 = vadd.f32 %v1028_v21, %v3083_v6 }
 0x23e   :  { %v2160_v24 = vadd.f32 %v987_v19, %v3075_v17  ;;  %v989_v25 = vpop.f32.mrb[6].mxu0  ;;  %v1032_v26 = vpop.f32.mrb[6].mxu1  ;;  %v2192_v7 = vadd.f32 %v1030_v23, %v3080_v35 }
 0x23f   :  { %v2104_v27 = vmul.f32 -1.442695, %v2159_v22  ;;  %v2161_v28 = vadd.f32 %v989_v25, %v3073_v16  ;;  %v991_v29 = vpop.f32.mrb[7].mxu0  ;;  %v1034_v30 = vpop.f32.mrb[7].mxu1  ;;  %v2193_v12 = vadd.f32 %v1032_v26, %v3083_v6 }
 0x240   :  { %v2106_v31 = vmul.f32 -1.442695, %v2160_v24  ;;  %v2162_v32 = vadd.f32 %v991_v29, %v3075_v17  ;;  %v2108_v10 = vmul.f32 -1.442695, %v2192_v7  ;;  %v2194_v11 = vadd.f32 %v1034_v30, %v3080_v35 }
 0x241   :  { %2421 = vpow2.f32 %v2104_v27  ;;  %v2105_v52 = vmul.f32 -1.442695, %v2161_v28 }
 0x242   :  { %2423 = vpow2.f32 %v2106_v31  ;;  %v2107_v61 = vmul.f32 -1.442695, %v2162_v32  ;;  %v2109_v20 = vmul.f32 -1.442695, %v2194_v11 }
 0x243   :  { %2425 = vpow2.f32 %v2105_v52 }
 0x244   :  { %2427 = vpow2.f32 %v2107_v61 }
 0x245   :  { %2429 = vtanh.f32 %v2191_v8 }
 0x246   :  { %2431 = vpow2.f32 %v2108_v10 }
 0x247   :  { %2433 = vtanh.f32 %v2193_v12 }
 0x24b   :  { %v2422_v13 = vpop.eup %2421 }
 0x24c   :  { %v2424_v15 = vpop.eup %2423  ;;  %v1051_v18 = vadd.f32 1.0, %v2422_v13 }
 0x24d   :  { %v1063_v14 = vadd.f32 1.0, %v2424_v15  ;;  %v2426_v22 = vpop.eup %2425 }
 0x24e   :  { %2435 = vrcp.f32 %v1051_v18  ;;  %v1052_v19 = vadd.f32 1.0, %v2426_v22  ;;  %v2428_v23 = vpop.eup %2427 }
 0x24f   :  { %2437 = vrcp.f32 %v1063_v14  ;;  %v1064_v21 = vadd.f32 1.0, %v2428_v23  ;;  %v2430_v24 = vpop.eup %2429 }
 0x250   :  { %2439 = vpow2.f32 %v2109_v20  ;;  %v2432_v25 = vpop.eup %2431 }
 0x251   :  { %2441 = vrcp.f32 %v1052_v19  ;;  %v2434_v26 = vpop.eup %2433  ;;  %v1077_v52 = vadd.f32 1.0, %v2432_v25 }
 0x252   :  { %2443 = vrcp.f32 %v1064_v21 }
 0x253   :  { %2445 = vrcp.f32 %v1077_v52 }
 0x258   :  { %v2436_v27 = vpop.eup %2435 }
 0x259   :  { %v2438_v28 = vpop.eup %2437  ;;  %v1085_v29 = vmul.f32 %v2436_v27, %v2430_v24 }
 0x25a   :  { %v2440_v30 = vpop.eup %2439  ;;  %v1083_v31 = vmul.f32 %v2438_v28, %v3089_v43 }
 0x25b   :  { %v2442_v32 = vpop.eup %2441  ;;  %v1078_v10 = vadd.f32 1.0, %v2440_v30 }
 0x25c   :  { %v3138_v61 = vadd.f32 %v1085_v29, %v1083_v31  ;;  %v1086_v7 = vmul.f32 %v2442_v32, %v2434_v26  ;;  %v2444_v8 = vpop.eup %2443 }
 0x25d   :  { %v1084_v11 = vmul.f32 %v2444_v8, %v3092_v9  ;;  %v2446_v13 = vpop.eup %2445 }
 0x25e   :  { %2447 = vtanh.f32 %v3138_v61 }
 0x25f   :  { %v3142_v12 = vadd.f32 %v1086_v7, %v1084_v11  ;;  %2449 = vrcp.f32 %v1078_v10 }
 0x261   :  { %2451 = vtanh.f32 %v3142_v12 }
 0x268   :  { %v2448_v15 = vpop.eup %2447 }
 0x269   :  { %v2450_v43 = vpop.eup %2449  ;;  %v1091_v20 = vmul.f32 %v2448_v15, %v2446_v13 }
 0x26b   :  { %v2452_v18 = vpop.eup %2451 }
 0x26c   :  { %v1092_v14 = vmul.f32 %v2452_v18, %v2450_v43 }
 0x26e   :  { %v1102_v22 = vpack.c.bf16 %v1092_v14, %v1091_v20 }
 0x270   :  { %1136 = vmatmul.mubr.bf16.vlgmr.msra.gmra.mrb[8].mxu0 %v1102_v22  ;;  %1179 = vmatmul.mubr.bf16.vlgmr.msra.gmra.mrb[8].mxu1 %v1102_v22 }
 0x271   :  { %1256 = vmatpush1.bf16.msra.mxu0 %v2818_v36  ;;  %1299 = vmatpush1.bf16.msra.mxu1 %v2830_v38 }
 0x272   :  { %1257 = vmatprep.subr.bf16.mxu0 %v2824_v37  ;;  %1300 = vmatprep.subr.bf16.mxu1 %v2835_v39 }
 0x273   :  { %1287 = vmatprep.mubr.bf16.mxu0 %v2677_v1  ;;  %1330 = vmatprep.mubr.bf16.mxu1 %v2677_v1 }
 0x275   :  { %1258 = vmatpush1.bf16.msra.mxu0 %v2842_v40  ;;  %1301 = vmatpush1.bf16.msra.mxu1 %v2855_v42 }
 0x276   :  { %1259 = vmatprep.subr.bf16.mxu0 %v2849_v41  ;;  %1302 = vmatprep.subr.bf16.mxu1 %v2876_v46 }
 0x279   :  { %1260 = vmatpush1.bf16.msra.mxu0 %v2865_v44  ;;  %1303 = vmatpush1.bf16.msra.mxu1 %v2882_v47 }
 0x27a   :  { %1261 = vmatprep.subr.bf16.mxu0 %v2870_v45  ;;  %1304 = vmatprep.subr.bf16.mxu1 %v2887_v48 }
 0x27d   :  { %1262 = vmatpush1.bf16.msra.mxu0 %v2895_v49  ;;  %1305 = vmatpush1.bf16.msra.mxu1 %v2908_v51 }
 0x27e   :  { %1263 = vmatprep.subr.bf16.mxu0 %v2901_v50  ;;  %1306 = vmatprep.subr.bf16.mxu1 %v2923_v54 }
 0x281   :  { %1264 = vmatpush1.bf16.msra.mxu0 %v2917_v53  ;;  %1307 = vmatpush1.bf16.msra.mxu1 %v2935_v56 }
 0x282   :  { %1265 = vmatprep.subr.bf16.mxu0 %v2929_v55  ;;  %1308 = vmatprep.subr.bf16.mxu1 %v2940_v57 }
 0x285   :  { %1266 = vmatpush1.bf16.msra.mxu0 %v2948_v58  ;;  %1309 = vmatpush1.bf16.msra.mxu1 %v2961_v60 }
 0x286   :  { %1267 = vmatprep.subr.bf16.mxu0 %v2955_v59  ;;  %1310 = vmatprep.subr.bf16.mxu1 %v2976_v63 }
 0x289   :  { %1268 = vmatpush1.bf16.msra.mxu0 %v2971_v62  ;;  %1311 = vmatpush1.bf16.msra.mxu1 %v2988_v2 }
 0x28a   :  { %1269 = vmatprep.subr.bf16.mxu0 %v2983_v0  ;;  %1312 = vmatprep.subr.bf16.mxu1 %v2993_v3 }
 0x28d   :  { %1270 = vmatpush1.bf16.msra.mxu0 %v3002_v4  ;;  %1313 = vmatpush1.bf16.msra.mxu1 %v3009_v5 }
 0x28e   :  { %1407 = vmatprep.subr.bf16.mxu0 %v2805_v33  ;;  %1450 = vmatprep.subr.bf16.mxu1 %v2810_v34 }
 0x343   :  { %v1137_v9 = vpop.f32.mrb[8].mxu0  ;;  %v1180_v19 = vpop.f32.mrb[8].mxu1 }
 0x344   :  { %v2163_v23 = vadd.f32 %v1137_v9, %v3073_v16  ;;  %v1139_v21 = vpop.f32.mrb[9].mxu0  ;;  %v1182_v24 = vpop.f32.mrb[9].mxu1  ;;  %v2195_v11 = vadd.f32 %v1180_v19, %v3083_v6 }
 0x345   :  { %v2164_v25 = vadd.f32 %v1139_v21, %v3075_v17  ;;  %v1141_v26 = vpop.f32.mrb[10].mxu0  ;;  %v1184_v27 = vpop.f32.mrb[10].mxu1  ;;  %v2196_v10 = vadd.f32 %v1182_v24, %v3080_v35 }
 0x346   :  { %v2110_v28 = vmul.f32 -1.442695, %v2163_v23  ;;  %v2165_v29 = vadd.f32 %v1141_v26, %v3073_v16  ;;  %v1143_v30 = vpop.f32.mrb[11].mxu0  ;;  %v1186_v31 = vpop.f32.mrb[11].mxu1  ;;  %v2197_v43 = vadd.f32 %v1184_v27, %v3083_v6 }
 0x347   :  { %v2112_v32 = vmul.f32 -1.442695, %v2164_v25  ;;  %v2166_v52 = vadd.f32 %v1143_v30, %v3075_v17  ;;  %v2114_v13 = vmul.f32 -1.442695, %v2196_v10  ;;  %v2198_v15 = vadd.f32 %v1186_v31, %v3080_v35 }
 0x348   :  { %2453 = vpow2.f32 %v2110_v28  ;;  %v2111_v7 = vmul.f32 -1.442695, %v2165_v29 }
 0x349   :  { %2455 = vpow2.f32 %v2112_v32  ;;  %v2113_v8 = vmul.f32 -1.442695, %v2166_v52  ;;  %v2115_v22 = vmul.f32 -1.442695, %v2198_v15 }
 0x34a   :  { %2457 = vpow2.f32 %v2111_v7 }
 0x34b   :  { %2459 = vpow2.f32 %v2113_v8 }
 0x34c   :  { %2461 = vtanh.f32 %v2195_v11 }
 0x34d   :  { %2463 = vpow2.f32 %v2114_v13 }
 0x34e   :  { %2465 = vtanh.f32 %v2197_v43 }
 0x352   :  { %v2454_v18 = vpop.eup %2453 }
 0x353   :  { %v2456_v20 = vpop.eup %2455  ;;  %v1203_v14 = vadd.f32 1.0, %v2454_v18 }
 0x354   :  { %v1215_v9 = vadd.f32 1.0, %v2456_v20  ;;  %v2458_v23 = vpop.eup %2457 }
 0x355   :  { %2467 = vrcp.f32 %v1203_v14  ;;  %v1204_v21 = vadd.f32 1.0, %v2458_v23  ;;  %v2460_v24 = vpop.eup %2459 }
 0x356   :  { %2469 = vrcp.f32 %v1215_v9  ;;  %v1216_v19 = vadd.f32 1.0, %v2460_v24  ;;  %v2462_v25 = vpop.eup %2461 }
 0x357   :  { %2471 = vpow2.f32 %v2115_v22  ;;  %v2464_v26 = vpop.eup %2463 }
 0x358   :  { %2473 = vrcp.f32 %v1204_v21  ;;  %v2466_v27 = vpop.eup %2465  ;;  %v1229_v7 = vadd.f32 1.0, %v2464_v26 }
 0x359   :  { %2475 = vrcp.f32 %v1216_v19 }
 0x35a   :  { %2477 = vrcp.f32 %v1229_v7 }
 0x35f   :  { %v2468_v28 = vpop.eup %2467 }
 0x360   :  { %v2470_v29 = vpop.eup %2469  ;;  %v1237_v30 = vmul.f32 %v2468_v28, %v2462_v25 }
 0x361   :  { %v2472_v31 = vpop.eup %2471  ;;  %v1235_v32 = vmul.f32 %v2470_v29, %v3138_v61 }
 0x362   :  { %v2474_v52 = vpop.eup %2473  ;;  %v1230_v13 = vadd.f32 1.0, %v2472_v31 }
 0x363   :  { %v3188_v8 = vadd.f32 %v1237_v30, %v1235_v32  ;;  %v1238_v10 = vmul.f32 %v2474_v52, %v2466_v27  ;;  %v2476_v11 = vpop.eup %2475 }
 0x364   :  { %v1236_v15 = vmul.f32 %v2476_v11, %v3142_v12  ;;  %v2478_v18 = vpop.eup %2477 }
 0x365   :  { %2479 = vtanh.f32 %v3188_v8 }
 0x366   :  { %v3192_v43 = vadd.f32 %v1238_v10, %v1236_v15  ;;  %2481 = vrcp.f32 %v1230_v13 }
 0x368   :  { %2483 = vtanh.f32 %v3192_v43 }
 0x36f   :  { %v2480_v20 = vpop.eup %2479 }
 0x370   :  { %v2482_v61 = vpop.eup %2481  ;;  %v1243_v22 = vmul.f32 %v2480_v20, %v2478_v18 }
 0x372   :  { %v2484_v14 = vpop.eup %2483 }
 0x373   :  { %v1244_v9 = vmul.f32 %v2484_v14, %v2482_v61 }
 0x375   :  { %v1254_v23 = vpack.c.bf16 %v1244_v9, %v1243_v22 }
 0x377   :  { %1288 = vmatmul.mubr.bf16.vlgmr.msra.gmra.mrb[12].mxu0 %v1254_v23  ;;  %1331 = vmatmul.mubr.bf16.vlgmr.msra.gmra.mrb[12].mxu1 %v1254_v23 }
 0x378   :  { %1408 = vmatpush1.bf16.msra.mxu0 %v2818_v36  ;;  %1451 = vmatpush1.bf16.msra.mxu1 %v2830_v38 }
 0x379   :  { %1409 = vmatprep.subr.bf16.mxu0 %v2824_v37  ;;  %1452 = vmatprep.subr.bf16.mxu1 %v2835_v39 }
 0x37a   :  { %1439 = vmatprep.mubr.bf16.mxu0 %v2677_v1  ;;  %1482 = vmatprep.mubr.bf16.mxu1 %v2677_v1 }
 0x37c   :  { %1410 = vmatpush1.bf16.msra.mxu0 %v2842_v40  ;;  %1453 = vmatpush1.bf16.msra.mxu1 %v2855_v42 }
 0x37d   :  { %1411 = vmatprep.subr.bf16.mxu0 %v2849_v41  ;;  %1454 = vmatprep.subr.bf16.mxu1 %v2876_v46 }
 0x380   :  { %1412 = vmatpush1.bf16.msra.mxu0 %v2865_v44  ;;  %1455 = vmatpush1.bf16.msra.mxu1 %v2882_v47 }
 0x381   :  { %1413 = vmatprep.subr.bf16.mxu0 %v2870_v45  ;;  %1456 = vmatprep.subr.bf16.mxu1 %v2887_v48 }
 0x384   :  { %1414 = vmatpush1.bf16.msra.mxu0 %v2895_v49  ;;  %1457 = vmatpush1.bf16.msra.mxu1 %v2908_v51 }
 0x385   :  { %1415 = vmatprep.subr.bf16.mxu0 %v2901_v50  ;;  %1458 = vmatprep.subr.bf16.mxu1 %v2923_v54 }
 0x388   :  { %1416 = vmatpush1.bf16.msra.mxu0 %v2917_v53  ;;  %1459 = vmatpush1.bf16.msra.mxu1 %v2935_v56 }
 0x389   :  { %1417 = vmatprep.subr.bf16.mxu0 %v2929_v55  ;;  %1460 = vmatprep.subr.bf16.mxu1 %v2940_v57 }
 0x38c   :  { %1418 = vmatpush1.bf16.msra.mxu0 %v2948_v58  ;;  %1461 = vmatpush1.bf16.msra.mxu1 %v2961_v60 }
 0x38d   :  { %1419 = vmatprep.subr.bf16.mxu0 %v2955_v59  ;;  %1462 = vmatprep.subr.bf16.mxu1 %v2976_v63 }
 0x390   :  { %1420 = vmatpush1.bf16.msra.mxu0 %v2971_v62  ;;  %1463 = vmatpush1.bf16.msra.mxu1 %v2988_v2 }
 0x391   :  { %1421 = vmatprep.subr.bf16.mxu0 %v2983_v0  ;;  %1464 = vmatprep.subr.bf16.mxu1 %v2993_v3 }
 0x394   :  { %1422 = vmatpush1.bf16.msra.mxu0 %v3002_v4  ;;  %1465 = vmatpush1.bf16.msra.mxu1 %v3009_v5 }
 0x395   :  { %1559 = vmatprep.subr.bf16.mxu0 %v2805_v33  ;;  %1602 = vmatprep.subr.bf16.mxu1 %v2810_v34 }
 0x44a   :  { %v1289_v36 = vpop.f32.mrb[12].mxu0  ;;  %v1332_v37 = vpop.f32.mrb[12].mxu1 }
 0x44b   :  { %v2167_v38 = vadd.f32 %v1289_v36, %v3073_v16  ;;  %v1291_v39 = vpop.f32.mrb[13].mxu0  ;;  %v1334_v40 = vpop.f32.mrb[13].mxu1  ;;  %v2199_v53 = vadd.f32 %v1332_v37, %v3083_v6 }
 0x44c   :  { %v2168_v41 = vadd.f32 %v1291_v39, %v3075_v17  ;;  %v1293_v42 = vpop.f32.mrb[14].mxu0  ;;  %v1336_v44 = vpop.f32.mrb[14].mxu1  ;;  %v2200_v51 = vadd.f32 %v1334_v40, %v3080_v35 }
 0x44d   :  { %v2116_v45 = vmul.f32 -1.442695, %v2167_v38  ;;  %v2169_v46 = vadd.f32 %v1293_v42, %v3073_v16  ;;  %v1295_v47 = vpop.f32.mrb[15].mxu0  ;;  %v1338_v48 = vpop.f32.mrb[15].mxu1  ;;  %v2201_v56 = vadd.f32 %v1336_v44, %v3083_v6  ;;  %v3254_v42 = vld [vmem:[%s3568_s2 + $0x8] ss:$16 sps:$4 sm:$0xff]  }
 0x44e   :  { %v2118_v49 = vmul.f32 -1.442695, %v2168_v41  ;;  %v2170_v33 = vadd.f32 %v1295_v47, %v3075_v17  ;;  %v2120_v54 = vmul.f32 -1.442695, %v2200_v51  ;;  %v2202_v55 = vadd.f32 %v1338_v48, %v3080_v35  ;;  %v3260_v44 = vld [vmem:[%s3568_s2 + $0x24] ss:$16 sps:$4 sm:$0xff]  }
 0x44f   :  { %2485 = vpow2.f32 %v2116_v45  ;;  %v2117_v34 = vmul.f32 -1.442695, %v2169_v46  ;;  %v3266_v45 = vld [vmem:[%s3568_s2 + $0x2c] ss:$16 sps:$4 sm:$0xff]   ;;  %v3274_v46 = vld [vmem:[%s3568_s2 + $0x20] ss:$16 sps:$4 sm:$0xff]  }
 0x450   :  { %2487 = vpow2.f32 %v2118_v49  ;;  %v2119_v50 = vmul.f32 -1.442695, %v2170_v33  ;;  %v2121_v19 = vmul.f32 -1.442695, %v2202_v55  ;;  %v3280_v47 = vld [vmem:[%s3568_s2 + $0x28] ss:$16 sps:$4 sm:$0xff]  }
 0x451   :  { %2489 = vpow2.f32 %v2117_v34  ;;  %v3286_v48 = vld [vmem:[%s3568_s2 + $0x44] ss:$16 sps:$4 sm:$0xff]   ;;  %v3292_v49 = vld [vmem:[%s3568_s2 + $0x4c] ss:$16 sps:$4 sm:$0xff]   ;;  %v3298_v33 = vld [vmem:[%s3568_s2 + $0x40] ss:$16 sps:$4 sm:$0xff]  }
 0x452   :  { %2491 = vpow2.f32 %v2119_v50  ;;  %v3304_v34 = vld [vmem:[%s3568_s2 + $0x48] ss:$16 sps:$4 sm:$0xff]   ;;  %v3310_v50 = vld [vmem:[%s3568_s2 + $0x64] ss:$16 sps:$4 sm:$0xff]   ;;  %v3316_v51 = vld [vmem:[%s3568_s2 + $0x6c] ss:$16 sps:$4 sm:$0xff]  }
 0x453   :  { %2493 = vtanh.f32 %v2199_v53  ;;  %v3322_v53 = vld [vmem:[%s3568_s2 + $0x60] ss:$16 sps:$4 sm:$0xff]   ;;  %v3334_v55 = vld [vmem:[%s3568_s2 + $0x84] ss:$16 sps:$4 sm:$0xff]  }
 0x454   :  { %2495 = vpow2.f32 %v2120_v54  ;;  %v3328_v54 = vld [vmem:[%s3568_s2 + $0x68] ss:$16 sps:$4 sm:$0xff]  }
 0x455   :  { %2497 = vtanh.f32 %v2201_v56  ;;  %v3340_v56 = vld [vmem:[%s3568_s2 + $0x8c] ss:$16 sps:$4 sm:$0xff]  }
 0x459   :  { %v2486_v12 = vpop.eup %2485 }
 0x45a   :  { %v2488_v21 = vpop.eup %2487  ;;  %v1355_v24 = vadd.f32 1.0, %v2486_v12  ;;  %v3346_v12 = vld [vmem:[%s3568_s2 + $0x80] ss:$16 sps:$4 sm:$0xff]  }
 0x45b   :  { %v1367_v25 = vadd.f32 1.0, %v2488_v21  ;;  %v2490_v26 = vpop.eup %2489  ;;  %v3352_v21 = vld [vmem:[%s3568_s2 + $0x88] ss:$16 sps:$4 sm:$0xff]  }
 0x45c   :  { %2499 = vrcp.f32 %v1355_v24  ;;  %v1356_v27 = vadd.f32 1.0, %v2490_v26  ;;  %v2492_v28 = vpop.eup %2491  ;;  %v3358_v24 = vld [vmem:[%s3568_s2 + $0xa4] ss:$16 sps:$4 sm:$0xff]  }
 0x45d   :  { %2501 = vrcp.f32 %v1367_v25  ;;  %v1368_v29 = vadd.f32 1.0, %v2492_v28  ;;  %v2494_v30 = vpop.eup %2493 }
 0x45e   :  { %2503 = vpow2.f32 %v2121_v19  ;;  %v2496_v31 = vpop.eup %2495 }
 0x45f   :  { %2505 = vrcp.f32 %v1356_v27  ;;  %v2498_v32 = vpop.eup %2497  ;;  %v1381_v18 = vadd.f32 1.0, %v2496_v31 }
 0x460   :  { %2507 = vrcp.f32 %v1368_v29 }
 0x461   :  { %2509 = vrcp.f32 %v1381_v18 }
 0x466   :  { %v2500_v52 = vpop.eup %2499 }
 0x467   :  { %v2502_v7 = vpop.eup %2501  ;;  %v1389_v10 = vmul.f32 %v2500_v52, %v2494_v30 }
 0x468   :  { %v2504_v11 = vpop.eup %2503  ;;  %v1387_v13 = vmul.f32 %v2502_v7, %v3188_v8 }
 0x469   :  { %v2506_v15 = vpop.eup %2505  ;;  %v1382_v22 = vadd.f32 1.0, %v2504_v11 }
 0x46a   :  { %v3238_v20 = vadd.f32 %v1389_v10, %v1387_v13  ;;  %v1390_v61 = vmul.f32 %v2506_v15, %v2498_v32  ;;  %v2508_v14 = vpop.eup %2507 }
 0x46b   :  { %v1388_v9 = vmul.f32 %v2508_v14, %v3192_v43  ;;  %v2510_v36 = vpop.eup %2509  ;;  %v3248_v43 = vld [vmem:[%s3568_s2] ss:$16 sps:$4 sm:$0xff]  }
 0x46c   :  { %2511 = vtanh.f32 %v3238_v20 }
 0x46d   :  { %v3242_v23 = vadd.f32 %v1390_v61, %v1388_v9  ;;  %2513 = vrcp.f32 %v1382_v22 }
 0x46f   :  { %2515 = vtanh.f32 %v3242_v23 }
 0x476   :  { %v2512_v37 = vpop.eup %2511 }
 0x477   :  { %v2514_v8 = vpop.eup %2513  ;;  %v1395_v39 = vmul.f32 %v2512_v37, %v2510_v36 }
 0x479   :  { %v2516_v38 = vpop.eup %2515 }
 0x47a   :  { %v1396_v40 = vmul.f32 %v2516_v38, %v2514_v8 }
 0x47c   :  { %v1406_v41 = vpack.c.bf16 %v1396_v40, %v1395_v39 }
 0x47e   :  { %1440 = vmatmul.mubr.bf16.vlgmr.msra.gmra.mrb[16].mxu0 %v1406_v41  ;;  %1483 = vmatmul.mubr.bf16.vlgmr.msra.gmra.mrb[16].mxu1 %v1406_v41 }
 0x47f   :  { %1560 = vmatpush1.bf16.msra.mxu0 %v3248_v43  ;;  %1603 = vmatpush1.bf16.msra.mxu1 %v3254_v42 }
 0x480   :  { %1561 = vmatprep.subr.bf16.mxu0 %v3260_v44  ;;  %1604 = vmatprep.subr.bf16.mxu1 %v3266_v45 }
 0x481   :  { %1591 = vmatprep.mubr.bf16.mxu0 %v2677_v1  ;;  %1634 = vmatprep.mubr.bf16.mxu1 %v2677_v1 }
 0x483   :  { %1562 = vmatpush1.bf16.msra.mxu0 %v3274_v46  ;;  %1605 = vmatpush1.bf16.msra.mxu1 %v3280_v47 }
 0x484   :  { %1563 = vmatprep.subr.bf16.mxu0 %v3286_v48  ;;  %1606 = vmatprep.subr.bf16.mxu1 %v3292_v49 }
 0x487   :  { %1564 = vmatpush1.bf16.msra.mxu0 %v3298_v33  ;;  %1607 = vmatpush1.bf16.msra.mxu1 %v3304_v34 }
 0x488   :  { %1565 = vmatprep.subr.bf16.mxu0 %v3310_v50  ;;  %1608 = vmatprep.subr.bf16.mxu1 %v3316_v51 }
 0x48b   :  { %1566 = vmatpush1.bf16.msra.mxu0 %v3322_v53  ;;  %1609 = vmatpush1.bf16.msra.mxu1 %v3328_v54 }
 0x48c   :  { %1567 = vmatprep.subr.bf16.mxu0 %v3334_v55  ;;  %1610 = vmatprep.subr.bf16.mxu1 %v3340_v56 }
 0x48f   :  { %1568 = vmatpush1.bf16.msra.mxu0 %v3346_v12  ;;  %1611 = vmatpush1.bf16.msra.mxu1 %v3352_v21 }
 0x490   :  { %1569 = vmatprep.subr.bf16.mxu0 %v3358_v24  ;;  %1612 = vmatprep.subr.bf16.mxu1 %v2940_v57  ;;  %v3375_v57 = vld [vmem:[%s3568_s2 + $0x4] ss:$16 sps:$4 sm:$0xff]  }
 0x493   :  { %1570 = vmatpush1.bf16.msra.mxu0 %v2948_v58  ;;  %1613 = vmatpush1.bf16.msra.mxu1 %v2961_v60  ;;  %v3381_v58 = vld [vmem:[%s3568_s2 + $0xc] ss:$16 sps:$4 sm:$0xff]  }
 0x494   :  { %1571 = vmatprep.subr.bf16.mxu0 %v2955_v59  ;;  %1614 = vmatprep.subr.bf16.mxu1 %v2976_v63 }
 0x497   :  { %1572 = vmatpush1.bf16.msra.mxu0 %v2971_v62  ;;  %1615 = vmatpush1.bf16.msra.mxu1 %v2988_v2 }
 0x498   :  { %1573 = vmatprep.subr.bf16.mxu0 %v2983_v0  ;;  %1616 = vmatprep.subr.bf16.mxu1 %v2993_v3 }
 0x49b   :  { %1574 = vmatpush1.bf16.msra.mxu0 %v3002_v4  ;;  %1617 = vmatpush1.bf16.msra.mxu1 %v3009_v5 }
 0x49c   :  { %1711 = vmatprep.subr.bf16.mxu0 %v3375_v57  ;;  %1754 = vmatprep.subr.bf16.mxu1 %v3381_v58 }
 0x551   :  { %v1441_v59 = vpop.f32.mrb[16].mxu0  ;;  %v1484_v60 = vpop.f32.mrb[16].mxu1 }
 0x552   :  { %v2171_v62 = vadd.f32 %v1441_v59, %v3073_v16  ;;  %v1443_v63 = vpop.f32.mrb[17].mxu0  ;;  %v1486_v0 = vpop.f32.mrb[17].mxu1  ;;  %v2203_v32 = vadd.f32 %v1484_v60, %v3083_v6 }
 0x553   :  { %v2172_v2 = vadd.f32 %v1443_v63, %v3075_v17  ;;  %v1445_v3 = vpop.f32.mrb[18].mxu0  ;;  %v1488_v4 = vpop.f32.mrb[18].mxu1  ;;  %v2204_v31 = vadd.f32 %v1486_v0, %v3080_v35 }
 0x554   :  { %v2122_v5 = vmul.f32 -1.442695, %v2171_v62  ;;  %v2173_v19 = vadd.f32 %v1445_v3, %v3073_v16  ;;  %v1447_v25 = vpop.f32.mrb[19].mxu0  ;;  %v1490_v26 = vpop.f32.mrb[19].mxu1  ;;  %v2205_v10 = vadd.f32 %v1488_v4, %v3083_v6 }
 0x555   :  { %v2124_v27 = vmul.f32 -1.442695, %v2172_v2  ;;  %v2174_v28 = vadd.f32 %v1447_v25, %v3075_v17  ;;  %v2126_v52 = vmul.f32 -1.442695, %v2204_v31  ;;  %v2206_v7 = vadd.f32 %v1490_v26, %v3080_v35  ;;  %v3430_v31 = vld [vmem:[%s3568_s2 + $0xa0] ss:$16 sps:$4 sm:$0xff]  }
 0x556   :  { %2517 = vpow2.f32 %v2122_v5  ;;  %v2123_v29 = vmul.f32 -1.442695, %v2173_v19 }
 0x557   :  { %2519 = vpow2.f32 %v2124_v27  ;;  %v2125_v30 = vmul.f32 -1.442695, %v2174_v28  ;;  %v2127_v18 = vmul.f32 -1.442695, %v2206_v7  ;;  %v3448_v7 = vld [vmem:[%s3568_s2 + $0xcc] ss:$16 sps:$4 sm:$0xff]  }
 0x558   :  { %2521 = vpow2.f32 %v2123_v29 }
 0x559   :  { %2523 = vpow2.f32 %v2125_v30 }
 0x55a   :  { %2525 = vtanh.f32 %v2203_v32  ;;  %v3436_v32 = vld [vmem:[%s3568_s2 + $0xa8] ss:$16 sps:$4 sm:$0xff]  }
 0x55b   :  { %2527 = vpow2.f32 %v2126_v52  ;;  %v3442_v52 = vld [vmem:[%s3568_s2 + $0xc4] ss:$16 sps:$4 sm:$0xff]  }
 0x55c   :  { %2529 = vtanh.f32 %v2205_v10  ;;  %v3454_v10 = vld [vmem:[%s3568_s2 + $0xc0] ss:$16 sps:$4 sm:$0xff]  }
 0x560   :  { %v2518_v11 = vpop.eup %2517 }
 0x561   :  { %v2520_v13 = vpop.eup %2519  ;;  %v1507_v15 = vadd.f32 1.0, %v2518_v11  ;;  %v3460_v11 = vld [vmem:[%s3568_s2 + $0xc8] ss:$16 sps:$4 sm:$0xff]  }
 0x562   :  { %v1519_v61 = vadd.f32 1.0, %v2520_v13  ;;  %v2522_v14 = vpop.eup %2521  ;;  %v3466_v13 = vld [vmem:[%s3568_s2 + $0xe4] ss:$16 sps:$4 sm:$0xff]  }
 0x563   :  { %2531 = vrcp.f32 %v1507_v15  ;;  %v1508_v22 = vadd.f32 1.0, %v2522_v14  ;;  %v2524_v9 = vpop.eup %2523  ;;  %v3472_v15 = vld [vmem:[%s3568_s2 + $0xec] ss:$16 sps:$4 sm:$0xff]  }
 0x564   :  { %2533 = vrcp.f32 %v1519_v61  ;;  %v1520_v36 = vadd.f32 1.0, %v2524_v9  ;;  %v2526_v37 = vpop.eup %2525  ;;  %v3484_v61 = vld [vmem:[%s3568_s2 + $0xe8] ss:$16 sps:$4 sm:$0xff]  }
 0x565   :  { %2535 = vpow2.f32 %v2127_v18  ;;  %v2528_v8 = vpop.eup %2527  ;;  %v3478_v18 = vld [vmem:[%s3568_s2 + $0xe0] ss:$16 sps:$4 sm:$0xff]  }
 0x566   :  { %2537 = vrcp.f32 %v1508_v22  ;;  %v2530_v38 = vpop.eup %2529  ;;  %v1533_v63 = vadd.f32 1.0, %v2528_v8 }
 0x567   :  { %2539 = vrcp.f32 %v1520_v36 }
 0x568   :  { %2541 = vrcp.f32 %v1533_v63 }
 0x56d   :  { %v2532_v39 = vpop.eup %2531 }
 0x56e   :  { %v2534_v40 = vpop.eup %2533  ;;  %v1541_v41 = vmul.f32 %v2532_v39, %v2526_v37 }
 0x56f   :  { %v2536_v59 = vpop.eup %2535  ;;  %v1539_v60 = vmul.f32 %v2534_v40, %v3238_v20 }
 0x570   :  { %v2538_v62 = vpop.eup %2537  ;;  %v1534_v4 = vadd.f32 1.0, %v2536_v59 }
 0x571   :  { %v3393_v0 = vadd.f32 %v1541_v41, %v1539_v60  ;;  %v1542_v2 = vmul.f32 %v2538_v62, %v2530_v38  ;;  %v2540_v3 = vpop.eup %2539 }
 0x572   :  { %v1540_v5 = vmul.f32 %v2540_v3, %v3242_v23  ;;  %v2542_v25 = vpop.eup %2541  ;;  %v3424_v23 = vld [vmem:[%s3568_s2 + $0xac] ss:$16 sps:$4 sm:$0xff]  }
 0x573   :  { %2543 = vtanh.f32 %v3393_v0 }
 0x574   :  { %v3397_v19 = vadd.f32 %v1542_v2, %v1540_v5  ;;  %2545 = vrcp.f32 %v1534_v4 }
 0x576   :  { %2547 = vtanh.f32 %v3397_v19 }
 0x57d   :  { %v2544_v26 = vpop.eup %2543 }
 0x57e   :  { %v2546_v20 = vpop.eup %2545  ;;  %v1547_v28 = vmul.f32 %v2544_v26, %v2542_v25 }
 0x580   :  { %v2548_v27 = vpop.eup %2547 }
 0x581   :  { %v1548_v29 = vmul.f32 %v2548_v27, %v2546_v20 }
 0x583   :  { %v1558_v30 = vpack.c.bf16 %v1548_v29, %v1547_v28 }
 0x585   :  { %1592 = vmatmul.mubr.bf16.vlgmr.msra.gmra.mrb[20].mxu0 %v1558_v30  ;;  %1635 = vmatmul.mubr.bf16.vlgmr.msra.gmra.mrb[20].mxu1 %v1558_v30 }
 0x586   :  { %1712 = vmatpush1.bf16.msra.mxu0 %v3248_v43  ;;  %1755 = vmatpush1.bf16.msra.mxu1 %v3254_v42 }
 0x587   :  { %1713 = vmatprep.subr.bf16.mxu0 %v3260_v44  ;;  %1756 = vmatprep.subr.bf16.mxu1 %v3266_v45 }
 0x588   :  { %1743 = vmatprep.mubr.bf16.mxu0 %v2677_v1  ;;  %1786 = vmatprep.mubr.bf16.mxu1 %v2677_v1 }
 0x58a   :  { %1714 = vmatpush1.bf16.msra.mxu0 %v3274_v46  ;;  %1757 = vmatpush1.bf16.msra.mxu1 %v3280_v47 }
 0x58b   :  { %1715 = vmatprep.subr.bf16.mxu0 %v3286_v48  ;;  %1758 = vmatprep.subr.bf16.mxu1 %v3292_v49 }
 0x58e   :  { %1716 = vmatpush1.bf16.msra.mxu0 %v3298_v33  ;;  %1759 = vmatpush1.bf16.msra.mxu1 %v3304_v34 }
 0x58f   :  { %1717 = vmatprep.subr.bf16.mxu0 %v3310_v50  ;;  %1760 = vmatprep.subr.bf16.mxu1 %v3316_v51 }
 0x592   :  { %1718 = vmatpush1.bf16.msra.mxu0 %v3322_v53  ;;  %1761 = vmatpush1.bf16.msra.mxu1 %v3328_v54 }
 0x593   :  { %1719 = vmatprep.subr.bf16.mxu0 %v3334_v55  ;;  %1762 = vmatprep.subr.bf16.mxu1 %v3340_v56 }
 0x596   :  { %1720 = vmatpush1.bf16.msra.mxu0 %v3346_v12  ;;  %1763 = vmatpush1.bf16.msra.mxu1 %v3352_v21 }
 0x597   :  { %1721 = vmatprep.subr.bf16.mxu0 %v3358_v24  ;;  %1764 = vmatprep.subr.bf16.mxu1 %v3424_v23 }
 0x59a   :  { %1722 = vmatpush1.bf16.msra.mxu0 %v3430_v31  ;;  %1765 = vmatpush1.bf16.msra.mxu1 %v3436_v32 }
 0x59b   :  { %1723 = vmatprep.subr.bf16.mxu0 %v3442_v52  ;;  %1766 = vmatprep.subr.bf16.mxu1 %v3448_v7 }
 0x59e   :  { %1724 = vmatpush1.bf16.msra.mxu0 %v3454_v10  ;;  %1767 = vmatpush1.bf16.msra.mxu1 %v3460_v11 }
 0x59f   :  { %1725 = vmatprep.subr.bf16.mxu0 %v3466_v13  ;;  %1768 = vmatprep.subr.bf16.mxu1 %v3472_v15 }
 0x5a2   :  { %1726 = vmatpush1.bf16.msra.mxu0 %v3478_v18  ;;  %1769 = vmatpush1.bf16.msra.mxu1 %v3484_v61 }
 0x5a3   :  { %1863 = vmatprep.subr.bf16.mxu0 %v3375_v57  ;;  %1906 = vmatprep.subr.bf16.mxu1 %v3381_v58 }
 0x658   :  { %v1593_v14 = vpop.f32.mrb[20].mxu0  ;;  %v1636_v22 = vpop.f32.mrb[20].mxu1 }
 0x659   :  { %v2175_v9 = vadd.f32 %v1593_v14, %v3073_v16  ;;  %v1595_v36 = vpop.f32.mrb[21].mxu0  ;;  %v1638_v37 = vpop.f32.mrb[21].mxu1  ;;  %v2207_v3 = vadd.f32 %v1636_v22, %v3083_v6 }
 0x65a   :  { %v2176_v8 = vadd.f32 %v1595_v36, %v3075_v17  ;;  %v1597_v38 = vpop.f32.mrb[22].mxu0  ;;  %v1640_v39 = vpop.f32.mrb[22].mxu1  ;;  %v2208_v2 = vadd.f32 %v1638_v37, %v3080_v35 }
 0x65b   :  { %v2128_v40 = vmul.f32 -1.442695, %v2175_v9  ;;  %v2177_v41 = vadd.f32 %v1597_v38, %v3073_v16  ;;  %v1599_v59 = vpop.f32.mrb[23].mxu0  ;;  %v1642_v60 = vpop.f32.mrb[23].mxu1  ;;  %v2209_v25 = vadd.f32 %v1640_v39, %v3083_v6 }
 0x65c   :  { %v2130_v62 = vmul.f32 -1.442695, %v2176_v8  ;;  %v2178_v57 = vadd.f32 %v1599_v59, %v3075_v17  ;;  %v2132_v4 = vmul.f32 -1.442695, %v2208_v2  ;;  %v2210_v5 = vadd.f32 %v1642_v60, %v3080_v35 }
 0x65d   :  { %2549 = vpow2.f32 %v2128_v40  ;;  %v2129_v58 = vmul.f32 -1.442695, %v2177_v41 }
 0x65e   :  { %2551 = vpow2.f32 %v2130_v62  ;;  %v2131_v63 = vmul.f32 -1.442695, %v2178_v57  ;;  %v2133_v28 = vmul.f32 -1.442695, %v2210_v5 }
 0x65f   :  { %2553 = vpow2.f32 %v2129_v58 }
 0x660   :  { %2555 = vpow2.f32 %v2131_v63 }
 0x661   :  { %2557 = vtanh.f32 %v2207_v3 }
 0x662   :  { %2559 = vpow2.f32 %v2132_v4 }
 0x663   :  { %2561 = vtanh.f32 %v2209_v25 }
 0x667   :  { %v2550_v26 = vpop.eup %2549 }
 0x668   :  { %v2552_v20 = vpop.eup %2551  ;;  %v1659_v27 = vadd.f32 1.0, %v2550_v26 }
 0x669   :  { %v1671_v29 = vadd.f32 1.0, %v2552_v20  ;;  %v2554_v30 = vpop.eup %2553 }
 0x66a   :  { %2563 = vrcp.f32 %v1659_v27  ;;  %v1660_v14 = vadd.f32 1.0, %v2554_v30  ;;  %v2556_v9 = vpop.eup %2555 }
 0x66b   :  { %2565 = vrcp.f32 %v1671_v29  ;;  %v1672_v22 = vadd.f32 1.0, %v2556_v9  ;;  %v2558_v36 = vpop.eup %2557 }
 0x66c   :  { %2567 = vpow2.f32 %v2133_v28  ;;  %v2560_v37 = vpop.eup %2559 }
 0x66d   :  { %2569 = vrcp.f32 %v1660_v14  ;;  %v2562_v8 = vpop.eup %2561  ;;  %v1685_v62 = vadd.f32 1.0, %v2560_v37 }
 0x66e   :  { %2571 = vrcp.f32 %v1672_v22 }
 0x66f   :  { %2573 = vrcp.f32 %v1685_v62 }
 0x674   :  { %v2564_v38 = vpop.eup %2563 }
 0x675   :  { %v2566_v39 = vpop.eup %2565  ;;  %v1693_v40 = vmul.f32 %v2564_v38, %v2558_v36 }
 0x676   :  { %v2568_v41 = vpop.eup %2567  ;;  %v1691_v59 = vmul.f32 %v2566_v39, %v3393_v0 }
 0x677   :  { %v2570_v60 = vpop.eup %2569  ;;  %v1686_v2 = vadd.f32 1.0, %v2568_v41 }
 0x678   :  { %v3498_v57 = vadd.f32 %v1693_v40, %v1691_v59  ;;  %v1694_v58 = vmul.f32 %v2570_v60, %v2562_v8  ;;  %v2572_v63 = vpop.eup %2571 }
 0x679   :  { %v1692_v3 = vmul.f32 %v2572_v63, %v3397_v19  ;;  %v2574_v5 = vpop.eup %2573 }
 0x67a   :  { %2575 = vtanh.f32 %v3498_v57 }
 0x67b   :  { %v3502_v4 = vadd.f32 %v1694_v58, %v1692_v3  ;;  %2577 = vrcp.f32 %v1686_v2 }
 0x67d   :  { %2579 = vtanh.f32 %v3502_v4 }
 0x684   :  { %v2576_v25 = vpop.eup %2575 }
 0x685   :  { %v2578_v0 = vpop.eup %2577  ;;  %v1699_v20 = vmul.f32 %v2576_v25, %v2574_v5 }
 0x687   :  { %v2580_v26 = vpop.eup %2579 }
 0x688   :  { %v1700_v27 = vmul.f32 %v2580_v26, %v2578_v0 }
 0x68a   :  { %v1710_v28 = vpack.c.bf16 %v1700_v27, %v1699_v20 }
 0x68c   :  { %1744 = vmatmul.mubr.bf16.vlgmr.msra.gmra.mrb[24].mxu0 %v1710_v28  ;;  %1787 = vmatmul.mubr.bf16.vlgmr.msra.gmra.mrb[24].mxu1 %v1710_v28 }
 0x68d   :  { %1864 = vmatpush1.bf16.msra.mxu0 %v3248_v43  ;;  %1907 = vmatpush1.bf16.msra.mxu1 %v3254_v42 }
 0x68e   :  { %1865 = vmatprep.subr.bf16.mxu0 %v3260_v44  ;;  %1908 = vmatprep.subr.bf16.mxu1 %v3266_v45 }
 0x68f   :  { %1895 = vmatprep.mubr.bf16.mxu0 %v2677_v1  ;;  %1938 = vmatprep.mubr.bf16.mxu1 %v2677_v1 }
 0x691   :  { %1866 = vmatpush1.bf16.msra.mxu0 %v3274_v46  ;;  %1909 = vmatpush1.bf16.msra.mxu1 %v3280_v47 }
 0x692   :  { %1867 = vmatprep.subr.bf16.mxu0 %v3286_v48  ;;  %1910 = vmatprep.subr.bf16.mxu1 %v3292_v49 }
 0x695   :  { %1868 = vmatpush1.bf16.msra.mxu0 %v3298_v33  ;;  %1911 = vmatpush1.bf16.msra.mxu1 %v3304_v34 }
 0x696   :  { %1869 = vmatprep.subr.bf16.mxu0 %v3310_v50  ;;  %1912 = vmatprep.subr.bf16.mxu1 %v3316_v51 }
 0x699   :  { %1870 = vmatpush1.bf16.msra.mxu0 %v3322_v53  ;;  %1913 = vmatpush1.bf16.msra.mxu1 %v3328_v54 }
 0x69a   :  { %1871 = vmatprep.subr.bf16.mxu0 %v3334_v55  ;;  %1914 = vmatprep.subr.bf16.mxu1 %v3340_v56 }
 0x69d   :  { %1872 = vmatpush1.bf16.msra.mxu0 %v3346_v12  ;;  %1915 = vmatpush1.bf16.msra.mxu1 %v3352_v21 }
 0x69e   :  { %1873 = vmatprep.subr.bf16.mxu0 %v3358_v24  ;;  %1916 = vmatprep.subr.bf16.mxu1 %v3424_v23 }
 0x6a1   :  { %1874 = vmatpush1.bf16.msra.mxu0 %v3430_v31  ;;  %1917 = vmatpush1.bf16.msra.mxu1 %v3436_v32 }
 0x6a2   :  { %1875 = vmatprep.subr.bf16.mxu0 %v3442_v52  ;;  %1918 = vmatprep.subr.bf16.mxu1 %v3448_v7 }
 0x6a5   :  { %1876 = vmatpush1.bf16.msra.mxu0 %v3454_v10  ;;  %1919 = vmatpush1.bf16.msra.mxu1 %v3460_v11 }
 0x6a6   :  { %1877 = vmatprep.subr.bf16.mxu0 %v3466_v13  ;;  %1920 = vmatprep.subr.bf16.mxu1 %v3472_v15 }
 0x6a9   :  { %1878 = vmatpush1.bf16.msra.mxu0 %v3478_v18  ;;  %1921 = vmatpush1.bf16.msra.mxu1 %v3484_v61 }
 0x75f   :  { %v1745_v1 = vpop.f32.mrb[24].mxu0  ;;  %v1788_v43 = vpop.f32.mrb[24].mxu1 }
 0x760   :  { %v2179_v42 = vadd.f32 %v1745_v1, %v3073_v16  ;;  %v1747_v44 = vpop.f32.mrb[25].mxu0  ;;  %v1790_v45 = vpop.f32.mrb[25].mxu1  ;;  %v2211_v12 = vadd.f32 %v1788_v43, %v3083_v6 }
 0x761   :  { %v2180_v46 = vadd.f32 %v1747_v44, %v3075_v17  ;;  %v1749_v47 = vpop.f32.mrb[26].mxu0  ;;  %v1792_v48 = vpop.f32.mrb[26].mxu1  ;;  %v2212_v56 = vadd.f32 %v1790_v45, %v3080_v35 }
 0x762   :  { %v2134_v49 = vmul.f32 -1.442695, %v2179_v42  ;;  %v2181_v33 = vadd.f32 %v1749_v47, %v3073_v16  ;;  %v1751_v34 = vpop.f32.mrb[27].mxu0  ;;  %v1794_v50 = vpop.f32.mrb[27].mxu1  ;;  %v2213_v19 = vadd.f32 %v1792_v48, %v3083_v6 }
 0x763   :  { %v2136_v51 = vmul.f32 -1.442695, %v2180_v46  ;;  %v2182_v53 = vadd.f32 %v1751_v34, %v3075_v17  ;;  %v2138_v21 = vmul.f32 -1.442695, %v2212_v56  ;;  %v2214_v24 = vadd.f32 %v1794_v50, %v3080_v35 }
 0x764   :  { %2581 = vpow2.f32 %v2134_v49  ;;  %v2135_v54 = vmul.f32 -1.442695, %v2181_v33 }
 0x765   :  { %2583 = vpow2.f32 %v2136_v51  ;;  %v2137_v55 = vmul.f32 -1.442695, %v2182_v53  ;;  %v2139_v52 = vmul.f32 -1.442695, %v2214_v24 }
 0x766   :  { %2585 = vpow2.f32 %v2135_v54 }
 0x767   :  { %2587 = vpow2.f32 %v2137_v55 }
 0x768   :  { %2589 = vtanh.f32 %v2211_v12 }
 0x769   :  { %2591 = vpow2.f32 %v2138_v21 }
 0x76a   :  { %2593 = vtanh.f32 %v2213_v19 }
 0x76e   :  { %v2582_v23 = vpop.eup %2581 }
 0x76f   :  { %v2584_v31 = vpop.eup %2583  ;;  %v1811_v32 = vadd.f32 1.0, %v2582_v23 }
 0x770   :  { %v1823_v7 = vadd.f32 1.0, %v2584_v31  ;;  %v2586_v10 = vpop.eup %2585 }
 0x771   :  { %2595 = vrcp.f32 %v1811_v32  ;;  %v1812_v11 = vadd.f32 1.0, %v2586_v10  ;;  %v2588_v13 = vpop.eup %2587 }
 0x772   :  { %2597 = vrcp.f32 %v1823_v7  ;;  %v1824_v15 = vadd.f32 1.0, %v2588_v13  ;;  %v2590_v18 = vpop.eup %2589 }
 0x773   :  { %2599 = vpow2.f32 %v2139_v52  ;;  %v2592_v61 = vpop.eup %2591 }
 0x774   :  { %2601 = vrcp.f32 %v1812_v11  ;;  %v2594_v29 = vpop.eup %2593  ;;  %v1837_v8 = vadd.f32 1.0, %v2592_v61 }
 0x775   :  { %2603 = vrcp.f32 %v1824_v15 }
 0x776   :  { %2605 = vrcp.f32 %v1837_v8 }
 0x77b   :  { %v2596_v30 = vpop.eup %2595 }
 0x77c   :  { %v2598_v14 = vpop.eup %2597  ;;  %v1845_v9 = vmul.f32 %v2596_v30, %v2590_v18 }
 0x77d   :  { %v2600_v22 = vpop.eup %2599  ;;  %v1843_v36 = vmul.f32 %v2598_v14, %v3498_v57 }
 0x77e   :  { %v2602_v37 = vpop.eup %2601  ;;  %v1838_v41 = vadd.f32 1.0, %v2600_v22 }
 0x77f   :  { %v3546_v38 = vadd.f32 %v1845_v9, %v1843_v36  ;;  %v1846_v39 = vmul.f32 %v2602_v37, %v2594_v29  ;;  %v2604_v40 = vpop.eup %2603 }
 0x780   :  { %v1844_v59 = vmul.f32 %v2604_v40, %v3502_v4  ;;  %v2606_v62 = vpop.eup %2605 }
 0x781   :  { %2607 = vtanh.f32 %v3546_v38 }
 0x782   :  { %v3550_v60 = vadd.f32 %v1846_v39, %v1844_v59  ;;  %2609 = vrcp.f32 %v1838_v41 }
 0x784   :  { %2611 = vtanh.f32 %v3550_v60 }
 0x78b   :  { %v2608_v58 = vpop.eup %2607 }
 0x78c   :  { %v2610_v57 = vpop.eup %2609  ;;  %v1851_v2 = vmul.f32 %v2608_v58, %v2606_v62 }
 0x78e   :  { %v2612_v63 = vpop.eup %2611 }
 0x78f   :  { %v1852_v3 = vmul.f32 %v2612_v63, %v2610_v57 }
 0x791   :  { %v1862_v5 = vpack.c.bf16 %v1852_v3, %v1851_v2 }
 0x793   :  { %1896 = vmatmul.mubr.bf16.vlgmr.msra.gmra.mrb[28].mxu0 %v1862_v5  ;;  %1939 = vmatmul.mubr.bf16.vlgmr.msra.gmra.mrb[28].mxu1 %v1862_v5 }
 0x866   :  { %v1897_v25 = vpop.f32.mrb[28].mxu0  ;;  %v1940_v0 = vpop.f32.mrb[28].mxu1 }
 0x867   :  { %v2183_v4 = vadd.f32 %v1897_v25, %v3073_v16  ;;  %v1899_v26 = vpop.f32.mrb[29].mxu0  ;;  %v1942_v20 = vpop.f32.mrb[29].mxu1  ;;  %v2215_v34 = vadd.f32 %v1940_v0, %v3083_v6 }
 0x868   :  { %v2184_v27 = vadd.f32 %v1899_v26, %v3075_v17  ;;  %v1901_v28 = vpop.f32.mrb[30].mxu0  ;;  %v1944_v1 = vpop.f32.mrb[30].mxu1  ;;  %v2216_v33 = vadd.f32 %v1942_v20, %v3080_v35 }
 0x869   :  { %v2140_v43 = vmul.f32 -1.442695, %v2183_v4  ;;  %v2185_v42 = vadd.f32 %v1901_v28, %v3073_v16  ;;  %v1903_v44 = vpop.f32.mrb[31].mxu0  ;;  %v1946_v45 = vpop.f32.mrb[31].mxu1  ;;  %v2217_v16 = vadd.f32 %v1944_v1, %v3083_v6 }
 0x86a   :  { %v2142_v46 = vmul.f32 -1.442695, %v2184_v27  ;;  %v2186_v47 = vadd.f32 %v1903_v44, %v3075_v17  ;;  %v2144_v50 = vmul.f32 -1.442695, %v2216_v33  ;;  %v2218_v51 = vadd.f32 %v1946_v45, %v3080_v35 }
 0x86b   :  { %2613 = vpow2.f32 %v2140_v43  ;;  %v2141_v48 = vmul.f32 -1.442695, %v2185_v42 }
 0x86c   :  { %2615 = vpow2.f32 %v2142_v46  ;;  %v2143_v49 = vmul.f32 -1.442695, %v2186_v47  ;;  %v2145_v17 = vmul.f32 -1.442695, %v2218_v51 }
 0x86d   :  { %2617 = vpow2.f32 %v2141_v48 }
 0x86e   :  { %2619 = vpow2.f32 %v2143_v49 }
 0x86f   :  { %2621 = vtanh.f32 %v2215_v34 }
 0x870   :  { %2623 = vpow2.f32 %v2144_v50 }
 0x871   :  { %2625 = vtanh.f32 %v2217_v16 }
 0x875   :  { %v2614_v53 = vpop.eup %2613 }
 0x876   :  { %v2616_v54 = vpop.eup %2615  ;;  %v1963_v55 = vadd.f32 1.0, %v2614_v53 }
 0x877   :  { %v1975_v56 = vadd.f32 1.0, %v2616_v54  ;;  %v2618_v12 = vpop.eup %2617 }
 0x878   :  { %2627 = vrcp.f32 %v1963_v55  ;;  %v1964_v21 = vadd.f32 1.0, %v2618_v12  ;;  %v2620_v24 = vpop.eup %2619 }
 0x879   :  { %2629 = vrcp.f32 %v1975_v56  ;;  %v1976_v19 = vadd.f32 1.0, %v2620_v24  ;;  %v2622_v35 = vpop.eup %2621 }
 0x87a   :  { %2631 = vpow2.f32 %v2145_v17  ;;  %v2624_v23 = vpop.eup %2623 }
 0x87b   :  { %2633 = vrcp.f32 %v1964_v21  ;;  %v2626_v6 = vpop.eup %2625  ;;  %v1989_v7 = vadd.f32 1.0, %v2624_v23 }
 0x87c   :  { %2635 = vrcp.f32 %v1976_v19 }
 0x87d   :  { %2637 = vrcp.f32 %v1989_v7 }
 0x882   :  { %v2628_v31 = vpop.eup %2627 }
 0x883   :  { %v2630_v32 = vpop.eup %2629  ;;  %v1997_v52 = vmul.f32 %v2628_v31, %v2622_v35 }
 0x884   :  { %v2632_v10 = vpop.eup %2631  ;;  %v1995_v11 = vmul.f32 %v2630_v32, %v3546_v38 }
 0x885   :  { %v2634_v13 = vpop.eup %2633  ;;  %v1990_v29 = vadd.f32 1.0, %v2632_v10 }
 0x886   :  { %v1999_v15 = vadd.f32 %v1997_v52, %v1995_v11  ;;  %v1998_v18 = vmul.f32 %v2634_v13, %v2626_v6  ;;  %v2636_v61 = vpop.eup %2635 }
 0x887   :  { %v1996_v30 = vmul.f32 %v2636_v61, %v3550_v60  ;;  %v2638_v9 = vpop.eup %2637 }
 0x888   :  { %2639 = vtanh.f32 %v1999_v15 }
 0x889   :  { %v2000_v14 = vadd.f32 %v1998_v18, %v1996_v30  ;;  %2641 = vrcp.f32 %v1990_v29 }
 0x88b   :  { %2643 = vtanh.f32 %v2000_v14 }
 0x892   :  { %v2640_v22 = vpop.eup %2639 }
 0x893   :  { %v2003_v36 = vmul.f32 %v2640_v22, %v2638_v9  ;;  %v2642_v37 = vpop.eup %2641 }
 0x895   :  { %v2644_v8 = vpop.eup %2643 }
 0x896   :  { %v2004_v39 = vmul.f32 %v2644_v8, %v2642_v37 }
 0x898   :  { %v2153_v40 = vpack.c.bf16 %v2004_v39, %v2003_v36 }
 0x89a   :  { %2154 = vst [vmem:[%s3570_s4] sm:$0xff] %v2153_v40  }

// kernel: lstm_module_forward.3
= control target key start
LH: loop header
LB: loop body
LE: loop exit
PB: predicated region body
PF: predicated region fallthrough
CT: control target
= control target key end

     0   :  { %9 = vsyncpa [#allocation6], 0  ;;  %s5146_s0 = inlined_call_operand.vmem [shape: bf16[8,16,128], index: 0, kind: input, shape index: {}]   ;;  %s5147_s1 = inlined_call_operand.hbm [shape: bf16[128,512], index: 1, kind: input, shape index: {}]   ;;  %s5148_s2 = inlined_call_operand.hbm [shape: bf16[128,512], index: 2, kind: input, shape index: {}]   ;;  %s5149_s3 = inlined_call_operand.vmem [shape: f32[1,512], index: 3, kind: input, shape index: {}]   ;;  %s5150_s4 = inlined_call_operand.vmem [shape: bf16[8,16,128], index: 4, kind: output, shape index: {}]  }
   0x1   :  { %10 = vsyncpa [#allocation8], 0  ;;  %s4500_s15 = smov [#allocation5]   ;;  %s4452_s19 = scalar_lea.hbm %s5147_s1, 4096 }
   0x2   :  { %s18_s16 = sshll.u32 %s4500_s15, 4  ;;  %p4453_p0 = scmp.ne.s32.totalorder %s5147_s1, %s4452_s19  ;;  %s19_s16 = int_to_ptr.vmem [resolvable:$true] %s18_s16 }
   0x3   :  { %p4456_p1 = scmp.lt.u32.totalorder %s4452_s19, %s5147_s1 }
   0x5   :  { %p4458_p2 = pnand %p4456_p1, %p4453_p0 }
   0x7   :  { %4461 = shalt.err (!%p4458_p2)
}
   0x8   :  { %s4462_s24 = scalar_lea.vmem %s19_s16, 4096  ;;  %p4467_p4 = scmp.lt.s32.totalorder %s19_s16, %s19_s16 }
   0x9   :  { %p4463_p3 = scmp.ne.s32.totalorder %s19_s16, %s4462_s24  ;;  %p4468_p5 = scmp.lt.s32.totalorder %s4462_s24, %s4462_s24 }
   0xb   :  { %p4469_p6 = por %p4468_p5, %p4467_p4 }
   0xd   :  { %p4470_p7 = pnand %p4469_p6, %p4463_p3 }
   0xf   :  { %4473 = shalt.err (!%p4470_p7)
}
  0x10   :  { %s4501_s25 = smov 256   ;;  %s4502_s26 = smov 16  }
  0x11   :  { %24 = dma.hbm_to_vmem [thread:$0]  %s5147_s1, 4096, %s19_s16, [#allocation6], %s4501_s25, %s4501_s25, %s4502_s26  }
  0x12   :  { %s4503_s29 = smov [#allocation7]   ;;  %s4474_s7 = scalar_lea.hbm %s5148_s2, 4096 }
  0x13   :  { %s30_s30 = sshll.u32 %s4503_s29, 4  ;;  %p4475_p8 = scmp.ne.s32.totalorder %s5148_s2, %s4474_s7  ;;  %s31_s30 = int_to_ptr.vmem [resolvable:$true] %s30_s30 }
  0x14   :  { %p4478_p9 = scmp.lt.u32.totalorder %s4474_s7, %s5148_s2 }
  0x16   :  { %p4480_p10 = pnand %p4478_p9, %p4475_p8 }
  0x18   :  { %4483 = shalt.err (!%p4480_p10)
}
  0x19   :  { %s4484_s12 = scalar_lea.vmem %s31_s30, 4096  ;;  %p4489_p12 = scmp.lt.s32.totalorder %s31_s30, %s31_s30 }
  0x1a   :  { %p4485_p11 = scmp.ne.s32.totalorder %s31_s30, %s4484_s12  ;;  %p4490_p13 = scmp.lt.s32.totalorder %s4484_s12, %s4484_s12 }
  0x1c   :  { %p4491_p0 = por %p4490_p13, %p4489_p12 }
  0x1e   :  { %p4492_p1 = pnand %p4491_p0, %p4485_p11 }
  0x20   :  { %4495 = shalt.err (!%p4492_p1)
}
  0x21   :  { %36 = dma.hbm_to_vmem [thread:$0]  %s5148_s2, 4096, %s31_s30, [#allocation8], %s4501_s25, %s4501_s25, %s4502_s26  }
  0x22   :  { %4496 = dma.done.wait [#allocation6], 4096  }
  0x23   :  { %4497 = vsyncadd [#allocation6], 4294963200 }
  0x24   :  { %4498 = dma.done.wait [#allocation8], 4096  }
  0x25   :  { %4499 = vsyncadd [#allocation8], 4294963200  ;;  %v4504_v0 = vmov 0   ;;  %v4038_v1 = vld [vmem:[#allocation5 + $0x4] ss:$16 sps:$4 sm:$0xff]   ;;  %v4090_v43 = vld [vmem:[%s5146_s0 + $0x8] sm:$0xff]  }
  0x26   :  { %364 = vmatprep.mubr.bf16.mxu0 %v4504_v0  ;;  %477 = vmatprep.mubr.bf16.mxu1 %v4504_v0  ;;  %v4040_v2 = vld [vmem:[#allocation5 + $0xc] ss:$16 sps:$4 sm:$0xff]   ;;  %v4042_v3 = vld [vmem:[#allocation5] ss:$16 sps:$4 sm:$0xff]   ;;  %v4043_v4 = vld [vmem:[#allocation5 + $0x8] ss:$16 sps:$4 sm:$0xff]  }
  0x27   :  { %332 = vmatprep.subr.bf16.mxu0 %v4038_v1  ;;  %445 = vmatprep.subr.bf16.mxu1 %v4040_v2  ;;  %v4044_v5 = vld [vmem:[#allocation5 + $0x24] ss:$16 sps:$4 sm:$0xff]   ;;  %v4046_v6 = vld [vmem:[#allocation5 + $0x2c] ss:$16 sps:$4 sm:$0xff]   ;;  %v4048_v7 = vld [vmem:[#allocation5 + $0x20] ss:$16 sps:$4 sm:$0xff]  }
  0x28   :  { %333 = vmatpush1.bf16.msra.mxu0 %v4042_v3  ;;  %446 = vmatpush1.bf16.msra.mxu1 %v4043_v4  ;;  %v4049_v8 = vld [vmem:[#allocation5 + $0x28] ss:$16 sps:$4 sm:$0xff]   ;;  %v4050_v9 = vld [vmem:[#allocation5 + $0x44] ss:$16 sps:$4 sm:$0xff]   ;;  %v4052_v10 = vld [vmem:[#allocation5 + $0x4c] ss:$16 sps:$4 sm:$0xff]  }
  0x29   :  { %334 = vmatprep.subr.bf16.mxu0 %v4044_v5  ;;  %447 = vmatprep.subr.bf16.mxu1 %v4046_v6  ;;  %v4054_v11 = vld [vmem:[#allocation5 + $0x40] ss:$16 sps:$4 sm:$0xff]   ;;  %v4055_v12 = vld [vmem:[#allocation5 + $0x48] ss:$16 sps:$4 sm:$0xff]   ;;  %v4056_v13 = vld [vmem:[#allocation5 + $0x64] ss:$16 sps:$4 sm:$0xff]  }
  0x2a   :  { %v4058_v14 = vld [vmem:[#allocation5 + $0x6c] ss:$16 sps:$4 sm:$0xff]   ;;  %v4060_v15 = vld [vmem:[#allocation5 + $0x60] ss:$16 sps:$4 sm:$0xff]   ;;  %v4061_v16 = vld [vmem:[#allocation5 + $0x68] ss:$16 sps:$4 sm:$0xff]  }
  0x2b   :  { %v4062_v17 = vld [vmem:[#allocation5 + $0x84] ss:$16 sps:$4 sm:$0xff]   ;;  %v4064_v18 = vld [vmem:[#allocation5 + $0x8c] ss:$16 sps:$4 sm:$0xff]   ;;  %v4066_v19 = vld [vmem:[#allocation5 + $0x80] ss:$16 sps:$4 sm:$0xff]  }
  0x2c   :  { %335 = vmatpush1.bf16.msra.mxu0 %v4048_v7  ;;  %448 = vmatpush1.bf16.msra.mxu1 %v4049_v8  ;;  %v4067_v20 = vld [vmem:[#allocation5 + $0x88] ss:$16 sps:$4 sm:$0xff]   ;;  %v4068_v21 = vld [vmem:[#allocation5 + $0xa4] ss:$16 sps:$4 sm:$0xff]   ;;  %v4070_v22 = vld [vmem:[#allocation5 + $0xac] ss:$16 sps:$4 sm:$0xff]  }
  0x2d   :  { %336 = vmatprep.subr.bf16.mxu0 %v4050_v9  ;;  %449 = vmatprep.subr.bf16.mxu1 %v4052_v10  ;;  %v4072_v23 = vld [vmem:[#allocation5 + $0xa0] ss:$16 sps:$4 sm:$0xff]   ;;  %v4073_v24 = vld [vmem:[#allocation5 + $0xa8] ss:$16 sps:$4 sm:$0xff]   ;;  %v4074_v25 = vld [vmem:[#allocation5 + $0xc4] ss:$16 sps:$4 sm:$0xff]  }
  0x2e   :  { %v4076_v26 = vld [vmem:[#allocation5 + $0xcc] ss:$16 sps:$4 sm:$0xff]   ;;  %v4078_v27 = vld [vmem:[#allocation5 + $0xc0] ss:$16 sps:$4 sm:$0xff]   ;;  %v4079_v28 = vld [vmem:[#allocation5 + $0xc8] ss:$16 sps:$4 sm:$0xff]  }
  0x2f   :  { %v4080_v29 = vld [vmem:[#allocation5 + $0xe4] ss:$16 sps:$4 sm:$0xff]   ;;  %v4082_v30 = vld [vmem:[#allocation5 + $0xec] ss:$16 sps:$4 sm:$0xff]   ;;  %v4084_v31 = vld [vmem:[#allocation5 + $0xe0] ss:$16 sps:$4 sm:$0xff]  }
  0x30   :  { %337 = vmatpush1.bf16.msra.mxu0 %v4054_v11  ;;  %450 = vmatpush1.bf16.msra.mxu1 %v4055_v12  ;;  %v4085_v32 = vld [vmem:[#allocation5 + $0xe8] ss:$16 sps:$4 sm:$0xff]   ;;  %v4557_v33 = vld [vmem:[#allocation7 + $0x4] ss:$16 sps:$4 sm:$0xff]   ;;  %v4559_v34 = vld [vmem:[#allocation7 + $0xc] ss:$16 sps:$4 sm:$0xff]   ;;  %v104_v11 = vlaneseq }
  0x31   :  { %338 = vmatprep.subr.bf16.mxu0 %v4056_v13  ;;  %451 = vmatprep.subr.bf16.mxu1 %v4058_v14  ;;  %v4086_v35 = vld [vmem:[%s5146_s0] sm:$0xff]   ;;  %v4570_v38 = vld [vmem:[#allocation7 + $0x8] ss:$16 sps:$4 sm:$0xff]   ;;  %v4572_v39 = vld [vmem:[#allocation7 + $0x2c] ss:$16 sps:$4 sm:$0xff]   ;;  %v4505_v10 = vmov 0.0|0.0  }
  0x32   :  { %v4564_v36 = vld [vmem:[#allocation7] ss:$16 sps:$4 sm:$0xff]   ;;  %v4567_v37 = vld [vmem:[#allocation7 + $0x24] ss:$16 sps:$4 sm:$0xff]   ;;  %v4583_v42 = vld [vmem:[#allocation7 + $0x28] ss:$16 sps:$4 sm:$0xff]  }
  0x33   :  { %v4576_v40 = vld [vmem:[#allocation7 + $0x20] ss:$16 sps:$4 sm:$0xff]   ;;  %v4580_v41 = vld [vmem:[#allocation7 + $0x44] ss:$16 sps:$4 sm:$0xff]   ;;  %v4595_v46 = vld [vmem:[#allocation7 + $0x4c] ss:$16 sps:$4 sm:$0xff]  }
  0x34   :  { %339 = vmatpush1.bf16.msra.mxu0 %v4060_v15  ;;  %452 = vmatpush1.bf16.msra.mxu1 %v4061_v16  ;;  %v4590_v44 = vld [vmem:[#allocation7 + $0x40] ss:$16 sps:$4 sm:$0xff]   ;;  %v4593_v45 = vld [vmem:[#allocation7 + $0x64] ss:$16 sps:$4 sm:$0xff]   ;;  %v4598_v47 = vld [vmem:[#allocation7 + $0x48] ss:$16 sps:$4 sm:$0xff]  }
  0x35   :  { %340 = vmatprep.subr.bf16.mxu0 %v4062_v17  ;;  %453 = vmatprep.subr.bf16.mxu1 %v4064_v18  ;;  %v4600_v48 = vld [vmem:[#allocation7 + $0x6c] ss:$16 sps:$4 sm:$0xff]   ;;  %v4605_v49 = vld [vmem:[#allocation7 + $0x60] ss:$16 sps:$4 sm:$0xff]   ;;  %v4608_v50 = vld [vmem:[#allocation7 + $0x84] ss:$16 sps:$4 sm:$0xff]  }
  0x36   :  { %v4612_v51 = vld [vmem:[#allocation7 + $0x68] ss:$16 sps:$4 sm:$0xff]   ;;  %v4097_v52 = vld [vmem:[%s5146_s0 + $0x10] sm:$0xff]   ;;  %v4621_v54 = vld [vmem:[#allocation7 + $0x8c] ss:$16 sps:$4 sm:$0xff]   ;;  %v105_v12 = vshrl.u32 %v104_v11, 7 }
  0x37   :  { %v4618_v53 = vld [vmem:[#allocation7 + $0x80] ss:$16 sps:$4 sm:$0xff]   ;;  %v4624_v55 = vld [vmem:[#allocation7 + $0xa4] ss:$16 sps:$4 sm:$0xff]   ;;  %v4627_v56 = vld [vmem:[#allocation7 + $0x88] ss:$16 sps:$4 sm:$0xff]  }
  0x38   :  { %341 = vmatpush1.bf16.msra.mxu0 %v4066_v19  ;;  %454 = vmatpush1.bf16.msra.mxu1 %v4067_v20  ;;  %v4629_v57 = vld [vmem:[#allocation7 + $0xac] ss:$16 sps:$4 sm:$0xff]   ;;  %v4631_v58 = vld [vmem:[#allocation7 + $0xa0] ss:$16 sps:$4 sm:$0xff]   ;;  %v4635_v59 = vld [vmem:[#allocation7 + $0xc4] ss:$16 sps:$4 sm:$0xff]  }
  0x39   :  { %342 = vmatprep.subr.bf16.mxu0 %v4068_v21  ;;  %455 = vmatprep.subr.bf16.mxu1 %v4070_v22  ;;  %v4637_v60 = vld [vmem:[#allocation7 + $0xa8] ss:$16 sps:$4 sm:$0xff]   ;;  %v4646_v62 = vld [vmem:[#allocation7 + $0xc0] ss:$16 sps:$4 sm:$0xff]   ;;  %v4649_v63 = vld [vmem:[#allocation7 + $0xcc] ss:$16 sps:$4 sm:$0xff]  }
  0x3a   :  { %v4104_v61 = vld [vmem:[%s5146_s0 + $0x18] sm:$0xff]   ;;  %v4651_v1 = vld [vmem:[#allocation7 + $0xe4] ss:$16 sps:$4 sm:$0xff]   ;;  %v4660_v4 = vld [vmem:[#allocation7 + $0xe0] ss:$16 sps:$4 sm:$0xff]   ;;  %v106_v13 = vsub.s32 0, %v105_v12 }
  0x3b   :  { %v4653_v2 = vld [vmem:[#allocation7 + $0xc8] ss:$16 sps:$4 sm:$0xff]   ;;  %v4656_v3 = vld [vmem:[#allocation7 + $0xec] ss:$16 sps:$4 sm:$0xff]   ;;  %v4111_v6 = vld [vmem:[%s5146_s0 + $0x20] sm:$0xff]   ;;  %v110_v15 = vsub.s32 1, %v105_v12 }
  0x3c   :  { %343 = vmatpush1.bf16.msra.mxu0 %v4072_v23  ;;  %456 = vmatpush1.bf16.msra.mxu1 %v4073_v24  ;;  %v4664_v5 = vld [vmem:[#allocation7 + $0xe8] ss:$16 sps:$4 sm:$0xff]   ;;  %v4125_v8 = vld [vmem:[%s5146_s0 + $0x30] sm:$0xff]   ;;  %v102_v14 = vld [vmem:[%s5149_s3] sm:$0xf]  ;;  %v118_v20 = vsub.s32 3, %v105_v12 }
  0x3d   :  { %344 = vmatprep.subr.bf16.mxu0 %v4074_v25  ;;  %457 = vmatprep.subr.bf16.mxu1 %v4076_v26  ;;  %v4118_v7 = vld [vmem:[%s5146_s0 + $0x28] sm:$0xff]   ;;  %v4132_v9 = vld [vmem:[%s5146_s0 + $0x38] sm:$0xff]   ;;  %v4732_v16 = vrot.slane %v102_v14, %v106_v13  ;;  %v4734_v17 = vrot.slane %v102_v14, %v110_v15 }
  0x40   :  { %345 = vmatpush1.bf16.msra.mxu0 %v4078_v27  ;;  %458 = vmatpush1.bf16.msra.mxu1 %v4079_v28  ;;  %v114_v28 = vsub.s32 2, %v105_v12 }
  0x41   :  { %346 = vmatprep.subr.bf16.mxu0 %v4080_v29  ;;  %459 = vmatprep.subr.bf16.mxu1 %v4082_v30 }
  0x44   :  { %347 = vmatpush1.bf16.msra.mxu0 %v4084_v31  ;;  %460 = vmatpush1.bf16.msra.mxu1 %v4085_v32 }
  0x45   :  { %827 = vmatprep.subr.bf16.mxu0 %v4557_v33  ;;  %870 = vmatprep.subr.bf16.mxu1 %v4559_v34 }
  0x47   :  { %365 = vmatmul.mubr.bf16.vlgmr.msra.gmra.mrb[0].mxu0 %v4086_v35  ;;  %478 = vmatmul.mubr.bf16.vlgmr.msra.gmra.mrb[0].mxu1 %v4086_v35 }
  0x48   :  { %828 = vmatpush1.bf16.msra.mxu0 %v4564_v36  ;;  %374 = vmatprep.mubr.bf16.mxu0 %v4504_v0 }
  0x49   :  { %487 = vmatprep.mubr.bf16.mxu1 %v4504_v0  ;;  %829 = vmatprep.subr.bf16.mxu0 %v4567_v37 }
  0x4a   :  { %871 = vmatpush1.bf16.msra.mxu1 %v4570_v38 }
  0x4b   :  { %872 = vmatprep.subr.bf16.mxu1 %v4572_v39 }
  0x4c   :  { %830 = vmatpush1.bf16.msra.mxu0 %v4576_v40 }
  0x4d   :  { %831 = vmatprep.subr.bf16.mxu0 %v4580_v41 }
  0x4e   :  { %873 = vmatpush1.bf16.msra.mxu1 %v4583_v42 }
  0x4f   :  { %375 = vmatmul.mubr.bf16.gmra.mrb[4].mxu0 %v4090_v43  ;;  %488 = vmatmul.mubr.bf16.gmra.mrb[4].mxu1 %v4090_v43 }
  0x50   :  { %384 = vmatprep.mubr.bf16.mxu0 %v4504_v0  ;;  %497 = vmatprep.mubr.bf16.mxu1 %v4504_v0 }
  0x51   :  { %832 = vmatpush1.bf16.msra.mxu0 %v4590_v44  ;;  %874 = vmatprep.subr.bf16.mxu1 %v4595_v46 }
  0x52   :  { %833 = vmatprep.subr.bf16.mxu0 %v4593_v45  ;;  %875 = vmatpush1.bf16.msra.mxu1 %v4598_v47 }
  0x53   :  { %876 = vmatprep.subr.bf16.mxu1 %v4600_v48 }
  0x55   :  { %834 = vmatpush1.bf16.msra.mxu0 %v4605_v49 }
  0x56   :  { %835 = vmatprep.subr.bf16.mxu0 %v4608_v50  ;;  %877 = vmatpush1.bf16.msra.mxu1 %v4612_v51 }
  0x57   :  { %385 = vmatmul.mubr.bf16.gmra.mrb[8].mxu0 %v4097_v52  ;;  %498 = vmatmul.mubr.bf16.gmra.mrb[8].mxu1 %v4097_v52 }
  0x58   :  { %394 = vmatprep.mubr.bf16.mxu0 %v4504_v0  ;;  %507 = vmatprep.mubr.bf16.mxu1 %v4504_v0 }
  0x59   :  { %836 = vmatpush1.bf16.msra.mxu0 %v4618_v53  ;;  %878 = vmatprep.subr.bf16.mxu1 %v4621_v54 }
  0x5a   :  { %837 = vmatprep.subr.bf16.mxu0 %v4624_v55  ;;  %879 = vmatpush1.bf16.msra.mxu1 %v4627_v56 }
  0x5b   :  { %880 = vmatprep.subr.bf16.mxu1 %v4629_v57 }
  0x5d   :  { %838 = vmatpush1.bf16.msra.mxu0 %v4631_v58 }
  0x5e   :  { %839 = vmatprep.subr.bf16.mxu0 %v4635_v59  ;;  %881 = vmatpush1.bf16.msra.mxu1 %v4637_v60 }
  0x5f   :  { %395 = vmatmul.mubr.bf16.gmra.mrb[12].mxu0 %v4104_v61  ;;  %508 = vmatmul.mubr.bf16.gmra.mrb[12].mxu1 %v4104_v61  ;;  %v4742_v61 = vrot.slane %v102_v14, %v114_v28 }
  0x60   :  { %404 = vmatprep.mubr.bf16.mxu0 %v4504_v0  ;;  %517 = vmatprep.mubr.bf16.mxu1 %v4504_v0 }
  0x61   :  { %840 = vmatpush1.bf16.msra.mxu0 %v4646_v62  ;;  %882 = vmatprep.subr.bf16.mxu1 %v4649_v63 }
  0x62   :  { %841 = vmatprep.subr.bf16.mxu0 %v4651_v1  ;;  %883 = vmatpush1.bf16.msra.mxu1 %v4653_v2 }
  0x63   :  { %884 = vmatprep.subr.bf16.mxu1 %v4656_v3 }
  0x65   :  { %842 = vmatpush1.bf16.msra.mxu0 %v4660_v4 }
  0x66   :  { %885 = vmatpush1.bf16.msra.mxu1 %v4664_v5  ;;  %1180 = vmatprep.subr.bf16.mxu0 %v4557_v33 }
  0x67   :  { %405 = vmatmul.mubr.bf16.gmra.mrb[16].mxu0 %v4111_v6  ;;  %518 = vmatmul.mubr.bf16.gmra.mrb[16].mxu1 %v4111_v6 }
  0x68   :  { %414 = vmatprep.mubr.bf16.mxu0 %v4504_v0  ;;  %527 = vmatprep.mubr.bf16.mxu1 %v4504_v0 }
  0x69   :  { %1223 = vmatprep.subr.bf16.mxu1 %v4559_v34 }
  0x6f   :  { %415 = vmatmul.mubr.bf16.gmra.mrb[20].mxu0 %v4118_v7  ;;  %528 = vmatmul.mubr.bf16.gmra.mrb[20].mxu1 %v4118_v7 }
  0x70   :  { %424 = vmatprep.mubr.bf16.mxu0 %v4504_v0  ;;  %537 = vmatprep.mubr.bf16.mxu1 %v4504_v0 }
  0x77   :  { %425 = vmatmul.mubr.bf16.gmra.mrb[24].mxu0 %v4125_v8  ;;  %538 = vmatmul.mubr.bf16.gmra.mrb[24].mxu1 %v4125_v8 }
  0x78   :  { %434 = vmatprep.mubr.bf16.mxu0 %v4504_v0  ;;  %547 = vmatprep.mubr.bf16.mxu1 %v4504_v0 }
  0x7f   :  { %435 = vmatmul.mubr.bf16.gmra.mrb[28].mxu0 %v4132_v9  ;;  %548 = vmatmul.mubr.bf16.gmra.mrb[28].mxu1 %v4132_v9 }
  0x80   :  { %859 = vmatprep.mubr.bf16.mxu0 %v4504_v0  ;;  %902 = vmatprep.mubr.bf16.mxu1 %v4504_v0 }
  0x87   :  { %860 = vmatmul.mubr.bf16.vlgmr.msra.gmra.mrb[0].mxu0 %v4505_v10  ;;  %903 = vmatmul.mubr.bf16.vlgmr.msra.gmra.mrb[0].mxu1 %v4505_v10 }
  0x88   :  { %1181 = vmatpush1.bf16.msra.mxu0 %v4564_v36  ;;  %1224 = vmatpush1.bf16.msra.mxu1 %v4570_v38 }
  0x89   :  { %1182 = vmatprep.subr.bf16.mxu0 %v4567_v37  ;;  %1225 = vmatprep.subr.bf16.mxu1 %v4572_v39 }
  0x8a   :  { %1212 = vmatprep.mubr.bf16.mxu0 %v4504_v0  ;;  %1255 = vmatprep.mubr.bf16.mxu1 %v4504_v0 }
  0x8c   :  { %1183 = vmatpush1.bf16.msra.mxu0 %v4576_v40  ;;  %1226 = vmatpush1.bf16.msra.mxu1 %v4583_v42 }
  0x8d   :  { %1184 = vmatprep.subr.bf16.mxu0 %v4580_v41  ;;  %1227 = vmatprep.subr.bf16.mxu1 %v4595_v46 }
  0x90   :  { %1185 = vmatpush1.bf16.msra.mxu0 %v4590_v44  ;;  %1228 = vmatpush1.bf16.msra.mxu1 %v4598_v47 }
  0x91   :  { %1186 = vmatprep.subr.bf16.mxu0 %v4593_v45  ;;  %1229 = vmatprep.subr.bf16.mxu1 %v4600_v48 }
  0x94   :  { %1187 = vmatpush1.bf16.msra.mxu0 %v4605_v49  ;;  %1230 = vmatpush1.bf16.msra.mxu1 %v4612_v51 }
  0x95   :  { %1188 = vmatprep.subr.bf16.mxu0 %v4608_v50  ;;  %1231 = vmatprep.subr.bf16.mxu1 %v4621_v54 }
  0x98   :  { %1189 = vmatpush1.bf16.msra.mxu0 %v4618_v53  ;;  %1232 = vmatpush1.bf16.msra.mxu1 %v4627_v56 }
  0x99   :  { %1190 = vmatprep.subr.bf16.mxu0 %v4624_v55  ;;  %1233 = vmatprep.subr.bf16.mxu1 %v4629_v57 }
  0x9c   :  { %1191 = vmatpush1.bf16.msra.mxu0 %v4631_v58  ;;  %1234 = vmatpush1.bf16.msra.mxu1 %v4637_v60 }
  0x9d   :  { %1192 = vmatprep.subr.bf16.mxu0 %v4635_v59  ;;  %1235 = vmatprep.subr.bf16.mxu1 %v4649_v63 }
  0xa0   :  { %1193 = vmatpush1.bf16.msra.mxu0 %v4646_v62  ;;  %1236 = vmatpush1.bf16.msra.mxu1 %v4653_v2 }
  0xa1   :  { %1194 = vmatprep.subr.bf16.mxu0 %v4651_v1  ;;  %1237 = vmatprep.subr.bf16.mxu1 %v4656_v3 }
  0xa4   :  { %1195 = vmatpush1.bf16.msra.mxu0 %v4660_v4  ;;  %1238 = vmatpush1.bf16.msra.mxu1 %v4664_v5 }
  0xa5   :  { %1534 = vmatprep.subr.bf16.mxu0 %v4557_v33  ;;  %1577 = vmatprep.subr.bf16.mxu1 %v4559_v34  ;;  %v4739_v33 = vrot.slane %v102_v14, %v118_v20 }
 0x15a   :  { %v861_v18 = vpop.f32.mrb[0].mxu0  ;;  %v904_v19 = vpop.f32.mrb[0].mxu1 }
 0x15b   :  { %v3904_v21 = vadd.f32 %v861_v18, %v4732_v16  ;;  %v863_v22 = vpop.f32.mrb[1].mxu0  ;;  %v906_v23 = vpop.f32.mrb[1].mxu1  ;;  %v3936_v7 = vadd.f32 %v904_v19, %v4742_v61 }
 0x15c   :  { %v3905_v24 = vadd.f32 %v863_v22, %v4734_v17  ;;  %v865_v25 = vpop.f32.mrb[2].mxu0  ;;  %v908_v26 = vpop.f32.mrb[2].mxu1  ;;  %v3937_v6 = vadd.f32 %v906_v23, %v4739_v33 }
 0x15d   :  { %v3539_v27 = vmul.f32 -1.442695, %v3904_v21  ;;  %v3906_v29 = vadd.f32 %v865_v25, %v4732_v16  ;;  %v867_v30 = vpop.f32.mrb[3].mxu0  ;;  %v910_v31 = vpop.f32.mrb[3].mxu1  ;;  %v3938_v10 = vadd.f32 %v908_v26, %v4742_v61 }
 0x15e   :  { %v3541_v32 = vmul.f32 -1.442695, %v3905_v24  ;;  %v3907_v35 = vadd.f32 %v867_v30, %v4734_v17  ;;  %v3543_v8 = vmul.f32 -1.442695, %v3937_v6  ;;  %v3939_v9 = vadd.f32 %v910_v31, %v4739_v33 }
 0x15f   :  { %4196 = vpow2.f32 %v3539_v27  ;;  %v3540_v43 = vmul.f32 -1.442695, %v3906_v29 }
 0x160   :  { %4198 = vpow2.f32 %v3541_v32  ;;  %v3542_v52 = vmul.f32 -1.442695, %v3907_v35  ;;  %v3544_v15 = vmul.f32 -1.442695, %v3939_v9 }
 0x161   :  { %4200 = vpow2.f32 %v3540_v43 }
 0x162   :  { %4202 = vpow2.f32 %v3542_v52 }
 0x163   :  { %4204 = vtanh.f32 %v3936_v7 }
 0x164   :  { %4206 = vpow2.f32 %v3543_v8 }
 0x165   :  { %4208 = vtanh.f32 %v3938_v10 }
 0x169   :  { %v4197_v11 = vpop.eup %4196 }
 0x16a   :  { %v4199_v12 = vpop.eup %4198  ;;  %v927_v13 = vadd.f32 1.0, %v4197_v11 }
 0x16b   :  { %v939_v18 = vadd.f32 1.0, %v4199_v12  ;;  %v4201_v14 = vpop.eup %4200 }
 0x16c   :  { %4210 = vrcp.f32 %v927_v13  ;;  %v928_v20 = vadd.f32 1.0, %v4201_v14  ;;  %v4203_v21 = vpop.eup %4202 }
 0x16d   :  { %4212 = vrcp.f32 %v939_v18  ;;  %v940_v19 = vadd.f32 1.0, %v4203_v21  ;;  %v4205_v22 = vpop.eup %4204 }
 0x16e   :  { %4214 = vpow2.f32 %v3544_v15  ;;  %v4207_v23 = vpop.eup %4206 }
 0x16f   :  { %4216 = vrcp.f32 %v928_v20  ;;  %v4209_v24 = vpop.eup %4208  ;;  %v953_v31 = vadd.f32 1.0, %v4207_v23 }
 0x170   :  { %4218 = vrcp.f32 %v940_v19 }
 0x171   :  { %4220 = vrcp.f32 %v953_v31 }
 0x176   :  { %v4211_v25 = vpop.eup %4210 }
 0x177   :  { %v4213_v26 = vpop.eup %4212  ;;  %v961_v27 = vmul.f32 %v4211_v25, %v4205_v22 }
 0x178   :  { %v4215_v28 = vpop.eup %4214  ;;  %v959_v29 = vmul.f32 0.0, %v4213_v26 }
 0x179   :  { %v4217_v30 = vpop.eup %4216  ;;  %v954_v52 = vadd.f32 1.0, %v4215_v28 }
 0x17a   :  { %v4748_v32 = vadd.f32 %v961_v27, %v959_v29  ;;  %v962_v35 = vmul.f32 %v4217_v30, %v4209_v24  ;;  %v4219_v43 = vpop.eup %4218 }
 0x17b   :  { %v960_v6 = vmul.f32 0.0, %v4219_v43  ;;  %v4221_v8 = vpop.eup %4220 }
 0x17c   :  { %4222 = vtanh.f32 %v4748_v32 }
 0x17d   :  { %v4751_v7 = vadd.f32 %v962_v35, %v960_v6  ;;  %4224 = vrcp.f32 %v954_v52 }
 0x17f   :  { %4226 = vtanh.f32 %v4751_v7 }
 0x186   :  { %v4223_v9 = vpop.eup %4222 }
 0x187   :  { %v4225_v10 = vpop.eup %4224  ;;  %v967_v12 = vmul.f32 %v4223_v9, %v4221_v8 }
 0x189   :  { %v4227_v11 = vpop.eup %4226 }
 0x18a   :  { %v968_v13 = vmul.f32 %v4227_v11, %v4225_v10 }
 0x18c   :  { %v969_v15 = vpack.c.bf16 %v968_v13, %v967_v12 }
 0x18e   :  { %3861 = vst [vmem:[%s5150_s4] sm:$0xff] %v969_v15   ;;  %1213 = vmatmul.mubr.bf16.vlgmr.msra.gmra.mrb[4].mxu0 %v969_v15  ;;  %1256 = vmatmul.mubr.bf16.vlgmr.msra.gmra.mrb[4].mxu1 %v969_v15 }
 0x18f   :  { %1535 = vmatpush1.bf16.msra.mxu0 %v4564_v36  ;;  %1578 = vmatpush1.bf16.msra.mxu1 %v4570_v38 }
 0x190   :  { %1536 = vmatprep.subr.bf16.mxu0 %v4567_v37  ;;  %1579 = vmatprep.subr.bf16.mxu1 %v4572_v39 }
 0x191   :  { %1566 = vmatprep.mubr.bf16.mxu0 %v4504_v0  ;;  %1609 = vmatprep.mubr.bf16.mxu1 %v4504_v0 }
 0x193   :  { %1537 = vmatpush1.bf16.msra.mxu0 %v4576_v40  ;;  %1580 = vmatpush1.bf16.msra.mxu1 %v4583_v42 }
 0x194   :  { %1538 = vmatprep.subr.bf16.mxu0 %v4580_v41  ;;  %1581 = vmatprep.subr.bf16.mxu1 %v4595_v46 }
 0x197   :  { %1539 = vmatpush1.bf16.msra.mxu0 %v4590_v44  ;;  %1582 = vmatpush1.bf16.msra.mxu1 %v4598_v47 }
 0x198   :  { %1540 = vmatprep.subr.bf16.mxu0 %v4593_v45  ;;  %1583 = vmatprep.subr.bf16.mxu1 %v4600_v48 }
 0x19b   :  { %1541 = vmatpush1.bf16.msra.mxu0 %v4605_v49  ;;  %1584 = vmatpush1.bf16.msra.mxu1 %v4612_v51 }
 0x19c   :  { %1542 = vmatprep.subr.bf16.mxu0 %v4608_v50  ;;  %1585 = vmatprep.subr.bf16.mxu1 %v4621_v54 }
 0x19f   :  { %1543 = vmatpush1.bf16.msra.mxu0 %v4618_v53  ;;  %1586 = vmatpush1.bf16.msra.mxu1 %v4627_v56 }
 0x1a0   :  { %1544 = vmatprep.subr.bf16.mxu0 %v4624_v55  ;;  %1587 = vmatprep.subr.bf16.mxu1 %v4629_v57 }
 0x1a3   :  { %1545 = vmatpush1.bf16.msra.mxu0 %v4631_v58  ;;  %1588 = vmatpush1.bf16.msra.mxu1 %v4637_v60 }
 0x1a4   :  { %1546 = vmatprep.subr.bf16.mxu0 %v4635_v59  ;;  %1589 = vmatprep.subr.bf16.mxu1 %v4649_v63 }
 0x1a7   :  { %1547 = vmatpush1.bf16.msra.mxu0 %v4646_v62  ;;  %1590 = vmatpush1.bf16.msra.mxu1 %v4653_v2 }
 0x1a8   :  { %1548 = vmatprep.subr.bf16.mxu0 %v4651_v1  ;;  %1591 = vmatprep.subr.bf16.mxu1 %v4656_v3 }
 0x1ab   :  { %1549 = vmatpush1.bf16.msra.mxu0 %v4660_v4  ;;  %1592 = vmatpush1.bf16.msra.mxu1 %v4664_v5 }
 0x1ac   :  { %1931 = vmatprep.subr.bf16.mxu1 %v4559_v34 }
 0x261   :  { %v1214_v36 = vpop.f32.mrb[4].mxu0  ;;  %v1257_v37 = vpop.f32.mrb[4].mxu1 }
 0x262   :  { %v3908_v40 = vadd.f32 %v1214_v36, %v4732_v16  ;;  %v1216_v18 = vpop.f32.mrb[5].mxu0  ;;  %v1259_v14 = vpop.f32.mrb[5].mxu1  ;;  %v3940_v30 = vadd.f32 %v1257_v37, %v4742_v61 }
 0x263   :  { %v3909_v20 = vadd.f32 %v1216_v18, %v4734_v17  ;;  %v1218_v21 = vpop.f32.mrb[6].mxu0  ;;  %v1261_v19 = vpop.f32.mrb[6].mxu1  ;;  %v3941_v29 = vadd.f32 %v1259_v14, %v4739_v33 }
 0x264   :  { %v3579_v22 = vmul.f32 -1.442695, %v3908_v40  ;;  %v3910_v23 = vadd.f32 %v1218_v21, %v4732_v16  ;;  %v1220_v24 = vpop.f32.mrb[7].mxu0  ;;  %v1263_v25 = vpop.f32.mrb[7].mxu1  ;;  %v3942_v43 = vadd.f32 %v1261_v19, %v4742_v61 }
 0x265   :  { %v3581_v26 = vmul.f32 -1.442695, %v3909_v20  ;;  %v3911_v27 = vadd.f32 %v1220_v24, %v4734_v17  ;;  %v3583_v31 = vmul.f32 -1.442695, %v3941_v29  ;;  %v3943_v35 = vadd.f32 %v1263_v25, %v4739_v33 }
 0x266   :  { %4228 = vpow2.f32 %v3579_v22  ;;  %v3580_v34 = vmul.f32 -1.442695, %v3910_v23 }
 0x267   :  { %4230 = vpow2.f32 %v3581_v26  ;;  %v3582_v28 = vmul.f32 -1.442695, %v3911_v27  ;;  %v3584_v9 = vmul.f32 -1.442695, %v3943_v35 }
 0x268   :  { %4232 = vpow2.f32 %v3580_v34 }
 0x269   :  { %4234 = vpow2.f32 %v3582_v28 }
 0x26a   :  { %4236 = vtanh.f32 %v3940_v30 }
 0x26b   :  { %4238 = vpow2.f32 %v3583_v31 }
 0x26c   :  { %4240 = vtanh.f32 %v3942_v43 }
 0x270   :  { %v4229_v52 = vpop.eup %4228 }
 0x271   :  { %v4231_v6 = vpop.eup %4230  ;;  %v1280_v8 = vadd.f32 1.0, %v4229_v52 }
 0x272   :  { %v1292_v10 = vadd.f32 1.0, %v4231_v6  ;;  %v4233_v11 = vpop.eup %4232 }
 0x273   :  { %4242 = vrcp.f32 %v1280_v8  ;;  %v1281_v12 = vadd.f32 1.0, %v4233_v11  ;;  %v4235_v13 = vpop.eup %4234 }
 0x274   :  { %4244 = vrcp.f32 %v1292_v10  ;;  %v1293_v15 = vadd.f32 1.0, %v4235_v13  ;;  %v4237_v36 = vpop.eup %4236 }
 0x275   :  { %4246 = vpow2.f32 %v3584_v9  ;;  %v4239_v37 = vpop.eup %4238 }
 0x276   :  { %4248 = vrcp.f32 %v1281_v12  ;;  %v4241_v40 = vpop.eup %4240  ;;  %v1306_v23 = vadd.f32 1.0, %v4239_v37 }
 0x277   :  { %4250 = vrcp.f32 %v1293_v15 }
 0x278   :  { %4252 = vrcp.f32 %v1306_v23 }
 0x27d   :  { %v4243_v18 = vpop.eup %4242 }
 0x27e   :  { %v4245_v14 = vpop.eup %4244  ;;  %v1314_v20 = vmul.f32 %v4243_v18, %v4237_v36 }
 0x27f   :  { %v4247_v21 = vpop.eup %4246  ;;  %v1312_v19 = vmul.f32 %v4245_v14, %v4748_v32 }
 0x280   :  { %v4249_v22 = vpop.eup %4248  ;;  %v1307_v27 = vadd.f32 1.0, %v4247_v21 }
 0x281   :  { %v4799_v24 = vadd.f32 %v1314_v20, %v1312_v19  ;;  %v1315_v25 = vmul.f32 %v4249_v22, %v4241_v40  ;;  %v4251_v26 = vpop.eup %4250 }
 0x282   :  { %v1313_v34 = vmul.f32 %v4251_v26, %v4751_v7  ;;  %v4253_v29 = vpop.eup %4252 }
 0x283   :  { %4254 = vtanh.f32 %v4799_v24 }
 0x284   :  { %v4803_v28 = vadd.f32 %v1315_v25, %v1313_v34  ;;  %4256 = vrcp.f32 %v1307_v27 }
 0x286   :  { %4258 = vtanh.f32 %v4803_v28 }
 0x28d   :  { %v4255_v30 = vpop.eup %4254 }
 0x28e   :  { %v4257_v32 = vpop.eup %4256  ;;  %v1320_v35 = vmul.f32 %v4255_v30, %v4253_v29 }
 0x290   :  { %v4259_v31 = vpop.eup %4258 }
 0x291   :  { %v1321_v43 = vmul.f32 %v4259_v31, %v4257_v32 }
 0x293   :  { %v1322_v52 = vpack.c.bf16 %v1321_v43, %v1320_v35 }
 0x295   :  { %3897 = vst [vmem:[%s5150_s4 + $0x8] sm:$0xff] %v1322_v52   ;;  %1567 = vmatmul.mubr.bf16.vlgmr.msra.gmra.mrb[8].mxu0 %v1322_v52  ;;  %1610 = vmatmul.mubr.bf16.vlgmr.msra.gmra.mrb[8].mxu1 %v1322_v52  ;;  %v4877_v52 = vld [vmem:[#allocation7 + $0x8] ss:$16 sps:$4 sm:$0xff]  }
 0x296   :  { %1932 = vmatpush1.bf16.msra.mxu1 %v4570_v38  ;;  %1920 = vmatprep.mubr.bf16.mxu0 %v4504_v0  ;;  %v4826_v38 = vld [vmem:[#allocation7 + $0x4] ss:$16 sps:$4 sm:$0xff]  }
 0x297   :  { %1933 = vmatprep.subr.bf16.mxu1 %v4572_v39  ;;  %1963 = vmatprep.mubr.bf16.mxu1 %v4504_v0  ;;  %v4828_v39 = vld [vmem:[#allocation7] ss:$16 sps:$4 sm:$0xff]  }
 0x298   :  { %1888 = vmatprep.subr.bf16.mxu0 %v4826_v38 }
 0x299   :  { %1889 = vmatpush1.bf16.msra.mxu0 %v4828_v39 }
 0x29a   :  { %1934 = vmatpush1.bf16.msra.mxu1 %v4583_v42  ;;  %v4832_v42 = vld [vmem:[#allocation7 + $0x24] ss:$16 sps:$4 sm:$0xff]  }
 0x29b   :  { %1935 = vmatprep.subr.bf16.mxu1 %v4595_v46  ;;  %v4834_v46 = vld [vmem:[#allocation7 + $0x20] ss:$16 sps:$4 sm:$0xff]   ;;  %1890 = vmatprep.subr.bf16.mxu0 %v4832_v42 }
 0x29d   :  { %1891 = vmatpush1.bf16.msra.mxu0 %v4834_v46 }
 0x29e   :  { %1936 = vmatpush1.bf16.msra.mxu1 %v4598_v47  ;;  %1892 = vmatprep.subr.bf16.mxu0 %v4580_v41 }
 0x29f   :  { %1937 = vmatprep.subr.bf16.mxu1 %v4600_v48 }
 0x2a1   :  { %1893 = vmatpush1.bf16.msra.mxu0 %v4590_v44 }
 0x2a2   :  { %1938 = vmatpush1.bf16.msra.mxu1 %v4612_v51  ;;  %1894 = vmatprep.subr.bf16.mxu0 %v4593_v45 }
 0x2a3   :  { %1939 = vmatprep.subr.bf16.mxu1 %v4621_v54 }
 0x2a5   :  { %1895 = vmatpush1.bf16.msra.mxu0 %v4605_v49 }
 0x2a6   :  { %1940 = vmatpush1.bf16.msra.mxu1 %v4627_v56  ;;  %1896 = vmatprep.subr.bf16.mxu0 %v4608_v50 }
 0x2a7   :  { %1941 = vmatprep.subr.bf16.mxu1 %v4629_v57 }
 0x2a9   :  { %1897 = vmatpush1.bf16.msra.mxu0 %v4618_v53 }
 0x2aa   :  { %1942 = vmatpush1.bf16.msra.mxu1 %v4637_v60  ;;  %1898 = vmatprep.subr.bf16.mxu0 %v4624_v55 }
 0x2ab   :  { %1943 = vmatprep.subr.bf16.mxu1 %v4649_v63 }
 0x2ad   :  { %1899 = vmatpush1.bf16.msra.mxu0 %v4631_v58 }
 0x2ae   :  { %1944 = vmatpush1.bf16.msra.mxu1 %v4653_v2  ;;  %1900 = vmatprep.subr.bf16.mxu0 %v4635_v59 }
 0x2af   :  { %1945 = vmatprep.subr.bf16.mxu1 %v4656_v3 }
 0x2b1   :  { %1901 = vmatpush1.bf16.msra.mxu0 %v4646_v62 }
 0x2b2   :  { %1946 = vmatpush1.bf16.msra.mxu1 %v4664_v5  ;;  %1902 = vmatprep.subr.bf16.mxu0 %v4651_v1 }
 0x2b5   :  { %1903 = vmatpush1.bf16.msra.mxu0 %v4660_v4 }
 0x2b6   :  { %2242 = vmatprep.subr.bf16.mxu0 %v4826_v38 }
 0x368   :  { %v1568_v41 = vpop.f32.mrb[8].mxu0  ;;  %v1611_v44 = vpop.f32.mrb[8].mxu1 }
 0x369   :  { %v3912_v45 = vadd.f32 %v1568_v41, %v4732_v16  ;;  %v1570_v47 = vpop.f32.mrb[9].mxu0  ;;  %v1613_v48 = vpop.f32.mrb[9].mxu1  ;;  %v3944_v63 = vadd.f32 %v1611_v44, %v4742_v61  ;;  %v4881_v41 = vld [vmem:[#allocation7 + $0x2c] ss:$16 sps:$4 sm:$0xff]   ;;  %v4883_v44 = vld [vmem:[#allocation7 + $0x28] ss:$16 sps:$4 sm:$0xff]  }
 0x36a   :  { %v3913_v49 = vadd.f32 %v1570_v47, %v4734_v17  ;;  %v1572_v50 = vpop.f32.mrb[10].mxu0  ;;  %v1615_v51 = vpop.f32.mrb[10].mxu1  ;;  %v3945_v62 = vadd.f32 %v1613_v48, %v4739_v33  ;;  %v4889_v47 = vld [vmem:[#allocation7 + $0x4c] ss:$16 sps:$4 sm:$0xff]   ;;  %v4891_v48 = vld [vmem:[#allocation7 + $0x40] ss:$16 sps:$4 sm:$0xff]  }
 0x36b   :  { %v3621_v53 = vmul.f32 -1.442695, %v3912_v45  ;;  %v3914_v54 = vadd.f32 %v1572_v50, %v4732_v16  ;;  %v1574_v55 = vpop.f32.mrb[11].mxu0  ;;  %v1617_v56 = vpop.f32.mrb[11].mxu1  ;;  %v3946_v3 = vadd.f32 %v1615_v51, %v4742_v61  ;;  %v4887_v45 = vld [vmem:[#allocation7 + $0x44] ss:$16 sps:$4 sm:$0xff]  }
 0x36c   :  { %v3623_v57 = vmul.f32 -1.442695, %v3913_v49  ;;  %v3915_v58 = vadd.f32 %v1574_v55, %v4734_v17  ;;  %v3625_v1 = vmul.f32 -1.442695, %v3945_v62  ;;  %v3947_v2 = vadd.f32 %v1617_v56, %v4739_v33  ;;  %v4893_v49 = vld [vmem:[#allocation7 + $0x48] ss:$16 sps:$4 sm:$0xff]  }
 0x36d   :  { %4260 = vpow2.f32 %v3621_v53  ;;  %v3622_v59 = vmul.f32 -1.442695, %v3914_v54  ;;  %v4899_v50 = vld [vmem:[#allocation7 + $0x64] ss:$16 sps:$4 sm:$0xff]   ;;  %v4901_v51 = vld [vmem:[#allocation7 + $0x6c] ss:$16 sps:$4 sm:$0xff]  }
 0x36e   :  { %4262 = vpow2.f32 %v3623_v57  ;;  %v3624_v60 = vmul.f32 -1.442695, %v3915_v58  ;;  %v3626_v6 = vmul.f32 -1.442695, %v3947_v2  ;;  %v4903_v53 = vld [vmem:[#allocation7 + $0x60] ss:$16 sps:$4 sm:$0xff]  }
 0x36f   :  { %4264 = vpow2.f32 %v3622_v59  ;;  %v4905_v54 = vld [vmem:[#allocation7 + $0x68] ss:$16 sps:$4 sm:$0xff]   ;;  %v4911_v55 = vld [vmem:[#allocation7 + $0x84] ss:$16 sps:$4 sm:$0xff]   ;;  %v4913_v56 = vld [vmem:[#allocation7 + $0x8c] ss:$16 sps:$4 sm:$0xff]  }
 0x370   :  { %4266 = vpow2.f32 %v3624_v60  ;;  %v4915_v57 = vld [vmem:[#allocation7 + $0x80] ss:$16 sps:$4 sm:$0xff]   ;;  %v4917_v58 = vld [vmem:[#allocation7 + $0x88] ss:$16 sps:$4 sm:$0xff]   ;;  %v4921_v59 = vld [vmem:[#allocation7 + $0xa4] ss:$16 sps:$4 sm:$0xff]  }
 0x371   :  { %4268 = vtanh.f32 %v3944_v63  ;;  %v4923_v60 = vld [vmem:[#allocation7 + $0xac] ss:$16 sps:$4 sm:$0xff]   ;;  %v4927_v62 = vld [vmem:[#allocation7 + $0xa0] ss:$16 sps:$4 sm:$0xff]   ;;  %v4929_v63 = vld [vmem:[#allocation7 + $0xa8] ss:$16 sps:$4 sm:$0xff]  }
 0x372   :  { %4270 = vpow2.f32 %v3625_v1  ;;  %v4933_v1 = vld [vmem:[#allocation7 + $0xc4] ss:$16 sps:$4 sm:$0xff]   ;;  %v4935_v2 = vld [vmem:[#allocation7 + $0xcc] ss:$16 sps:$4 sm:$0xff]  }
 0x373   :  { %4272 = vtanh.f32 %v3946_v3  ;;  %v4939_v3 = vld [vmem:[#allocation7 + $0xc0] ss:$16 sps:$4 sm:$0xff]  }
 0x377   :  { %v4261_v4 = vpop.eup %4260 }
 0x378   :  { %v4263_v5 = vpop.eup %4262  ;;  %v1634_v7 = vadd.f32 1.0, %v4261_v4  ;;  %v4941_v4 = vld [vmem:[#allocation7 + $0xc8] ss:$16 sps:$4 sm:$0xff]  }
 0x379   :  { %v1646_v8 = vadd.f32 1.0, %v4263_v5  ;;  %v4265_v9 = vpop.eup %4264  ;;  %v4945_v5 = vld [vmem:[#allocation7 + $0xe4] ss:$16 sps:$4 sm:$0xff]  }
 0x37a   :  { %4274 = vrcp.f32 %v1634_v7  ;;  %v1635_v10 = vadd.f32 1.0, %v4265_v9  ;;  %v4267_v11 = vpop.eup %4266  ;;  %v4947_v7 = vld [vmem:[#allocation7 + $0xec] ss:$16 sps:$4 sm:$0xff]  }
 0x37b   :  { %4276 = vrcp.f32 %v1646_v8  ;;  %v1647_v12 = vadd.f32 1.0, %v4267_v11  ;;  %v4269_v13 = vpop.eup %4268  ;;  %v4953_v8 = vld [vmem:[#allocation7 + $0xe8] ss:$16 sps:$4 sm:$0xff]  }
 0x37c   :  { %4278 = vpow2.f32 %v3626_v6  ;;  %v4271_v15 = vpop.eup %4270  ;;  %v4951_v6 = vld [vmem:[#allocation7 + $0xe0] ss:$16 sps:$4 sm:$0xff]  }
 0x37d   :  { %4280 = vrcp.f32 %v1635_v10  ;;  %v4273_v36 = vpop.eup %4272  ;;  %v1660_v19 = vadd.f32 1.0, %v4271_v15 }
 0x37e   :  { %4282 = vrcp.f32 %v1647_v12 }
 0x37f   :  { %4284 = vrcp.f32 %v1660_v19 }
 0x384   :  { %v4275_v37 = vpop.eup %4274 }
 0x385   :  { %v4277_v40 = vpop.eup %4276  ;;  %v1668_v18 = vmul.f32 %v4275_v37, %v4269_v13 }
 0x386   :  { %v4279_v14 = vpop.eup %4278  ;;  %v1666_v20 = vmul.f32 %v4277_v40, %v4799_v24 }
 0x387   :  { %v4281_v21 = vpop.eup %4280  ;;  %v1661_v26 = vadd.f32 1.0, %v4279_v14 }
 0x388   :  { %v4860_v22 = vadd.f32 %v1668_v18, %v1666_v20  ;;  %v1669_v23 = vmul.f32 %v4281_v21, %v4273_v36  ;;  %v4283_v25 = vpop.eup %4282 }
 0x389   :  { %v1667_v27 = vmul.f32 %v4283_v25, %v4803_v28  ;;  %v4285_v29 = vpop.eup %4284  ;;  %v4875_v28 = vld [vmem:[#allocation7 + $0xc] ss:$16 sps:$4 sm:$0xff]  }
 0x38a   :  { %4286 = vtanh.f32 %v4860_v22  ;;  %2285 = vmatprep.subr.bf16.mxu1 %v4875_v28 }
 0x38b   :  { %v4864_v34 = vadd.f32 %v1669_v23, %v1667_v27  ;;  %4288 = vrcp.f32 %v1661_v26 }
 0x38d   :  { %4290 = vtanh.f32 %v4864_v34 }
 0x394   :  { %v4287_v30 = vpop.eup %4286 }
 0x395   :  { %v4289_v24 = vpop.eup %4288  ;;  %v1674_v31 = vmul.f32 %v4287_v30, %v4285_v29 }
 0x397   :  { %v4291_v32 = vpop.eup %4290 }
 0x398   :  { %v1675_v35 = vmul.f32 %v4291_v32, %v4289_v24 }
 0x39a   :  { %v1676_v43 = vpack.c.bf16 %v1675_v35, %v1674_v31 }
 0x39c   :  { %3898 = vst [vmem:[%s5150_s4 + $0x10] sm:$0xff] %v1676_v43   ;;  %1921 = vmatmul.mubr.bf16.vlgmr.msra.gmra.mrb[12].mxu0 %v1676_v43  ;;  %1964 = vmatmul.mubr.bf16.vlgmr.msra.gmra.mrb[12].mxu1 %v1676_v43 }
 0x39d   :  { %2243 = vmatpush1.bf16.msra.mxu0 %v4828_v39  ;;  %2274 = vmatprep.mubr.bf16.mxu0 %v4504_v0 }
 0x39e   :  { %2244 = vmatprep.subr.bf16.mxu0 %v4832_v42  ;;  %2317 = vmatprep.mubr.bf16.mxu1 %v4504_v0 }
 0x39f   :  { %2286 = vmatpush1.bf16.msra.mxu1 %v4877_v52 }
 0x3a0   :  { %2287 = vmatprep.subr.bf16.mxu1 %v4881_v41 }
 0x3a1   :  { %2245 = vmatpush1.bf16.msra.mxu0 %v4834_v46 }
 0x3a2   :  { %2246 = vmatprep.subr.bf16.mxu0 %v4887_v45 }
 0x3a3   :  { %2288 = vmatpush1.bf16.msra.mxu1 %v4883_v44 }
 0x3a4   :  { %2289 = vmatprep.subr.bf16.mxu1 %v4889_v47 }
 0x3a5   :  { %2247 = vmatpush1.bf16.msra.mxu0 %v4891_v48 }
 0x3a6   :  { %2248 = vmatprep.subr.bf16.mxu0 %v4899_v50 }
 0x3a7   :  { %2290 = vmatpush1.bf16.msra.mxu1 %v4893_v49 }
 0x3a8   :  { %2291 = vmatprep.subr.bf16.mxu1 %v4901_v51 }
 0x3a9   :  { %2249 = vmatpush1.bf16.msra.mxu0 %v4903_v53 }
 0x3aa   :  { %2250 = vmatprep.subr.bf16.mxu0 %v4911_v55 }
 0x3ab   :  { %2292 = vmatpush1.bf16.msra.mxu1 %v4905_v54 }
 0x3ac   :  { %2293 = vmatprep.subr.bf16.mxu1 %v4913_v56 }
 0x3ad   :  { %2251 = vmatpush1.bf16.msra.mxu0 %v4915_v57 }
 0x3ae   :  { %2252 = vmatprep.subr.bf16.mxu0 %v4921_v59 }
 0x3af   :  { %2294 = vmatpush1.bf16.msra.mxu1 %v4917_v58 }
 0x3b0   :  { %2295 = vmatprep.subr.bf16.mxu1 %v4923_v60 }
 0x3b1   :  { %2253 = vmatpush1.bf16.msra.mxu0 %v4927_v62 }
 0x3b2   :  { %2254 = vmatprep.subr.bf16.mxu0 %v4933_v1 }
 0x3b3   :  { %2296 = vmatpush1.bf16.msra.mxu1 %v4929_v63 }
 0x3b4   :  { %2297 = vmatprep.subr.bf16.mxu1 %v4935_v2 }
 0x3b5   :  { %2255 = vmatpush1.bf16.msra.mxu0 %v4939_v3 }
 0x3b6   :  { %2256 = vmatprep.subr.bf16.mxu0 %v4945_v5 }
 0x3b7   :  { %2298 = vmatpush1.bf16.msra.mxu1 %v4941_v4 }
 0x3b8   :  { %2299 = vmatprep.subr.bf16.mxu1 %v4947_v7 }
 0x3b9   :  { %2257 = vmatpush1.bf16.msra.mxu0 %v4951_v6 }
 0x3ba   :  { %2596 = vmatprep.subr.bf16.mxu0 %v4826_v38 }
 0x3bb   :  { %2300 = vmatpush1.bf16.msra.mxu1 %v4953_v8 }
 0x3bc   :  { %2639 = vmatprep.subr.bf16.mxu1 %v4875_v28 }
 0x46f   :  { %v1922_v9 = vpop.f32.mrb[12].mxu0  ;;  %v1965_v10 = vpop.f32.mrb[12].mxu1 }
 0x470   :  { %v3916_v11 = vadd.f32 %v1922_v9, %v4732_v16  ;;  %v1924_v12 = vpop.f32.mrb[13].mxu0  ;;  %v1967_v13 = vpop.f32.mrb[13].mxu1  ;;  %v3948_v27 = vadd.f32 %v1965_v10, %v4742_v61 }
 0x471   :  { %v3917_v15 = vadd.f32 %v1924_v12, %v4734_v17  ;;  %v1926_v36 = vpop.f32.mrb[14].mxu0  ;;  %v1969_v37 = vpop.f32.mrb[14].mxu1  ;;  %v3949_v26 = vadd.f32 %v1967_v13, %v4739_v33 }
 0x472   :  { %v3663_v40 = vmul.f32 -1.442695, %v3916_v11  ;;  %v3918_v18 = vadd.f32 %v1926_v36, %v4732_v16  ;;  %v1928_v14 = vpop.f32.mrb[15].mxu0  ;;  %v1971_v20 = vpop.f32.mrb[15].mxu1  ;;  %v3950_v24 = vadd.f32 %v1969_v37, %v4742_v61 }
 0x473   :  { %v3665_v21 = vmul.f32 -1.442695, %v3917_v15  ;;  %v3919_v19 = vadd.f32 %v1928_v14, %v4734_v17  ;;  %v3667_v29 = vmul.f32 -1.442695, %v3949_v26  ;;  %v3951_v30 = vadd.f32 %v1971_v20, %v4739_v33 }
 0x474   :  { %4292 = vpow2.f32 %v3663_v40  ;;  %v3664_v23 = vmul.f32 -1.442695, %v3918_v18 }
 0x475   :  { %4294 = vpow2.f32 %v3665_v21  ;;  %v3666_v25 = vmul.f32 -1.442695, %v3919_v19  ;;  %v3668_v43 = vmul.f32 -1.442695, %v3951_v30 }
 0x476   :  { %4296 = vpow2.f32 %v3664_v23 }
 0x477   :  { %4298 = vpow2.f32 %v3666_v25 }
 0x478   :  { %4300 = vtanh.f32 %v3948_v27 }
 0x479   :  { %4302 = vpow2.f32 %v3667_v29 }
 0x47a   :  { %4304 = vtanh.f32 %v3950_v24 }
 0x47e   :  { %v4293_v32 = vpop.eup %4292 }
 0x47f   :  { %v4295_v31 = vpop.eup %4294  ;;  %v1988_v35 = vadd.f32 1.0, %v4293_v32 }
 0x480   :  { %v2000_v9 = vadd.f32 1.0, %v4295_v31  ;;  %v4297_v11 = vpop.eup %4296 }
 0x481   :  { %4306 = vrcp.f32 %v1988_v35  ;;  %v1989_v12 = vadd.f32 1.0, %v4297_v11  ;;  %v4299_v13 = vpop.eup %4298 }
 0x482   :  { %4308 = vrcp.f32 %v2000_v9  ;;  %v2001_v10 = vadd.f32 1.0, %v4299_v13  ;;  %v4301_v15 = vpop.eup %4300 }
 0x483   :  { %4310 = vpow2.f32 %v3668_v43  ;;  %v4303_v36 = vpop.eup %4302 }
 0x484   :  { %4312 = vrcp.f32 %v1989_v12  ;;  %v4305_v37 = vpop.eup %4304  ;;  %v2014_v23 = vadd.f32 1.0, %v4303_v36 }
 0x485   :  { %4314 = vrcp.f32 %v2001_v10 }
 0x486   :  { %4316 = vrcp.f32 %v2014_v23 }
 0x48b   :  { %v4307_v40 = vpop.eup %4306 }
 0x48c   :  { %v4309_v18 = vpop.eup %4308  ;;  %v2022_v14 = vmul.f32 %v4307_v40, %v4301_v15 }
 0x48d   :  { %v4311_v20 = vpop.eup %4310  ;;  %v2020_v21 = vmul.f32 %v4309_v18, %v4860_v22 }
 0x48e   :  { %v4313_v19 = vpop.eup %4312  ;;  %v2015_v29 = vadd.f32 1.0, %v4311_v20 }
 0x48f   :  { %v4970_v25 = vadd.f32 %v2022_v14, %v2020_v21  ;;  %v2023_v26 = vmul.f32 %v4313_v19, %v4305_v37  ;;  %v4315_v27 = vpop.eup %4314 }
 0x490   :  { %v2021_v30 = vmul.f32 %v4315_v27, %v4864_v34  ;;  %v4317_v32 = vpop.eup %4316 }
 0x491   :  { %4318 = vtanh.f32 %v4970_v25 }
 0x492   :  { %v4974_v24 = vadd.f32 %v2023_v26, %v2021_v30  ;;  %4320 = vrcp.f32 %v2015_v29 }
 0x494   :  { %4322 = vtanh.f32 %v4974_v24 }
 0x49b   :  { %v4319_v31 = vpop.eup %4318 }
 0x49c   :  { %v4321_v22 = vpop.eup %4320  ;;  %v2028_v43 = vmul.f32 %v4319_v31, %v4317_v32 }
 0x49e   :  { %v4323_v35 = vpop.eup %4322 }
 0x49f   :  { %v2029_v9 = vmul.f32 %v4323_v35, %v4321_v22 }
 0x4a1   :  { %v2030_v11 = vpack.c.bf16 %v2029_v9, %v2028_v43 }
 0x4a3   :  { %3899 = vst [vmem:[%s5150_s4 + $0x18] sm:$0xff] %v2030_v11   ;;  %2275 = vmatmul.mubr.bf16.vlgmr.msra.gmra.mrb[16].mxu0 %v2030_v11  ;;  %2318 = vmatmul.mubr.bf16.vlgmr.msra.gmra.mrb[16].mxu1 %v2030_v11 }
 0x4a4   :  { %2597 = vmatpush1.bf16.msra.mxu0 %v4828_v39  ;;  %2640 = vmatpush1.bf16.msra.mxu1 %v4877_v52 }
 0x4a5   :  { %2598 = vmatprep.subr.bf16.mxu0 %v4832_v42  ;;  %2641 = vmatprep.subr.bf16.mxu1 %v4881_v41 }
 0x4a6   :  { %2628 = vmatprep.mubr.bf16.mxu0 %v4504_v0  ;;  %2671 = vmatprep.mubr.bf16.mxu1 %v4504_v0 }
 0x4a8   :  { %2599 = vmatpush1.bf16.msra.mxu0 %v4834_v46  ;;  %2642 = vmatpush1.bf16.msra.mxu1 %v4883_v44 }
 0x4a9   :  { %2600 = vmatprep.subr.bf16.mxu0 %v4887_v45  ;;  %2643 = vmatprep.subr.bf16.mxu1 %v4889_v47 }
 0x4ac   :  { %2601 = vmatpush1.bf16.msra.mxu0 %v4891_v48  ;;  %2644 = vmatpush1.bf16.msra.mxu1 %v4893_v49 }
 0x4ad   :  { %2602 = vmatprep.subr.bf16.mxu0 %v4899_v50  ;;  %2645 = vmatprep.subr.bf16.mxu1 %v4901_v51 }
 0x4b0   :  { %2603 = vmatpush1.bf16.msra.mxu0 %v4903_v53  ;;  %2646 = vmatpush1.bf16.msra.mxu1 %v4905_v54 }
 0x4b1   :  { %2604 = vmatprep.subr.bf16.mxu0 %v4911_v55  ;;  %2647 = vmatprep.subr.bf16.mxu1 %v4913_v56 }
 0x4b4   :  { %2605 = vmatpush1.bf16.msra.mxu0 %v4915_v57  ;;  %2648 = vmatpush1.bf16.msra.mxu1 %v4917_v58 }
 0x4b5   :  { %2606 = vmatprep.subr.bf16.mxu0 %v4921_v59  ;;  %2649 = vmatprep.subr.bf16.mxu1 %v4923_v60 }
 0x4b8   :  { %2607 = vmatpush1.bf16.msra.mxu0 %v4927_v62  ;;  %2650 = vmatpush1.bf16.msra.mxu1 %v4929_v63 }
 0x4b9   :  { %2608 = vmatprep.subr.bf16.mxu0 %v4933_v1  ;;  %2651 = vmatprep.subr.bf16.mxu1 %v4935_v2 }
 0x4bc   :  { %2609 = vmatpush1.bf16.msra.mxu0 %v4939_v3  ;;  %2652 = vmatpush1.bf16.msra.mxu1 %v4941_v4 }
 0x4bd   :  { %2610 = vmatprep.subr.bf16.mxu0 %v4945_v5  ;;  %2653 = vmatprep.subr.bf16.mxu1 %v4947_v7 }
 0x4c0   :  { %2611 = vmatpush1.bf16.msra.mxu0 %v4951_v6  ;;  %2654 = vmatpush1.bf16.msra.mxu1 %v4953_v8 }
 0x4c1   :  { %2950 = vmatprep.subr.bf16.mxu0 %v4826_v38  ;;  %2993 = vmatprep.subr.bf16.mxu1 %v4875_v28 }
 0x576   :  { %v2276_v34 = vpop.f32.mrb[16].mxu0  ;;  %v2319_v12 = vpop.f32.mrb[16].mxu1 }
 0x577   :  { %v3920_v13 = vadd.f32 %v2276_v34, %v4732_v16  ;;  %v2278_v10 = vpop.f32.mrb[17].mxu0  ;;  %v2321_v15 = vpop.f32.mrb[17].mxu1  ;;  %v3952_v29 = vadd.f32 %v2319_v12, %v4742_v61 }
 0x578   :  { %v3921_v36 = vadd.f32 %v2278_v10, %v4734_v17  ;;  %v2280_v37 = vpop.f32.mrb[18].mxu0  ;;  %v2323_v40 = vpop.f32.mrb[18].mxu1  ;;  %v3953_v27 = vadd.f32 %v2321_v15, %v4739_v33 }
 0x579   :  { %v3705_v18 = vmul.f32 -1.442695, %v3920_v13  ;;  %v3922_v14 = vadd.f32 %v2280_v37, %v4732_v16  ;;  %v2282_v20 = vpop.f32.mrb[19].mxu0  ;;  %v2325_v21 = vpop.f32.mrb[19].mxu1  ;;  %v3954_v31 = vadd.f32 %v2323_v40, %v4742_v61 }
 0x57a   :  { %v3707_v19 = vmul.f32 -1.442695, %v3921_v36  ;;  %v3923_v38 = vadd.f32 %v2282_v20, %v4734_v17  ;;  %v3709_v30 = vmul.f32 -1.442695, %v3953_v27  ;;  %v3955_v32 = vadd.f32 %v2325_v21, %v4739_v33 }
 0x57b   :  { %4324 = vpow2.f32 %v3705_v18  ;;  %v3706_v23 = vmul.f32 -1.442695, %v3922_v14 }
 0x57c   :  { %4326 = vpow2.f32 %v3707_v19  ;;  %v3708_v26 = vmul.f32 -1.442695, %v3923_v38  ;;  %v3710_v9 = vmul.f32 -1.442695, %v3955_v32 }
 0x57d   :  { %4328 = vpow2.f32 %v3706_v23 }
 0x57e   :  { %4330 = vpow2.f32 %v3708_v26 }
 0x57f   :  { %4332 = vtanh.f32 %v3952_v29 }
 0x580   :  { %4334 = vpow2.f32 %v3709_v30 }
 0x581   :  { %4336 = vtanh.f32 %v3954_v31 }
 0x585   :  { %v4325_v22 = vpop.eup %4324 }
 0x586   :  { %v4327_v35 = vpop.eup %4326  ;;  %v2342_v43 = vadd.f32 1.0, %v4325_v22 }
 0x587   :  { %v2354_v11 = vadd.f32 1.0, %v4327_v35  ;;  %v4329_v34 = vpop.eup %4328 }
 0x588   :  { %4338 = vrcp.f32 %v2342_v43  ;;  %v2343_v13 = vadd.f32 1.0, %v4329_v34  ;;  %v4331_v10 = vpop.eup %4330 }
 0x589   :  { %4340 = vrcp.f32 %v2354_v11  ;;  %v2355_v12 = vadd.f32 1.0, %v4331_v10  ;;  %v4333_v15 = vpop.eup %4332 }
 0x58a   :  { %4342 = vpow2.f32 %v3710_v9  ;;  %v4335_v36 = vpop.eup %4334 }
 0x58b   :  { %4344 = vrcp.f32 %v2343_v13  ;;  %v4337_v37 = vpop.eup %4336  ;;  %v2368_v38 = vadd.f32 1.0, %v4335_v36 }
 0x58c   :  { %4346 = vrcp.f32 %v2355_v12 }
 0x58d   :  { %4348 = vrcp.f32 %v2368_v38 }
 0x592   :  { %v4339_v40 = vpop.eup %4338 }
 0x593   :  { %v4341_v18 = vpop.eup %4340  ;;  %v2376_v14 = vmul.f32 %v4339_v40, %v4333_v15 }
 0x594   :  { %v4343_v20 = vpop.eup %4342  ;;  %v2374_v21 = vmul.f32 %v4341_v18, %v4970_v25 }
 0x595   :  { %v4345_v19 = vpop.eup %4344  ;;  %v2369_v29 = vadd.f32 1.0, %v4343_v20 }
 0x596   :  { %v5023_v23 = vadd.f32 %v2376_v14, %v2374_v21  ;;  %v2377_v26 = vmul.f32 %v4345_v19, %v4337_v37  ;;  %v4347_v27 = vpop.eup %4346 }
 0x597   :  { %v2375_v30 = vmul.f32 %v4347_v27, %v4974_v24  ;;  %v4349_v31 = vpop.eup %4348 }
 0x598   :  { %4350 = vtanh.f32 %v5023_v23 }
 0x599   :  { %v5027_v32 = vadd.f32 %v2377_v26, %v2375_v30  ;;  %4352 = vrcp.f32 %v2369_v29 }
 0x59b   :  { %4354 = vtanh.f32 %v5027_v32 }
 0x5a2   :  { %v4351_v22 = vpop.eup %4350 }
 0x5a3   :  { %v4353_v25 = vpop.eup %4352  ;;  %v2382_v43 = vmul.f32 %v4351_v22, %v4349_v31 }
 0x5a5   :  { %v4355_v35 = vpop.eup %4354 }
 0x5a6   :  { %v2383_v9 = vmul.f32 %v4355_v35, %v4353_v25 }
 0x5a8   :  { %v2384_v11 = vpack.c.bf16 %v2383_v9, %v2382_v43 }
 0x5aa   :  { %3900 = vst [vmem:[%s5150_s4 + $0x20] sm:$0xff] %v2384_v11   ;;  %2629 = vmatmul.mubr.bf16.vlgmr.msra.gmra.mrb[20].mxu0 %v2384_v11  ;;  %2672 = vmatmul.mubr.bf16.vlgmr.msra.gmra.mrb[20].mxu1 %v2384_v11 }
 0x5ab   :  { %2951 = vmatpush1.bf16.msra.mxu0 %v4828_v39  ;;  %2994 = vmatpush1.bf16.msra.mxu1 %v4877_v52 }
 0x5ac   :  { %2952 = vmatprep.subr.bf16.mxu0 %v4832_v42  ;;  %2995 = vmatprep.subr.bf16.mxu1 %v4881_v41 }
 0x5ad   :  { %2982 = vmatprep.mubr.bf16.mxu0 %v4504_v0  ;;  %3025 = vmatprep.mubr.bf16.mxu1 %v4504_v0 }
 0x5af   :  { %2953 = vmatpush1.bf16.msra.mxu0 %v4834_v46  ;;  %2996 = vmatpush1.bf16.msra.mxu1 %v4883_v44 }
 0x5b0   :  { %2954 = vmatprep.subr.bf16.mxu0 %v4887_v45  ;;  %2997 = vmatprep.subr.bf16.mxu1 %v4889_v47 }
 0x5b3   :  { %2955 = vmatpush1.bf16.msra.mxu0 %v4891_v48  ;;  %2998 = vmatpush1.bf16.msra.mxu1 %v4893_v49 }
 0x5b4   :  { %2956 = vmatprep.subr.bf16.mxu0 %v4899_v50  ;;  %2999 = vmatprep.subr.bf16.mxu1 %v4901_v51 }
 0x5b7   :  { %2957 = vmatpush1.bf16.msra.mxu0 %v4903_v53  ;;  %3000 = vmatpush1.bf16.msra.mxu1 %v4905_v54 }
 0x5b8   :  { %2958 = vmatprep.subr.bf16.mxu0 %v4911_v55  ;;  %3001 = vmatprep.subr.bf16.mxu1 %v4913_v56 }
 0x5bb   :  { %2959 = vmatpush1.bf16.msra.mxu0 %v4915_v57  ;;  %3002 = vmatpush1.bf16.msra.mxu1 %v4917_v58 }
 0x5bc   :  { %2960 = vmatprep.subr.bf16.mxu0 %v4921_v59  ;;  %3003 = vmatprep.subr.bf16.mxu1 %v4923_v60 }
 0x5bf   :  { %2961 = vmatpush1.bf16.msra.mxu0 %v4927_v62  ;;  %3004 = vmatpush1.bf16.msra.mxu1 %v4929_v63 }
 0x5c0   :  { %2962 = vmatprep.subr.bf16.mxu0 %v4933_v1  ;;  %3005 = vmatprep.subr.bf16.mxu1 %v4935_v2 }
 0x5c3   :  { %2963 = vmatpush1.bf16.msra.mxu0 %v4939_v3  ;;  %3006 = vmatpush1.bf16.msra.mxu1 %v4941_v4 }
 0x5c4   :  { %2964 = vmatprep.subr.bf16.mxu0 %v4945_v5  ;;  %3007 = vmatprep.subr.bf16.mxu1 %v4947_v7 }
 0x5c7   :  { %2965 = vmatpush1.bf16.msra.mxu0 %v4951_v6  ;;  %3008 = vmatpush1.bf16.msra.mxu1 %v4953_v8 }
 0x5c8   :  { %3347 = vmatprep.subr.bf16.mxu1 %v4875_v28 }
 0x67d   :  { %v2630_v39 = vpop.f32.mrb[20].mxu0  ;;  %v2673_v42 = vpop.f32.mrb[20].mxu1 }
 0x67e   :  { %v3924_v46 = vadd.f32 %v2630_v39, %v4732_v16  ;;  %v2632_v24 = vpop.f32.mrb[21].mxu0  ;;  %v2675_v34 = vpop.f32.mrb[21].mxu1  ;;  %v3956_v19 = vadd.f32 %v2673_v42, %v4742_v61 }
 0x67f   :  { %v3925_v13 = vadd.f32 %v2632_v24, %v4734_v17  ;;  %v2634_v10 = vpop.f32.mrb[22].mxu0  ;;  %v2677_v12 = vpop.f32.mrb[22].mxu1  ;;  %v3957_v21 = vadd.f32 %v2675_v34, %v4739_v33 }
 0x680   :  { %v3747_v15 = vmul.f32 -1.442695, %v3924_v46  ;;  %v3926_v36 = vadd.f32 %v2634_v10, %v4732_v16  ;;  %v2636_v37 = vpop.f32.mrb[23].mxu0  ;;  %v2679_v40 = vpop.f32.mrb[23].mxu1  ;;  %v3958_v27 = vadd.f32 %v2677_v12, %v4742_v61 }
 0x681   :  { %v3749_v18 = vmul.f32 -1.442695, %v3925_v13  ;;  %v3927_v14 = vadd.f32 %v2636_v37, %v4734_v17  ;;  %v3751_v38 = vmul.f32 -1.442695, %v3957_v21  ;;  %v3959_v26 = vadd.f32 %v2679_v40, %v4739_v33 }
 0x682   :  { %4356 = vpow2.f32 %v3747_v15  ;;  %v3748_v28 = vmul.f32 -1.442695, %v3926_v36 }
 0x683   :  { %4358 = vpow2.f32 %v3749_v18  ;;  %v3750_v20 = vmul.f32 -1.442695, %v3927_v14  ;;  %v3752_v22 = vmul.f32 -1.442695, %v3959_v26 }
 0x684   :  { %4360 = vpow2.f32 %v3748_v28 }
 0x685   :  { %4362 = vpow2.f32 %v3750_v20 }
 0x686   :  { %4364 = vtanh.f32 %v3956_v19 }
 0x687   :  { %4366 = vpow2.f32 %v3751_v38 }
 0x688   :  { %4368 = vtanh.f32 %v3958_v27 }
 0x68c   :  { %v4357_v29 = vpop.eup %4356 }
 0x68d   :  { %v4359_v30 = vpop.eup %4358  ;;  %v2696_v31 = vadd.f32 1.0, %v4357_v29 }
 0x68e   :  { %v2708_v25 = vadd.f32 1.0, %v4359_v30  ;;  %v4361_v35 = vpop.eup %4360 }
 0x68f   :  { %4370 = vrcp.f32 %v2696_v31  ;;  %v2697_v43 = vadd.f32 1.0, %v4361_v35  ;;  %v4363_v9 = vpop.eup %4362 }
 0x690   :  { %4372 = vrcp.f32 %v2708_v25  ;;  %v2709_v11 = vadd.f32 1.0, %v4363_v9  ;;  %v4365_v39 = vpop.eup %4364 }
 0x691   :  { %4374 = vpow2.f32 %v3752_v22  ;;  %v4367_v42 = vpop.eup %4366 }
 0x692   :  { %4376 = vrcp.f32 %v2697_v43  ;;  %v4369_v46 = vpop.eup %4368  ;;  %v2722_v36 = vadd.f32 1.0, %v4367_v42 }
 0x693   :  { %4378 = vrcp.f32 %v2709_v11 }
 0x694   :  { %4380 = vrcp.f32 %v2722_v36 }
 0x699   :  { %v4371_v24 = vpop.eup %4370 }
 0x69a   :  { %v4373_v34 = vpop.eup %4372  ;;  %v2730_v13 = vmul.f32 %v4371_v24, %v4365_v39 }
 0x69b   :  { %v4375_v10 = vpop.eup %4374  ;;  %v2728_v12 = vmul.f32 %v4373_v34, %v5023_v23 }
 0x69c   :  { %v4377_v15 = vpop.eup %4376  ;;  %v2723_v14 = vadd.f32 1.0, %v4375_v10 }
 0x69d   :  { %v5075_v37 = vadd.f32 %v2730_v13, %v2728_v12  ;;  %v2731_v40 = vmul.f32 %v4377_v15, %v4369_v46  ;;  %v4379_v18 = vpop.eup %4378 }
 0x69e   :  { %v2729_v28 = vmul.f32 %v4379_v18, %v5027_v32  ;;  %v4381_v21 = vpop.eup %4380 }
 0x69f   :  { %4382 = vtanh.f32 %v5075_v37 }
 0x6a0   :  { %v5079_v20 = vadd.f32 %v2731_v40, %v2729_v28  ;;  %4384 = vrcp.f32 %v2723_v14 }
 0x6a2   :  { %4386 = vtanh.f32 %v5079_v20 }
 0x6a9   :  { %v4383_v19 = vpop.eup %4382 }
 0x6aa   :  { %v4385_v23 = vpop.eup %4384  ;;  %v2736_v26 = vmul.f32 %v4383_v19, %v4381_v21 }
 0x6ac   :  { %v4387_v38 = vpop.eup %4386 }
 0x6ad   :  { %v2737_v27 = vmul.f32 %v4387_v38, %v4385_v23 }
 0x6af   :  { %v2738_v29 = vpack.c.bf16 %v2737_v27, %v2736_v26 }
 0x6b1   :  { %3901 = vst [vmem:[%s5150_s4 + $0x28] sm:$0xff] %v2738_v29   ;;  %2983 = vmatmul.mubr.bf16.vlgmr.msra.gmra.mrb[24].mxu0 %v2738_v29  ;;  %3026 = vmatmul.mubr.bf16.vlgmr.msra.gmra.mrb[24].mxu1 %v2738_v29 }
 0x6b2   :  { %3348 = vmatpush1.bf16.msra.mxu1 %v4877_v52  ;;  %3336 = vmatprep.mubr.bf16.mxu0 %v4504_v0  ;;  %v4190_v52 = vld [vmem:[#allocation7] ss:$16 sps:$4 sm:$0xff]  }
 0x6b3   :  { %3349 = vmatprep.subr.bf16.mxu1 %v4881_v41  ;;  %3379 = vmatprep.mubr.bf16.mxu1 %v4504_v0  ;;  %v4192_v0 = vld [vmem:[#allocation7 + $0x4] ss:$16 sps:$4 sm:$0xff]  }
 0x6b4   :  { %3304 = vmatprep.subr.bf16.mxu0 %v4192_v0  ;;  %v4195_v41 = vld [vmem:[#allocation7 + $0x24] ss:$16 sps:$4 sm:$0xff]  }
 0x6b5   :  { %3305 = vmatpush1.bf16.msra.mxu0 %v4190_v52 }
 0x6b6   :  { %3350 = vmatpush1.bf16.msra.mxu1 %v4883_v44  ;;  %v4193_v44 = vld [vmem:[#allocation7 + $0x20] ss:$16 sps:$4 sm:$0xff]   ;;  %3306 = vmatprep.subr.bf16.mxu0 %v4195_v41 }
 0x6b7   :  { %3351 = vmatprep.subr.bf16.mxu1 %v4889_v47 }
 0x6b9   :  { %3307 = vmatpush1.bf16.msra.mxu0 %v4193_v44 }
 0x6ba   :  { %3352 = vmatpush1.bf16.msra.mxu1 %v4893_v49  ;;  %3308 = vmatprep.subr.bf16.mxu0 %v4887_v45 }
 0x6bb   :  { %3353 = vmatprep.subr.bf16.mxu1 %v4901_v51 }
 0x6bd   :  { %3309 = vmatpush1.bf16.msra.mxu0 %v4891_v48 }
 0x6be   :  { %3354 = vmatpush1.bf16.msra.mxu1 %v4905_v54  ;;  %3310 = vmatprep.subr.bf16.mxu0 %v4899_v50 }
 0x6bf   :  { %3355 = vmatprep.subr.bf16.mxu1 %v4913_v56 }
 0x6c1   :  { %3311 = vmatpush1.bf16.msra.mxu0 %v4903_v53 }
 0x6c2   :  { %3356 = vmatpush1.bf16.msra.mxu1 %v4917_v58  ;;  %3312 = vmatprep.subr.bf16.mxu0 %v4911_v55 }
 0x6c3   :  { %3357 = vmatprep.subr.bf16.mxu1 %v4923_v60 }
 0x6c5   :  { %3313 = vmatpush1.bf16.msra.mxu0 %v4915_v57 }
 0x6c6   :  { %3358 = vmatpush1.bf16.msra.mxu1 %v4929_v63  ;;  %3314 = vmatprep.subr.bf16.mxu0 %v4921_v59 }
 0x6c7   :  { %3359 = vmatprep.subr.bf16.mxu1 %v4935_v2 }
 0x6c9   :  { %3315 = vmatpush1.bf16.msra.mxu0 %v4927_v62 }
 0x6ca   :  { %3360 = vmatpush1.bf16.msra.mxu1 %v4941_v4  ;;  %3316 = vmatprep.subr.bf16.mxu0 %v4933_v1 }
 0x6cb   :  { %3361 = vmatprep.subr.bf16.mxu1 %v4947_v7 }
 0x6cd   :  { %3317 = vmatpush1.bf16.msra.mxu0 %v4939_v3 }
 0x6ce   :  { %3362 = vmatpush1.bf16.msra.mxu1 %v4953_v8  ;;  %3318 = vmatprep.subr.bf16.mxu0 %v4945_v5 }
 0x6d1   :  { %3319 = vmatpush1.bf16.msra.mxu0 %v4951_v6 }
 0x784   :  { %v2984_v45 = vpop.f32.mrb[24].mxu0  ;;  %v3027_v47 = vpop.f32.mrb[24].mxu1 }
 0x785   :  { %v3928_v48 = vadd.f32 %v2984_v45, %v4732_v16  ;;  %v2986_v49 = vpop.f32.mrb[25].mxu0  ;;  %v3029_v50 = vpop.f32.mrb[25].mxu1  ;;  %v3960_v2 = vadd.f32 %v3027_v47, %v4742_v61 }
 0x786   :  { %v3929_v51 = vadd.f32 %v2986_v49, %v4734_v17  ;;  %v2988_v53 = vpop.f32.mrb[26].mxu0  ;;  %v3031_v54 = vpop.f32.mrb[26].mxu1  ;;  %v3961_v1 = vadd.f32 %v3029_v50, %v4739_v33 }
 0x787   :  { %v3789_v55 = vmul.f32 -1.442695, %v3928_v48  ;;  %v3930_v56 = vadd.f32 %v2988_v53, %v4732_v16  ;;  %v2990_v57 = vpop.f32.mrb[27].mxu0  ;;  %v3033_v58 = vpop.f32.mrb[27].mxu1  ;;  %v3962_v5 = vadd.f32 %v3031_v54, %v4742_v61 }
 0x788   :  { %v3791_v59 = vmul.f32 -1.442695, %v3929_v51  ;;  %v3931_v60 = vadd.f32 %v2990_v57, %v4734_v17  ;;  %v3793_v3 = vmul.f32 -1.442695, %v3961_v1  ;;  %v3963_v4 = vadd.f32 %v3033_v58, %v4739_v33 }
 0x789   :  { %4388 = vpow2.f32 %v3789_v55  ;;  %v3790_v62 = vmul.f32 -1.442695, %v3930_v56 }
 0x78a   :  { %4390 = vpow2.f32 %v3791_v59  ;;  %v3792_v63 = vmul.f32 -1.442695, %v3931_v60  ;;  %v3794_v32 = vmul.f32 -1.442695, %v3963_v4 }
 0x78b   :  { %4392 = vpow2.f32 %v3790_v62 }
 0x78c   :  { %4394 = vpow2.f32 %v3792_v63 }
 0x78d   :  { %4396 = vtanh.f32 %v3960_v2 }
 0x78e   :  { %4398 = vpow2.f32 %v3793_v3 }
 0x78f   :  { %4400 = vtanh.f32 %v3962_v5 }
 0x793   :  { %v4389_v7 = vpop.eup %4388 }
 0x794   :  { %v4391_v6 = vpop.eup %4390  ;;  %v3050_v8 = vadd.f32 1.0, %v4389_v7 }
 0x795   :  { %v3062_v30 = vadd.f32 1.0, %v4391_v6  ;;  %v4393_v31 = vpop.eup %4392 }
 0x796   :  { %4402 = vrcp.f32 %v3050_v8  ;;  %v3051_v22 = vadd.f32 1.0, %v4393_v31  ;;  %v4395_v25 = vpop.eup %4394 }
 0x797   :  { %4404 = vrcp.f32 %v3062_v30  ;;  %v3063_v35 = vadd.f32 1.0, %v4395_v25  ;;  %v4397_v43 = vpop.eup %4396 }
 0x798   :  { %4406 = vpow2.f32 %v3794_v32  ;;  %v4399_v9 = vpop.eup %4398 }
 0x799   :  { %4408 = vrcp.f32 %v3051_v22  ;;  %v4401_v11 = vpop.eup %4400  ;;  %v3076_v10 = vadd.f32 1.0, %v4399_v9 }
 0x79a   :  { %4410 = vrcp.f32 %v3063_v35 }
 0x79b   :  { %4412 = vrcp.f32 %v3076_v10 }
 0x7a0   :  { %v4403_v39 = vpop.eup %4402 }
 0x7a1   :  { %v4405_v42 = vpop.eup %4404  ;;  %v3084_v46 = vmul.f32 %v4403_v39, %v4397_v43 }
 0x7a2   :  { %v4407_v24 = vpop.eup %4406  ;;  %v3082_v34 = vmul.f32 %v4405_v42, %v5075_v37 }
 0x7a3   :  { %v4409_v13 = vpop.eup %4408  ;;  %v3077_v40 = vadd.f32 1.0, %v4407_v24 }
 0x7a4   :  { %v5123_v12 = vadd.f32 %v3084_v46, %v3082_v34  ;;  %v3085_v15 = vmul.f32 %v4409_v13, %v4401_v11  ;;  %v4411_v36 = vpop.eup %4410 }
 0x7a5   :  { %v3083_v18 = vmul.f32 %v4411_v36, %v5079_v20  ;;  %v4413_v28 = vpop.eup %4412 }
 0x7a6   :  { %4414 = vtanh.f32 %v5123_v12 }
 0x7a7   :  { %v5127_v14 = vadd.f32 %v3085_v15, %v3083_v18  ;;  %4416 = vrcp.f32 %v3077_v40 }
 0x7a9   :  { %4418 = vtanh.f32 %v5127_v14 }
 0x7b0   :  { %v4415_v21 = vpop.eup %4414 }
 0x7b1   :  { %v4417_v37 = vpop.eup %4416  ;;  %v3090_v23 = vmul.f32 %v4415_v21, %v4413_v28 }
 0x7b3   :  { %v4419_v19 = vpop.eup %4418 }
 0x7b4   :  { %v3091_v38 = vmul.f32 %v4419_v19, %v4417_v37 }
 0x7b6   :  { %v3092_v26 = vpack.c.bf16 %v3091_v38, %v3090_v23 }
 0x7b8   :  { %3902 = vst [vmem:[%s5150_s4 + $0x30] sm:$0xff] %v3092_v26   ;;  %3337 = vmatmul.mubr.bf16.vlgmr.msra.gmra.mrb[28].mxu0 %v3092_v26  ;;  %3380 = vmatmul.mubr.bf16.vlgmr.msra.gmra.mrb[28].mxu1 %v3092_v26 }
 0x88b   :  { %v3338_v20 = vpop.f32.mrb[28].mxu0  ;;  %v3381_v27 = vpop.f32.mrb[28].mxu1 }
 0x88c   :  { %v3932_v29 = vadd.f32 %v3338_v20, %v4732_v16  ;;  %v3340_v0 = vpop.f32.mrb[29].mxu0  ;;  %v3383_v52 = vpop.f32.mrb[29].mxu1  ;;  %v3964_v57 = vadd.f32 %v3381_v27, %v4742_v61 }
 0x88d   :  { %v3933_v41 = vadd.f32 %v3340_v0, %v4734_v17  ;;  %v3342_v44 = vpop.f32.mrb[30].mxu0  ;;  %v3385_v45 = vpop.f32.mrb[30].mxu1  ;;  %v3965_v56 = vadd.f32 %v3383_v52, %v4739_v33 }
 0x88e   :  { %v3831_v47 = vmul.f32 -1.442695, %v3932_v29  ;;  %v3934_v48 = vadd.f32 %v3342_v44, %v4732_v16  ;;  %v3344_v49 = vpop.f32.mrb[31].mxu0  ;;  %v3387_v50 = vpop.f32.mrb[31].mxu1  ;;  %v3966_v16 = vadd.f32 %v3385_v45, %v4742_v61 }
 0x88f   :  { %v3833_v51 = vmul.f32 -1.442695, %v3933_v41  ;;  %v3935_v53 = vadd.f32 %v3344_v49, %v4734_v17  ;;  %v3835_v58 = vmul.f32 -1.442695, %v3965_v56  ;;  %v3967_v59 = vadd.f32 %v3387_v50, %v4739_v33 }
 0x890   :  { %4420 = vpow2.f32 %v3831_v47  ;;  %v3832_v54 = vmul.f32 -1.442695, %v3934_v48 }
 0x891   :  { %4422 = vpow2.f32 %v3833_v51  ;;  %v3834_v55 = vmul.f32 -1.442695, %v3935_v53  ;;  %v3836_v17 = vmul.f32 -1.442695, %v3967_v59 }
 0x892   :  { %4424 = vpow2.f32 %v3832_v54 }
 0x893   :  { %4426 = vpow2.f32 %v3834_v55 }
 0x894   :  { %4428 = vtanh.f32 %v3964_v57 }
 0x895   :  { %4430 = vpow2.f32 %v3835_v58 }
 0x896   :  { %4432 = vtanh.f32 %v3966_v16 }
 0x89a   :  { %v4421_v60 = vpop.eup %4420 }
 0x89b   :  { %v4423_v62 = vpop.eup %4422  ;;  %v3404_v63 = vadd.f32 1.0, %v4421_v60 }
 0x89c   :  { %v3416_v1 = vadd.f32 1.0, %v4423_v62  ;;  %v4425_v2 = vpop.eup %4424 }
 0x89d   :  { %4434 = vrcp.f32 %v3404_v63  ;;  %v3405_v3 = vadd.f32 1.0, %v4425_v2  ;;  %v4427_v4 = vpop.eup %4426 }
 0x89e   :  { %4436 = vrcp.f32 %v3416_v1  ;;  %v3417_v5 = vadd.f32 1.0, %v4427_v4  ;;  %v4429_v33 = vpop.eup %4428 }
 0x89f   :  { %4438 = vpow2.f32 %v3836_v17  ;;  %v4431_v7 = vpop.eup %4430 }
 0x8a0   :  { %4440 = vrcp.f32 %v3405_v3  ;;  %v4433_v61 = vpop.eup %4432  ;;  %v3430_v30 = vadd.f32 1.0, %v4431_v7 }
 0x8a1   :  { %4442 = vrcp.f32 %v3417_v5 }
 0x8a2   :  { %4444 = vrcp.f32 %v3430_v30 }
 0x8a7   :  { %v4435_v6 = vpop.eup %4434 }
 0x8a8   :  { %v4437_v8 = vpop.eup %4436  ;;  %v3438_v32 = vmul.f32 %v4435_v6, %v4429_v33 }
 0x8a9   :  { %v4439_v31 = vpop.eup %4438  ;;  %v3436_v22 = vmul.f32 %v4437_v8, %v5123_v12 }
 0x8aa   :  { %v4441_v25 = vpop.eup %4440  ;;  %v3431_v11 = vadd.f32 1.0, %v4439_v31 }
 0x8ab   :  { %v3440_v35 = vadd.f32 %v3438_v32, %v3436_v22  ;;  %v3439_v43 = vmul.f32 %v4441_v25, %v4433_v61  ;;  %v4443_v9 = vpop.eup %4442 }
 0x8ac   :  { %v3437_v39 = vmul.f32 %v4443_v9, %v5127_v14  ;;  %v4445_v46 = vpop.eup %4444 }
 0x8ad   :  { %4446 = vtanh.f32 %v3440_v35 }
 0x8ae   :  { %v3441_v42 = vadd.f32 %v3439_v43, %v3437_v39  ;;  %4448 = vrcp.f32 %v3431_v11 }
 0x8b0   :  { %4450 = vtanh.f32 %v3441_v42 }
 0x8b7   :  { %v4447_v24 = vpop.eup %4446 }
 0x8b8   :  { %v3444_v34 = vmul.f32 %v4447_v24, %v4445_v46  ;;  %v4449_v13 = vpop.eup %4448 }
 0x8ba   :  { %v4451_v10 = vpop.eup %4450 }
 0x8bb   :  { %v3445_v15 = vmul.f32 %v4451_v10, %v4449_v13 }
 0x8bd   :  { %v3895_v36 = vpack.c.bf16 %v3445_v15, %v3444_v34 }
 0x8bf   :  { %3903 = vst [vmem:[%s5150_s4 + $0x38] sm:$0xff] %v3895_v36  }
 0x8c0   :  { %3465 = vsyncpa [#allocation6], 1 }
 0x8c1   :  { %3466 = vsyncpa [#allocation8], 1 }

</bundles_post_ra>
